<compile_context>
chip_gen: v7x
topology: tpu7x:2x2x1
jax: 0.10.0
libtpu: 0.0.40
codegen_flags: <defaults>
</compile_context>

<pallas_src>
import jax
import jax.numpy as jnp
from jax.experimental import pallas as pl
from jax.experimental.pallas import tpu as pltpu

NUM_CLASSES = 9
H = 32            # LSTM hidden size
NUM_LAYERS = 3    # LSTM layers (bidirectional)
C_IN = 224        # conv1 input channels (fixed by the module)
C_PAD = 256       # conv1 input channels zero-padded to a clean MXU K


def _pick_block_b(B):
    """Samples per grid block: >=2 blocks when possible (feeds v7x's 2 TCs)."""
    for bb in (8, 4, 2, 1):
        if B % bb == 0 and B // bb >= 2:
            return bb
    return 1


# ----------------------------------------------------------------------------
# Fused kernel (one grid step = one batch block of BB samples):
#   Conv1d(224->32,k4,s2,p1) -> BN -> ReLU -> MaxPool(2,2)
#   -> Conv1d(32->64,k3,s1,p1) -> BN -> ReLU -> MaxPool(3,1,1) -> ReLU
#   -> 3-layer bidirectional LSTM -> Linear(64 -> num_classes)
# Activation rows are time-major within the block: row = t*BB + b_local.
# ----------------------------------------------------------------------------
def _fused_kernel(T, BB):
    M = T * BB
    G = 8 * H                                   # 256 fused gate lanes

    def kernel(q01_ref, q23_ref, wA_ref, wB_ref, s1_ref, t1_ref,
               w2_ref, s2_ref, t2_ref,
               wih_ref, b_ref, whh_ref, fcw_ref, fcb_ref,
               y_ref, fst_ref, logits_ref,
               p2_scr, p3_scr, cur_scr, gx_scr, h_scr):
        # ------------------------- conv stack -------------------------
        # Conv1 fused with MaxPool(2,2): two K=512, N=64 bf16 matmuls.
        rA = jnp.dot(q01_ref[0], wA_ref[...],
                     preferred_element_type=jnp.float32)        # ((T+1)*BB, 64)
        rB = jnp.dot(q23_ref[0], wB_ref[...],
                     preferred_element_type=jnp.float32)        # (M, 64)
        e = rA[0:M, 0:32] + rB[:, 0:32]          # conv1 outputs at even times
        o = rA[BB:M + BB, 32:64] + rB[:, 32:64]  # conv1 outputs at odd times
        # conv bias folded into t1; BatchNorm1d(eval) + ReLU; pool = max of pair.
        e = jnp.maximum(e * s1_ref[...] + t1_ref[...], 0.0)
        o = jnp.maximum(o * s1_ref[...] + t1_ref[...], 0.0)
        h1 = jnp.maximum(e, o)                                   # (M, 32)

        # Conv1d(32->64,k3,s1,p1): zero-pad one timestep (= BB rows) each end.
        p2_scr[0:BB, :] = jnp.zeros((BB, 32), jnp.float32)
        p2_scr[M + BB:M + 2 * BB, :] = jnp.zeros((BB, 32), jnp.float32)
        p2_scr[BB:M + BB, :] = h1
        h2 = jnp.dot(p2_scr[0:M, :], w2_ref[0],
                     preferred_element_type=jnp.float32)
        h2 += jnp.dot(p2_scr[BB:M + BB, :], w2_ref[1],
                      preferred_element_type=jnp.float32)
        h2 += jnp.dot(p2_scr[2 * BB:M + 2 * BB, :], w2_ref[2],
                      preferred_element_type=jnp.float32)
        h2 = jnp.maximum(h2 * s2_ref[...] + t2_ref[...], 0.0)    # (M, 64), >= 0

        # MaxPool1d(3,1,1) + final ReLU.  h2 >= 0, so zero padding is exactly
        # equivalent to -inf padding followed by ReLU.
        p3_scr[0:BB, :] = jnp.zeros((BB, 64), jnp.float32)
        p3_scr[M + BB:M + 2 * BB, :] = jnp.zeros((BB, 64), jnp.float32)
        p3_scr[BB:M + BB, :] = h2
        y_val = jnp.maximum(jnp.maximum(p3_scr[0:M, :], p3_scr[BB:M + BB, :]),
                            p3_scr[2 * BB:M + 2 * BB, :])        # (M, 64)
        y_ref[0] = y_val

        # ----------------- 3-layer bidirectional LSTM -----------------
        # Gate columns: [i_f,i_b,f_f,f_b,o_f,o_b,g_f,g_b] (32 lanes each), so
        # sigmoid covers lanes [0:6H] and tanh covers [6H:8H]; each gate slice
        # is a contiguous 64-lane [fwd|bwd] pair aligned with the state layout.
        for layer in range(NUM_LAYERS):
            src = y_val if layer == 0 else cur_scr[...]
            # Hoisted input projection, both directions in one bf16 matmul.
            # Columns 0:G are forward-only gate pre-activations (+ both biases),
            # columns G:2G are backward-only, so the per-step fwd/bwd merge is a
            # plain add of two rows (no select on the recurrence chain).
            gx_scr[...] = (jnp.dot(src.astype(jnp.bfloat16), wih_ref[layer],
                                   preferred_element_type=jnp.float32)
                           + b_ref[layer])
            whh_l = whh_ref[layer]               # (64, 256) block-diagonal, f32

            h = jnp.zeros((BB, 2 * H), jnp.float32)   # [h_fwd | h_bwd]
            c = jnp.zeros((BB, 2 * H), jnp.float32)
            # Fully unrolled: T and BB are static and small; batch scaling goes
            # to the (parallel) grid, not to this unroll.
            for i in range(T):
                rf = i * BB                      # forward-time row offset
                rb = (T - 1 - i) * BB            # backward-time row offset
                gx = gx_scr[rf:rf + BB, 0:G] + gx_scr[rb:rb + BB, G:2 * G]
                gates = gx + jnp.dot(h, whh_l,
                                     preferred_element_type=jnp.float32)
                sg = jax.nn.sigmoid(gates[:, 0:6 * H])
                gg = jnp.tanh(gates[:, 6 * H:8 * H])
                c = sg[:, 2 * H:4 * H] * c + sg[:, 0:2 * H] * gg
                h = sg[:, 4 * H:6 * H] * jnp.tanh(c)
                h_scr[rf:rf + BB, :] = h         # one full-width store per step

            # Layer output: fwd half already time-aligned; reverse the bwd half
            # once per layer (off the serial chain).
            cur_scr[:, 0:H] = h_scr[:, 0:H]
            for i in range(T):
                cur_scr[(T - 1 - i) * BB:(T - i) * BB, H:2 * H] = \
                    h_scr[i * BB:(i + 1) * BB, H:2 * H]

        # --------------------------- FC head ---------------------------
        f_st = cur_scr[(T - 1) * BB:T * BB, :]   # out[:, -1, :]  (BB, 64)
        fst_ref[0] = f_st
        logits_ref[0] = (jnp.dot(f_st, fcw_ref[...],
                                 preferred_element_type=jnp.float32)
                         + fcb_ref[...])
    return kernel


# ----------------------------------------------------------------------------
# Parameter init (deterministic, synthetic, PyTorch layouts)
# ----------------------------------------------------------------------------
def init_params(key):
    ks = jax.random.split(key, 16)
    p = {}
    p["conv1_w"] = 0.05 * jax.random.normal(ks[0], (32, C_IN, 4), jnp.float32)
    p["conv1_b"] = 0.05 * jax.random.normal(ks[1], (32,), jnp.float32)
    p["bn1_g"] = 1.0 + 0.1 * jax.random.normal(ks[2], (32,), jnp.float32)
    p["bn1_b"] = 0.1 * jax.random.normal(ks[3], (32,), jnp.float32)
    p["bn1_rm"] = 0.1 * jax.random.normal(ks[4], (32,), jnp.float32)
    p["bn1_rv"] = 1.0 + 0.1 * jax.random.uniform(ks[5], (32,), jnp.float32)
    p["conv2_w"] = 0.05 * jax.random.normal(ks[6], (64, 32, 3), jnp.float32)
    p["conv2_b"] = 0.05 * jax.random.normal(ks[7], (64,), jnp.float32)
    p["bn2_g"] = 1.0 + 0.1 * jax.random.normal(ks[8], (64,), jnp.float32)
    p["bn2_b"] = 0.1 * jax.random.normal(ks[9], (64,), jnp.float32)
    p["bn2_rm"] = 0.1 * jax.random.normal(ks[10], (64,), jnp.float32)
    p["bn2_rv"] = 1.0 + 0.1 * jax.random.uniform(ks[11], (64,), jnp.float32)

    # LSTM (PyTorch layout): input size is 64 (=2H) for every layer.
    lk = jax.random.split(ks[12], NUM_LAYERS * 2 * 4)
    wih_all, whh_all, bih_all, bhh_all = [], [], [], []
    idx = 0
    for _layer in range(NUM_LAYERS):
        wih_d, whh_d, bih_d, bhh_d = [], [], [], []
        for _d in range(2):
            wih_d.append(0.1 * jax.random.normal(lk[idx], (4 * H, 2 * H), jnp.float32)); idx += 1
            whh_d.append(0.1 * jax.random.normal(lk[idx], (4 * H, H), jnp.float32)); idx += 1
            bih_d.append(0.1 * jax.random.normal(lk[idx], (4 * H,), jnp.float32)); idx += 1
            bhh_d.append(0.1 * jax.random.normal(lk[idx], (4 * H,), jnp.float32)); idx += 1
        wih_all.append(jnp.stack(wih_d)); whh_all.append(jnp.stack(whh_d))
        bih_all.append(jnp.stack(bih_d)); bhh_all.append(jnp.stack(bhh_d))
    p["lstm_w_ih"] = jnp.stack(wih_all)   # (3, 2, 128, 64)
    p["lstm_w_hh"] = jnp.stack(whh_all)   # (3, 2, 128, 32)
    p["lstm_b_ih"] = jnp.stack(bih_all)   # (3, 2, 128)
    p["lstm_b_hh"] = jnp.stack(bhh_all)   # (3, 2, 128)

    p["fc_w"] = 0.1 * jax.random.normal(ks[13], (NUM_CLASSES, 2 * H), jnp.float32)
    p["fc_b"] = 0.1 * jax.random.normal(ks[14], (NUM_CLASSES,), jnp.float32)
    return p


def _fuse_lstm_params(p):
    """Reorder PyTorch LSTM weights into fused per-layer tensors.

    Gate columns are ordered [i_f,i_b,f_f,f_b,o_f,o_b,g_f,g_b] (32 lanes each).
    wih_cat has 512 columns: 0:256 project only the forward direction (+ both
    biases), 256:512 only the backward direction; whh is per-gate
    block-diagonal so both directions recur in one (BB,64)x(64,256) matmul.
    """
    perm = jnp.array([0, 1, 3, 2])    # PyTorch gate order i,f,g,o -> i,f,o,g
    wih_l, whh_l, b_l = [], [], []
    for l in range(NUM_LAYERS):
        def gate_cols(w):             # (4H, in) -> (in, 4, H) in order i,f,o,g
            return jnp.transpose(w, (1, 0)).reshape(-1, 4, H)[:, perm, :]

        wf = gate_cols(p["lstm_w_ih"][l, 0])     # (2H, 4, H)
        wb = gate_cols(p["lstm_w_ih"][l, 1])
        z = jnp.zeros_like(wf)
        wihA = jnp.stack([wf, z], axis=2).reshape(2 * H, 8 * H)   # fwd-only cols
        wihB = jnp.stack([z, wb], axis=2).reshape(2 * H, 8 * H)   # bwd-only cols
        wih_cat = jnp.concatenate([wihA, wihB], axis=1)           # (64, 512)

        uf = gate_cols(p["lstm_w_hh"][l, 0])     # (H, 4, H)
        ub = gate_cols(p["lstm_w_hh"][l, 1])
        zu = jnp.zeros_like(uf)
        whh = jnp.concatenate(
            [jnp.stack([uf, zu], axis=2).reshape(H, 8 * H),
             jnp.stack([zu, ub], axis=2).reshape(H, 8 * H)], axis=0)  # (64, 256)

        bf = (p["lstm_b_ih"][l, 0] + p["lstm_b_hh"][l, 0]).reshape(4, H)[perm]
        bb = (p["lstm_b_ih"][l, 1] + p["lstm_b_hh"][l, 1]).reshape(4, H)[perm]
        bias = jnp.stack([bf, bb], axis=1).reshape(1, 8 * H)
        b_cat = jnp.concatenate([bias, jnp.zeros_like(bias)], axis=1)  # (1, 512)

        wih_l.append(wih_cat); whh_l.append(whh); b_l.append(b_cat)
    return (jnp.stack(wih_l).astype(jnp.bfloat16),   # (3, 64, 512) bf16
            jnp.stack(whh_l),                        # (3, 64, 256) f32
            jnp.stack(b_l))                          # (3, 1, 512) f32


# ----------------------------------------------------------------------------
# Forward (glue + the single fused pallas_call)
# ----------------------------------------------------------------------------
def conv1dlstm_forward(x, p):
    # x: (B, 1, 224, L) float32
    B, _, c_in, L = x.shape
    assert c_in == C_IN and L % 4 == 0 and L >= 4
    T1 = (L + 2 - 4) // 2 + 1        # conv1 output length
    T = T1 // 2                      # after MaxPool(2,2); conv2/pool3 keep length
    BB = _pick_block_b(B)            # samples per grid block
    NB = B // BB
    M = T * BB

    # ---- glue: channel pad 224->256, time pad 1, split by position mod 4 ----
    xc = jnp.transpose(x[:, 0, :, :], (0, 2, 1))                 # (B, L, 224)
    xc = jnp.pad(xc, ((0, 0), (1, 1), (0, C_PAD - C_IN)))        # (B, L+2, 256)

    def tap(r, n):                                               # (B, n, 256)
        return xc[:, r::4, :][:, :n, :]

    q01 = jnp.concatenate([tap(0, T + 1), tap(1, T + 1)], axis=-1)  # (B, T+1, 512)
    q23 = jnp.concatenate([tap(2, T), tap(3, T)], axis=-1)          # (B, T,   512)

    def blockify(q, n):   # (B, n, 512) -> (NB, n*BB, 512), time-major per block
        q = q.reshape(NB, BB, n, 2 * C_PAD).transpose(0, 2, 1, 3)
        return q.reshape(NB, n * BB, 2 * C_PAD).astype(jnp.bfloat16)

    q01 = blockify(q01, T + 1)
    q23 = blockify(q23, T)

    # Conv1 weights packed for the two fused even/odd matmuls (bf16, K=512, N=64).
    W1 = jnp.pad(jnp.transpose(p["conv1_w"], (2, 1, 0)),
                 ((0, 0), (0, C_PAD - C_IN), (0, 0)))            # (4, 256, 32)
    wA = jnp.concatenate(
        [jnp.concatenate([W1[0], W1[2]], axis=1),
         jnp.concatenate([W1[1], W1[3]], axis=1)], axis=0).astype(jnp.bfloat16)
    wB = jnp.concatenate(
        [jnp.concatenate([W1[2], W1[0]], axis=1),
         jnp.concatenate([W1[3], W1[1]], axis=1)], axis=0).astype(jnp.bfloat16)

    s1v = p["bn1_g"] / jnp.sqrt(p["bn1_rv"] + 1e-5)
    s1 = s1v.reshape(1, -1)
    t1 = (p["bn1_b"] - p["bn1_rm"] * s1v + p["conv1_b"] * s1v).reshape(1, -1)
    W2 = jnp.transpose(p["conv2_w"], (2, 1, 0))                  # (3, 32, 64)
    s2v = p["bn2_g"] / jnp.sqrt(p["bn2_rv"] + 1e-5)
    s2 = s2v.reshape(1, -1)
    t2 = (p["bn2_b"] - p["bn2_rm"] * s2v + p["conv2_b"] * s2v).reshape(1, -1)

    wih_f, whh_f, b_f = _fuse_lstm_params(p)
    fc_w_t = p["fc_w"].T                                         # (64, 9)
    fc_b = p["fc_b"].reshape(1, -1)                              # (1, 9)

    y_blk, fst_blk, logit_blk = pl.pallas_call(
        _fused_kernel(T, BB),
        out_shape=(jax.ShapeDtypeStruct((NB, M, 64), jnp.float32),
                   jax.ShapeDtypeStruct((NB, BB, 2 * H), jnp.float32),
                   jax.ShapeDtypeStruct((NB, BB, NUM_CLASSES), jnp.float32)),
        grid=(NB,),
        in_specs=[
            pl.BlockSpec((1, (T + 1) * BB, 2 * C_PAD), lambda b: (b, 0, 0)),
            pl.BlockSpec((1, M, 2 * C_PAD), lambda b: (b, 0, 0)),
            pl.BlockSpec((2 * C_PAD, 64), lambda b: (0, 0)),
            pl.BlockSpec((2 * C_PAD, 64), lambda b: (0, 0)),
            pl.BlockSpec((1, 32), lambda b: (0, 0)),
            pl.BlockSpec((1, 32), lambda b: (0, 0)),
            pl.BlockSpec((3, 32, 64), lambda b: (0, 0, 0)),
            pl.BlockSpec((1, 64), lambda b: (0, 0)),
            pl.BlockSpec((1, 64), lambda b: (0, 0)),
            pl.BlockSpec((NUM_LAYERS, 2 * H, 16 * H), lambda b: (0, 0, 0)),
            pl.BlockSpec((NUM_LAYERS, 1, 16 * H), lambda b: (0, 0, 0)),
            pl.BlockSpec((NUM_LAYERS, 2 * H, 8 * H), lambda b: (0, 0, 0)),
            pl.BlockSpec((2 * H, NUM_CLASSES), lambda b: (0, 0)),
            pl.BlockSpec((1, NUM_CLASSES), lambda b: (0, 0)),
        ],
        out_specs=(pl.BlockSpec((1, M, 64), lambda b: (b, 0, 0)),
                   pl.BlockSpec((1, BB, 2 * H), lambda b: (b, 0, 0)),
                   pl.BlockSpec((1, BB, NUM_CLASSES), lambda b: (b, 0, 0))),
        scratch_shapes=[
            pltpu.VMEM(((T + 2) * BB, 32), jnp.float32),   # conv2 zero-padded input
            pltpu.VMEM(((T + 2) * BB, 64), jnp.float32),   # pool3 zero-padded input
            pltpu.VMEM((M, 2 * H), jnp.float32),           # layer activations
            pltpu.VMEM((M, 16 * H), jnp.float32),          # hoisted fwd|bwd projections
            pltpu.VMEM((M, 2 * H), jnp.float32),           # per-step hidden states
        ],
        compiler_params=pltpu.CompilerParams(
            dimension_semantics=("parallel",),
            vmem_limit_bytes=32 * 1024 * 1024),
    )(q01, q23, wA, wB, s1, t1, W2, s2, t2, wih_f, b_f, whh_f, fc_w_t, fc_b)

    # Unpack batch blocks back to the PyTorch return layout.
    y = y_blk.reshape(NB, T, BB, 64).transpose(0, 2, 1, 3).reshape(B, T, 64)
    f_st = fst_blk.reshape(B, 2 * H)
    logits = logit_blk.reshape(B, NUM_CLASSES)
    return logits, f_st, y


if __name__ == "__main__":
    key = jax.random.PRNGKey(0)
    kx, kp = jax.random.split(key)
    B, L = 2, 32
    x = jax.random.normal(kx, (B, 1, C_IN, L), jnp.float32)
    params = init_params(kp)

    logits, f_st, y = jax.jit(conv1dlstm_forward)(x, params)
    jax.block_until_ready((logits, f_st, y))

    assert logits.shape == (B, NUM_CLASSES)
    assert f_st.shape == (B, 2 * H)
    assert y.shape == (B, L // 4, 64)
    print("KERNEL_OK")
</pallas_src>

<mosaic_0001>
module attributes {stable_mosaic.version = 11 : i64} {
  func.func @kernel(%arg0: i32, %arg1: memref<1x9x512xbf16, #tpu.memory_space<vmem>>, %arg2: memref<1x8x512xbf16, #tpu.memory_space<vmem>>, %arg3: memref<512x64xbf16, #tpu.memory_space<vmem>>, %arg4: memref<512x64xbf16, #tpu.memory_space<vmem>>, %arg5: memref<1x32xf32, #tpu.memory_space<vmem>>, %arg6: memref<1x32xf32, #tpu.memory_space<vmem>>, %arg7: memref<3x32x64xf32, #tpu.memory_space<vmem>>, %arg8: memref<1x64xf32, #tpu.memory_space<vmem>>, %arg9: memref<1x64xf32, #tpu.memory_space<vmem>>, %arg10: memref<3x64x512xbf16, #tpu.memory_space<vmem>>, %arg11: memref<3x1x512xf32, #tpu.memory_space<vmem>>, %arg12: memref<3x64x256xf32, #tpu.memory_space<vmem>>, %arg13: memref<64x9xf32, #tpu.memory_space<vmem>>, %arg14: memref<1x9xf32, #tpu.memory_space<vmem>>, %arg15: memref<1x8x64xf32, #tpu.memory_space<vmem>>, %arg16: memref<1x1x64xf32, #tpu.memory_space<vmem>>, %arg17: memref<1x1x9xf32, #tpu.memory_space<vmem>>, %arg18: memref<10x32xf32, #tpu.memory_space<vmem>>, %arg19: memref<10x64xf32, #tpu.memory_space<vmem>>, %arg20: memref<8x64xf32, #tpu.memory_space<vmem>>, %arg21: memref<8x512xf32, #tpu.memory_space<vmem>>, %arg22: memref<8x64xf32, #tpu.memory_space<vmem>>) attributes {dimension_semantics = [#tpu.dimension_semantics<parallel>], iteration_bounds = array<i64: 2>, scalar_prefetch = 0 : i64, scratch_operands = 5 : i64, tpu.core_type = #tpu.core_type<tc>, window_params = [{transform_indices = @transform_0, window_bounds = array<i64: 1, 9, 512>}, {transform_indices = @transform_1, window_bounds = array<i64: 1, 8, 512>}, {pipeline_mode = #tpu.pipeline_mode<synchronous>, transform_indices = @transform_2, window_bounds = array<i64: 512, 64>}, {pipeline_mode = #tpu.pipeline_mode<synchronous>, transform_indices = @transform_3, window_bounds = array<i64: 512, 64>}, {pipeline_mode = #tpu.pipeline_mode<synchronous>, transform_indices = @transform_4, window_bounds = array<i64: 1, 32>}, {pipeline_mode = #tpu.pipeline_mode<synchronous>, transform_indices = @transform_5, window_bounds = array<i64: 1, 32>}, {pipeline_mode = #tpu.pipeline_mode<synchronous>, transform_indices = @transform_6, window_bounds = array<i64: 3, 32, 64>}, {pipeline_mode = #tpu.pipeline_mode<synchronous>, transform_indices = @transform_7, window_bounds = array<i64: 1, 64>}, {pipeline_mode = #tpu.pipeline_mode<synchronous>, transform_indices = @transform_8, window_bounds = array<i64: 1, 64>}, {pipeline_mode = #tpu.pipeline_mode<synchronous>, transform_indices = @transform_9, window_bounds = array<i64: 3, 64, 512>}, {pipeline_mode = #tpu.pipeline_mode<synchronous>, transform_indices = @transform_10, window_bounds = array<i64: 3, 1, 512>}, {pipeline_mode = #tpu.pipeline_mode<synchronous>, transform_indices = @transform_11, window_bounds = array<i64: 3, 64, 256>}, {pipeline_mode = #tpu.pipeline_mode<synchronous>, transform_indices = @transform_12, window_bounds = array<i64: 64, 9>}, {pipeline_mode = #tpu.pipeline_mode<synchronous>, transform_indices = @transform_13, window_bounds = array<i64: 1, 9>}, {transform_indices = @transform_14, window_bounds = array<i64: 1, 8, 64>}, {transform_indices = @transform_15, window_bounds = array<i64: 1, 1, 64>}, {transform_indices = @transform_16, window_bounds = array<i64: 1, 1, 9>}]} {
    %c0 = arith.constant 0 : index
    %c0_0 = arith.constant 0 : index
    %c0_1 = arith.constant 0 : index
    %0 = vector.load %arg1[%c0, %c0_0, %c0_1] : memref<1x9x512xbf16, #tpu.memory_space<vmem>>, vector<1x9x512xbf16>
    %1 = vector.shape_cast %0 : vector<1x9x512xbf16> to vector<9x512xbf16>
    %c0_2 = arith.constant 0 : index
    %c0_3 = arith.constant 0 : index
    %2 = vector.load %arg3[%c0_2, %c0_3] : memref<512x64xbf16, #tpu.memory_space<vmem>>, vector<512x64xbf16>
    %cst = arith.constant dense<0.000000e+00> : vector<9x64xf32>
    %3 = tpu.matmul %1, %2, %cst {dimension_numbers = #tpu.dot_dimension_numbers<[1], [0], [0], [1], [0, 0, 1, 1], [], []>} : vector<9x512xbf16>, vector<512x64xbf16>, vector<9x64xf32> -> vector<9x64xf32>
    %c0_4 = arith.constant 0 : index
    %c0_5 = arith.constant 0 : index
    %c0_6 = arith.constant 0 : index
    %4 = vector.load %arg2[%c0_4, %c0_5, %c0_6] : memref<1x8x512xbf16, #tpu.memory_space<vmem>>, vector<1x8x512xbf16>
    %5 = vector.shape_cast %4 : vector<1x8x512xbf16> to vector<8x512xbf16>
    %c0_7 = arith.constant 0 : index
    %c0_8 = arith.constant 0 : index
    %6 = vector.load %arg4[%c0_7, %c0_8] : memref<512x64xbf16, #tpu.memory_space<vmem>>, vector<512x64xbf16>
    %cst_9 = arith.constant dense<0.000000e+00> : vector<8x64xf32>
    %7 = tpu.matmul %5, %6, %cst_9 {dimension_numbers = #tpu.dot_dimension_numbers<[1], [0], [0], [1], [0, 0, 1, 1], [], []>} : vector<8x512xbf16>, vector<512x64xbf16>, vector<8x64xf32> -> vector<8x64xf32>
    %8 = vector.extract_strided_slice %3 {offsets = [0, 0], sizes = [8, 32], strides = [1, 1]} : vector<9x64xf32> to vector<8x32xf32>
    %9 = vector.extract_strided_slice %7 {offsets = [0, 0], sizes = [8, 32], strides = [1, 1]} : vector<8x64xf32> to vector<8x32xf32>
    %10 = arith.addf %8, %9 : vector<8x32xf32>
    %11 = vector.extract_strided_slice %3 {offsets = [1, 32], sizes = [8, 32], strides = [1, 1]} : vector<9x64xf32> to vector<8x32xf32>
    %12 = vector.extract_strided_slice %7 {offsets = [0, 32], sizes = [8, 32], strides = [1, 1]} : vector<8x64xf32> to vector<8x32xf32>
    %13 = arith.addf %11, %12 : vector<8x32xf32>
    %c0_10 = arith.constant 0 : index
    %c0_11 = arith.constant 0 : index
    %14 = vector.load %arg5[%c0_10, %c0_11] : memref<1x32xf32, #tpu.memory_space<vmem>>, vector<1x32xf32>
    %15 = vector.broadcast %14 : vector<1x32xf32> to vector<8x32xf32>
    %16 = arith.mulf %10, %15 : vector<8x32xf32>
    %c0_12 = arith.constant 0 : index
    %c0_13 = arith.constant 0 : index
    %17 = vector.load %arg6[%c0_12, %c0_13] : memref<1x32xf32, #tpu.memory_space<vmem>>, vector<1x32xf32>
    %18 = vector.broadcast %17 : vector<1x32xf32> to vector<8x32xf32>
    %19 = arith.addf %16, %18 : vector<8x32xf32>
    %cst_14 = arith.constant 0.000000e+00 : f32
    %20 = vector.broadcast %cst_14 : f32 to vector<8x32xf32>
    %21 = arith.maximumf %19, %20 : vector<8x32xf32>
    %c0_15 = arith.constant 0 : index
    %c0_16 = arith.constant 0 : index
    %22 = vector.load %arg5[%c0_15, %c0_16] : memref<1x32xf32, #tpu.memory_space<vmem>>, vector<1x32xf32>
    %23 = vector.broadcast %22 : vector<1x32xf32> to vector<8x32xf32>
    %24 = arith.mulf %13, %23 : vector<8x32xf32>
    %c0_17 = arith.constant 0 : index
    %c0_18 = arith.constant 0 : index
    %25 = vector.load %arg6[%c0_17, %c0_18] : memref<1x32xf32, #tpu.memory_space<vmem>>, vector<1x32xf32>
    %26 = vector.broadcast %25 : vector<1x32xf32> to vector<8x32xf32>
    %27 = arith.addf %24, %26 : vector<8x32xf32>
    %cst_19 = arith.constant 0.000000e+00 : f32
    %28 = vector.broadcast %cst_19 : f32 to vector<8x32xf32>
    %29 = arith.maximumf %27, %28 : vector<8x32xf32>
    %30 = arith.maximumf %21, %29 : vector<8x32xf32>
    %cst_20 = arith.constant 0.000000e+00 : f32
    %31 = vector.broadcast %cst_20 : f32 to vector<1x32xf32>
    %c0_21 = arith.constant 0 : index
    %c0_22 = arith.constant 0 : index
    %32 = vector.load %arg18[%c0_21, %c0_22] : memref<10x32xf32, #tpu.memory_space<vmem>>, vector<1x32xf32>
    tpu.vector_store %arg18[%c0_21, %c0_22], %31 {strides = array<i32>} : memref<10x32xf32, #tpu.memory_space<vmem>>, vector<1x32xf32>,
    %cst_23 = arith.constant 0.000000e+00 : f32
    %33 = vector.broadcast %cst_23 : f32 to vector<1x32xf32>
    %c9 = arith.constant 9 : index
    %c0_24 = arith.constant 0 : index
    %34 = vector.load %arg18[%c9, %c0_24] : memref<10x32xf32, #tpu.memory_space<vmem>>, vector<1x32xf32>
    tpu.vector_store %arg18[%c9, %c0_24], %33 {strides = array<i32>} : memref<10x32xf32, #tpu.memory_space<vmem>>, vector<1x32xf32>,
    %c1 = arith.constant 1 : index
    %c0_25 = arith.constant 0 : index
    %35 = vector.load %arg18[%c1, %c0_25] : memref<10x32xf32, #tpu.memory_space<vmem>>, vector<8x32xf32>
    tpu.vector_store %arg18[%c1, %c0_25], %30 {strides = array<i32>} : memref<10x32xf32, #tpu.memory_space<vmem>>, vector<8x32xf32>,
    %c0_26 = arith.constant 0 : index
    %c0_27 = arith.constant 0 : index
    %36 = vector.load %arg18[%c0_26, %c0_27] : memref<10x32xf32, #tpu.memory_space<vmem>>, vector<8x32xf32>
    %c0_28 = arith.constant 0 : index
    %c0_29 = arith.constant 0 : index
    %c0_30 = arith.constant 0 : index
    %37 = vector.load %arg7[%c0_28, %c0_29, %c0_30] : memref<3x32x64xf32, #tpu.memory_space<vmem>>, vector<1x32x64xf32>
    %38 = vector.shape_cast %37 : vector<1x32x64xf32> to vector<32x64xf32>
    %cst_31 = arith.constant dense<0.000000e+00> : vector<8x64xf32>
    %39 = tpu.matmul %36, %38, %cst_31 {dimension_numbers = #tpu.dot_dimension_numbers<[1], [0], [0], [1], [0, 0, 1, 1], [], []>} : vector<8x32xf32>, vector<32x64xf32>, vector<8x64xf32> -> vector<8x64xf32>
    %c1_32 = arith.constant 1 : index
    %c0_33 = arith.constant 0 : index
    %40 = vector.load %arg18[%c1_32, %c0_33] : memref<10x32xf32, #tpu.memory_space<vmem>>, vector<8x32xf32>
    %c1_34 = arith.constant 1 : index
    %c0_35 = arith.constant 0 : index
    %c0_36 = arith.constant 0 : index
    %41 = vector.load %arg7[%c1_34, %c0_35, %c0_36] : memref<3x32x64xf32, #tpu.memory_space<vmem>>, vector<1x32x64xf32>
    %42 = vector.shape_cast %41 : vector<1x32x64xf32> to vector<32x64xf32>
    %cst_37 = arith.constant dense<0.000000e+00> : vector<8x64xf32>
    %43 = tpu.matmul %40, %42, %cst_37 {dimension_numbers = #tpu.dot_dimension_numbers<[1], [0], [0], [1], [0, 0, 1, 1], [], []>} : vector<8x32xf32>, vector<32x64xf32>, vector<8x64xf32> -> vector<8x64xf32>
    %44 = arith.addf %39, %43 : vector<8x64xf32>
    %c2 = arith.constant 2 : index
    %c0_38 = arith.constant 0 : index
    %45 = vector.load %arg18[%c2, %c0_38] : memref<10x32xf32, #tpu.memory_space<vmem>>, vector<8x32xf32>
    %c2_39 = arith.constant 2 : index
    %c0_40 = arith.constant 0 : index
    %c0_41 = arith.constant 0 : index
    %46 = vector.load %arg7[%c2_39, %c0_40, %c0_41] : memref<3x32x64xf32, #tpu.memory_space<vmem>>, vector<1x32x64xf32>
    %47 = vector.shape_cast %46 : vector<1x32x64xf32> to vector<32x64xf32>
    %cst_42 = arith.constant dense<0.000000e+00> : vector<8x64xf32>
    %48 = tpu.matmul %45, %47, %cst_42 {dimension_numbers = #tpu.dot_dimension_numbers<[1], [0], [0], [1], [0, 0, 1, 1], [], []>} : vector<8x32xf32>, vector<32x64xf32>, vector<8x64xf32> -> vector<8x64xf32>
    %49 = arith.addf %44, %48 : vector<8x64xf32>
    %c0_43 = arith.constant 0 : index
    %c0_44 = arith.constant 0 : index
    %50 = vector.load %arg8[%c0_43, %c0_44] : memref<1x64xf32, #tpu.memory_space<vmem>>, vector<1x64xf32>
    %51 = vector.broadcast %50 : vector<1x64xf32> to vector<8x64xf32>
    %52 = arith.mulf %49, %51 : vector<8x64xf32>
    %c0_45 = arith.constant 0 : index
    %c0_46 = arith.constant 0 : index
    %53 = vector.load %arg9[%c0_45, %c0_46] : memref<1x64xf32, #tpu.memory_space<vmem>>, vector<1x64xf32>
    %54 = vector.broadcast %53 : vector<1x64xf32> to vector<8x64xf32>
    %55 = arith.addf %52, %54 : vector<8x64xf32>
    %cst_47 = arith.constant 0.000000e+00 : f32
    %56 = vector.broadcast %cst_47 : f32 to vector<8x64xf32>
    %57 = arith.maximumf %55, %56 : vector<8x64xf32>
    %cst_48 = arith.constant 0.000000e+00 : f32
    %58 = vector.broadcast %cst_48 : f32 to vector<1x64xf32>
    %c0_49 = arith.constant 0 : index
    %c0_50 = arith.constant 0 : index
    %59 = vector.load %arg19[%c0_49, %c0_50] : memref<10x64xf32, #tpu.memory_space<vmem>>, vector<1x64xf32>
    tpu.vector_store %arg19[%c0_49, %c0_50], %58 {strides = array<i32>} : memref<10x64xf32, #tpu.memory_space<vmem>>, vector<1x64xf32>,
    %cst_51 = arith.constant 0.000000e+00 : f32
    %60 = vector.broadcast %cst_51 : f32 to vector<1x64xf32>
    %c9_52 = arith.constant 9 : index
    %c0_53 = arith.constant 0 : index
    %61 = vector.load %arg19[%c9_52, %c0_53] : memref<10x64xf32, #tpu.memory_space<vmem>>, vector<1x64xf32>
    tpu.vector_store %arg19[%c9_52, %c0_53], %60 {strides = array<i32>} : memref<10x64xf32, #tpu.memory_space<vmem>>, vector<1x64xf32>,
    %c1_54 = arith.constant 1 : index
    %c0_55 = arith.constant 0 : index
    %62 = vector.load %arg19[%c1_54, %c0_55] : memref<10x64xf32, #tpu.memory_space<vmem>>, vector<8x64xf32>
    tpu.vector_store %arg19[%c1_54, %c0_55], %57 {strides = array<i32>} : memref<10x64xf32, #tpu.memory_space<vmem>>, vector<8x64xf32>,
    %c0_56 = arith.constant 0 : index
    %c0_57 = arith.constant 0 : index
    %63 = vector.load %arg19[%c0_56, %c0_57] : memref<10x64xf32, #tpu.memory_space<vmem>>, vector<8x64xf32>
    %c1_58 = arith.constant 1 : index
    %c0_59 = arith.constant 0 : index
    %64 = vector.load %arg19[%c1_58, %c0_59] : memref<10x64xf32, #tpu.memory_space<vmem>>, vector<8x64xf32>
    %65 = arith.maximumf %63, %64 : vector<8x64xf32>
    %c2_60 = arith.constant 2 : index
    %c0_61 = arith.constant 0 : index
    %66 = vector.load %arg19[%c2_60, %c0_61] : memref<10x64xf32, #tpu.memory_space<vmem>>, vector<8x64xf32>
    %67 = arith.maximumf %65, %66 : vector<8x64xf32>
    %c0_62 = arith.constant 0 : index
    %c0_63 = arith.constant 0 : index
    %c0_64 = arith.constant 0 : index
    %68 = vector.load %arg15[%c0_62, %c0_63, %c0_64] : memref<1x8x64xf32, #tpu.memory_space<vmem>>, vector<1x8x64xf32>
    %69 = vector.shape_cast %68 : vector<1x8x64xf32> to vector<8x64xf32>
    %70 = vector.shape_cast %67 : vector<8x64xf32> to vector<1x8x64xf32>
    tpu.vector_store %arg15[%c0_62, %c0_63, %c0_64], %70 {strides = array<i32>} : memref<1x8x64xf32, #tpu.memory_space<vmem>>, vector<1x8x64xf32>,
    %71 = arith.truncf %67 : vector<8x64xf32> to vector<8x64xbf16>
    %c0_65 = arith.constant 0 : index
    %c0_66 = arith.constant 0 : index
    %c0_67 = arith.constant 0 : index
    %72 = vector.load %arg10[%c0_65, %c0_66, %c0_67] : memref<3x64x512xbf16, #tpu.memory_space<vmem>>, vector<1x64x512xbf16>
    %73 = vector.shape_cast %72 : vector<1x64x512xbf16> to vector<64x512xbf16>
    %cst_68 = arith.constant dense<0.000000e+00> : vector<8x512xf32>
    %74 = tpu.matmul %71, %73, %cst_68 {dimension_numbers = #tpu.dot_dimension_numbers<[1], [0], [0], [1], [0, 0, 1, 1], [], []>} : vector<8x64xbf16>, vector<64x512xbf16>, vector<8x512xf32> -> vector<8x512xf32>
    %c0_69 = arith.constant 0 : index
    %c0_70 = arith.constant 0 : index
    %c0_71 = arith.constant 0 : index
    %75 = vector.load %arg11[%c0_69, %c0_70, %c0_71] : memref<3x1x512xf32, #tpu.memory_space<vmem>>, vector<1x1x512xf32>
    %76 = vector.shape_cast %75 : vector<1x1x512xf32> to vector<1x512xf32>
    %77 = vector.broadcast %76 : vector<1x512xf32> to vector<8x512xf32>
    %78 = arith.addf %74, %77 : vector<8x512xf32>
    %c0_72 = arith.constant 0 : index
    %c0_73 = arith.constant 0 : index
    %79 = vector.load %arg21[%c0_72, %c0_73] : memref<8x512xf32, #tpu.memory_space<vmem>>, vector<8x512xf32>
    tpu.vector_store %arg21[%c0_72, %c0_73], %78 {strides = array<i32>} : memref<8x512xf32, #tpu.memory_space<vmem>>, vector<8x512xf32>,
    %c0_74 = arith.constant 0 : index
    %c0_75 = arith.constant 0 : index
    %c0_76 = arith.constant 0 : index
    %80 = vector.load %arg12[%c0_74, %c0_75, %c0_76] : memref<3x64x256xf32, #tpu.memory_space<vmem>>, vector<1x64x256xf32>
    %81 = vector.shape_cast %80 : vector<1x64x256xf32> to vector<64x256xf32>
    %cst_77 = arith.constant 0.000000e+00 : f32
    %82 = vector.broadcast %cst_77 : f32 to vector<1x64xf32>
    %cst_78 = arith.constant 0.000000e+00 : f32
    %83 = vector.broadcast %cst_78 : f32 to vector<1x64xf32>
    %c0_79 = arith.constant 0 : index
    %c0_80 = arith.constant 0 : index
    %84 = vector.load %arg21[%c0_79, %c0_80] : memref<8x512xf32, #tpu.memory_space<vmem>>, vector<1x256xf32>
    %c7 = arith.constant 7 : index
    %c256 = arith.constant 256 : index
    %85 = vector.load %arg21[%c7, %c256] : memref<8x512xf32, #tpu.memory_space<vmem>>, vector<1x256xf32>
    %86 = arith.addf %84, %85 : vector<1x256xf32>
    %cst_81 = arith.constant dense<0.000000e+00> : vector<1x256xf32>
    %87 = tpu.matmul %82, %81, %cst_81 {dimension_numbers = #tpu.dot_dimension_numbers<[1], [0], [0], [1], [0, 0, 1, 1], [], []>} : vector<1x64xf32>, vector<64x256xf32>, vector<1x256xf32> -> vector<1x256xf32>
    %88 = arith.addf %86, %87 : vector<1x256xf32>
    %89 = vector.extract_strided_slice %88 {offsets = [0, 0], sizes = [1, 192], strides = [1, 1]} : vector<1x256xf32> to vector<1x192xf32>
    %90 = arith.negf %89 : vector<1x192xf32>
    %91 = math.exp %90 : vector<1x192xf32>
    %cst_82 = arith.constant 1.000000e+00 : f32
    %92 = vector.broadcast %cst_82 : f32 to vector<1x192xf32>
    %93 = arith.addf %92, %91 : vector<1x192xf32>
    %94 = arith.divf %92, %93 : vector<1x192xf32>
    %95 = vector.extract_strided_slice %88 {offsets = [0, 192], sizes = [1, 64], strides = [1, 1]} : vector<1x256xf32> to vector<1x64xf32>
    %96 = math.tanh %95 : vector<1x64xf32>
    %97 = vector.extract_strided_slice %94 {offsets = [0, 64], sizes = [1, 64], strides = [1, 1]} : vector<1x192xf32> to vector<1x64xf32>
    %98 = arith.mulf %97, %83 : vector<1x64xf32>
    %99 = vector.extract_strided_slice %94 {offsets = [0, 0], sizes = [1, 64], strides = [1, 1]} : vector<1x192xf32> to vector<1x64xf32>
    %100 = arith.mulf %99, %96 : vector<1x64xf32>
    %101 = arith.addf %98, %100 : vector<1x64xf32>
    %102 = vector.extract_strided_slice %94 {offsets = [0, 128], sizes = [1, 64], strides = [1, 1]} : vector<1x192xf32> to vector<1x64xf32>
    %103 = math.tanh %101 : vector<1x64xf32>
    %104 = arith.mulf %102, %103 : vector<1x64xf32>
    %c0_83 = arith.constant 0 : index
    %c0_84 = arith.constant 0 : index
    %105 = vector.load %arg22[%c0_83, %c0_84] : memref<8x64xf32, #tpu.memory_space<vmem>>, vector<1x64xf32>
    tpu.vector_store %arg22[%c0_83, %c0_84], %104 {strides = array<i32>} : memref<8x64xf32, #tpu.memory_space<vmem>>, vector<1x64xf32>,
    %c1_85 = arith.constant 1 : index
    %c0_86 = arith.constant 0 : index
    %106 = vector.load %arg21[%c1_85, %c0_86] : memref<8x512xf32, #tpu.memory_space<vmem>>, vector<1x256xf32>
    %c6 = arith.constant 6 : index
    %c256_87 = arith.constant 256 : index
    %107 = vector.load %arg21[%c6, %c256_87] : memref<8x512xf32, #tpu.memory_space<vmem>>, vector<1x256xf32>
    %108 = arith.addf %106, %107 : vector<1x256xf32>
    %cst_88 = arith.constant dense<0.000000e+00> : vector<1x256xf32>
    %109 = tpu.matmul %104, %81, %cst_88 {dimension_numbers = #tpu.dot_dimension_numbers<[1], [0], [0], [1], [0, 0, 1, 1], [], []>} : vector<1x64xf32>, vector<64x256xf32>, vector<1x256xf32> -> vector<1x256xf32>
    %110 = arith.addf %108, %109 : vector<1x256xf32>
    %111 = vector.extract_strided_slice %110 {offsets = [0, 0], sizes = [1, 192], strides = [1, 1]} : vector<1x256xf32> to vector<1x192xf32>
    %112 = arith.negf %111 : vector<1x192xf32>
    %113 = math.exp %112 : vector<1x192xf32>
    %cst_89 = arith.constant 1.000000e+00 : f32
    %114 = vector.broadcast %cst_89 : f32 to vector<1x192xf32>
    %115 = arith.addf %114, %113 : vector<1x192xf32>
    %116 = arith.divf %114, %115 : vector<1x192xf32>
    %117 = vector.extract_strided_slice %110 {offsets = [0, 192], sizes = [1, 64], strides = [1, 1]} : vector<1x256xf32> to vector<1x64xf32>
    %118 = math.tanh %117 : vector<1x64xf32>
    %119 = vector.extract_strided_slice %116 {offsets = [0, 64], sizes = [1, 64], strides = [1, 1]} : vector<1x192xf32> to vector<1x64xf32>
    %120 = arith.mulf %119, %101 : vector<1x64xf32>
    %121 = vector.extract_strided_slice %116 {offsets = [0, 0], sizes = [1, 64], strides = [1, 1]} : vector<1x192xf32> to vector<1x64xf32>
    %122 = arith.mulf %121, %118 : vector<1x64xf32>
    %123 = arith.addf %120, %122 : vector<1x64xf32>
    %124 = vector.extract_strided_slice %116 {offsets = [0, 128], sizes = [1, 64], strides = [1, 1]} : vector<1x192xf32> to vector<1x64xf32>
    %125 = math.tanh %123 : vector<1x64xf32>
    %126 = arith.mulf %124, %125 : vector<1x64xf32>
    %c1_90 = arith.constant 1 : index
    %c0_91 = arith.constant 0 : index
    %127 = vector.load %arg22[%c1_90, %c0_91] : memref<8x64xf32, #tpu.memory_space<vmem>>, vector<1x64xf32>
    tpu.vector_store %arg22[%c1_90, %c0_91], %126 {strides = array<i32>} : memref<8x64xf32, #tpu.memory_space<vmem>>, vector<1x64xf32>,
    %c2_92 = arith.constant 2 : index
    %c0_93 = arith.constant 0 : index
    %128 = vector.load %arg21[%c2_92, %c0_93] : memref<8x512xf32, #tpu.memory_space<vmem>>, vector<1x256xf32>
    %c5 = arith.constant 5 : index
    %c256_94 = arith.constant 256 : index
    %129 = vector.load %arg21[%c5, %c256_94] : memref<8x512xf32, #tpu.memory_space<vmem>>, vector<1x256xf32>
    %130 = arith.addf %128, %129 : vector<1x256xf32>
    %cst_95 = arith.constant dense<0.000000e+00> : vector<1x256xf32>
    %131 = tpu.matmul %126, %81, %cst_95 {dimension_numbers = #tpu.dot_dimension_numbers<[1], [0], [0], [1], [0, 0, 1, 1], [], []>} : vector<1x64xf32>, vector<64x256xf32>, vector<1x256xf32> -> vector<1x256xf32>
    %132 = arith.addf %130, %131 : vector<1x256xf32>
    %133 = vector.extract_strided_slice %132 {offsets = [0, 0], sizes = [1, 192], strides = [1, 1]} : vector<1x256xf32> to vector<1x192xf32>
    %134 = arith.negf %133 : vector<1x192xf32>
    %135 = math.exp %134 : vector<1x192xf32>
    %cst_96 = arith.constant 1.000000e+00 : f32
    %136 = vector.broadcast %cst_96 : f32 to vector<1x192xf32>
    %137 = arith.addf %136, %135 : vector<1x192xf32>
    %138 = arith.divf %136, %137 : vector<1x192xf32>
    %139 = vector.extract_strided_slice %132 {offsets = [0, 192], sizes = [1, 64], strides = [1, 1]} : vector<1x256xf32> to vector<1x64xf32>
    %140 = math.tanh %139 : vector<1x64xf32>
    %141 = vector.extract_strided_slice %138 {offsets = [0, 64], sizes = [1, 64], strides = [1, 1]} : vector<1x192xf32> to vector<1x64xf32>
    %142 = arith.mulf %141, %123 : vector<1x64xf32>
    %143 = vector.extract_strided_slice %138 {offsets = [0, 0], sizes = [1, 64], strides = [1, 1]} : vector<1x192xf32> to vector<1x64xf32>
    %144 = arith.mulf %143, %140 : vector<1x64xf32>
    %145 = arith.addf %142, %144 : vector<1x64xf32>
    %146 = vector.extract_strided_slice %138 {offsets = [0, 128], sizes = [1, 64], strides = [1, 1]} : vector<1x192xf32> to vector<1x64xf32>
    %147 = math.tanh %145 : vector<1x64xf32>
    %148 = arith.mulf %146, %147 : vector<1x64xf32>
    %c2_97 = arith.constant 2 : index
    %c0_98 = arith.constant 0 : index
    %149 = vector.load %arg22[%c2_97, %c0_98] : memref<8x64xf32, #tpu.memory_space<vmem>>, vector<1x64xf32>
    tpu.vector_store %arg22[%c2_97, %c0_98], %148 {strides = array<i32>} : memref<8x64xf32, #tpu.memory_space<vmem>>, vector<1x64xf32>,
    %c3 = arith.constant 3 : index
    %c0_99 = arith.constant 0 : index
    %150 = vector.load %arg21[%c3, %c0_99] : memref<8x512xf32, #tpu.memory_space<vmem>>, vector<1x256xf32>
    %c4 = arith.constant 4 : index
    %c256_100 = arith.constant 256 : index
    %151 = vector.load %arg21[%c4, %c256_100] : memref<8x512xf32, #tpu.memory_space<vmem>>, vector<1x256xf32>
    %152 = arith.addf %150, %151 : vector<1x256xf32>
    %cst_101 = arith.constant dense<0.000000e+00> : vector<1x256xf32>
    %153 = tpu.matmul %148, %81, %cst_101 {dimension_numbers = #tpu.dot_dimension_numbers<[1], [0], [0], [1], [0, 0, 1, 1], [], []>} : vector<1x64xf32>, vector<64x256xf32>, vector<1x256xf32> -> vector<1x256xf32>
    %154 = arith.addf %152, %153 : vector<1x256xf32>
    %155 = vector.extract_strided_slice %154 {offsets = [0, 0], sizes = [1, 192], strides = [1, 1]} : vector<1x256xf32> to vector<1x192xf32>
    %156 = arith.negf %155 : vector<1x192xf32>
    %157 = math.exp %156 : vector<1x192xf32>
    %cst_102 = arith.constant 1.000000e+00 : f32
    %158 = vector.broadcast %cst_102 : f32 to vector<1x192xf32>
    %159 = arith.addf %158, %157 : vector<1x192xf32>
    %160 = arith.divf %158, %159 : vector<1x192xf32>
    %161 = vector.extract_strided_slice %154 {offsets = [0, 192], sizes = [1, 64], strides = [1, 1]} : vector<1x256xf32> to vector<1x64xf32>
    %162 = math.tanh %161 : vector<1x64xf32>
    %163 = vector.extract_strided_slice %160 {offsets = [0, 64], sizes = [1, 64], strides = [1, 1]} : vector<1x192xf32> to vector<1x64xf32>
    %164 = arith.mulf %163, %145 : vector<1x64xf32>
    %165 = vector.extract_strided_slice %160 {offsets = [0, 0], sizes = [1, 64], strides = [1, 1]} : vector<1x192xf32> to vector<1x64xf32>
    %166 = arith.mulf %165, %162 : vector<1x64xf32>
    %167 = arith.addf %164, %166 : vector<1x64xf32>
    %168 = vector.extract_strided_slice %160 {offsets = [0, 128], sizes = [1, 64], strides = [1, 1]} : vector<1x192xf32> to vector<1x64xf32>
    %169 = math.tanh %167 : vector<1x64xf32>
    %170 = arith.mulf %168, %169 : vector<1x64xf32>
    %c3_103 = arith.constant 3 : index
    %c0_104 = arith.constant 0 : index
    %171 = vector.load %arg22[%c3_103, %c0_104] : memref<8x64xf32, #tpu.memory_space<vmem>>, vector<1x64xf32>
    tpu.vector_store %arg22[%c3_103, %c0_104], %170 {strides = array<i32>} : memref<8x64xf32, #tpu.memory_space<vmem>>, vector<1x64xf32>,
    %c4_105 = arith.constant 4 : index
    %c0_106 = arith.constant 0 : index
    %172 = vector.load %arg21[%c4_105, %c0_106] : memref<8x512xf32, #tpu.memory_space<vmem>>, vector<1x256xf32>
    %c3_107 = arith.constant 3 : index
    %c256_108 = arith.constant 256 : index
    %173 = vector.load %arg21[%c3_107, %c256_108] : memref<8x512xf32, #tpu.memory_space<vmem>>, vector<1x256xf32>
    %174 = arith.addf %172, %173 : vector<1x256xf32>
    %cst_109 = arith.constant dense<0.000000e+00> : vector<1x256xf32>
    %175 = tpu.matmul %170, %81, %cst_109 {dimension_numbers = #tpu.dot_dimension_numbers<[1], [0], [0], [1], [0, 0, 1, 1], [], []>} : vector<1x64xf32>, vector<64x256xf32>, vector<1x256xf32> -> vector<1x256xf32>
    %176 = arith.addf %174, %175 : vector<1x256xf32>
    %177 = vector.extract_strided_slice %176 {offsets = [0, 0], sizes = [1, 192], strides = [1, 1]} : vector<1x256xf32> to vector<1x192xf32>
    %178 = arith.negf %177 : vector<1x192xf32>
    %179 = math.exp %178 : vector<1x192xf32>
    %cst_110 = arith.constant 1.000000e+00 : f32
    %180 = vector.broadcast %cst_110 : f32 to vector<1x192xf32>
    %181 = arith.addf %180, %179 : vector<1x192xf32>
    %182 = arith.divf %180, %181 : vector<1x192xf32>
    %183 = vector.extract_strided_slice %176 {offsets = [0, 192], sizes = [1, 64], strides = [1, 1]} : vector<1x256xf32> to vector<1x64xf32>
    %184 = math.tanh %183 : vector<1x64xf32>
    %185 = vector.extract_strided_slice %182 {offsets = [0, 64], sizes = [1, 64], strides = [1, 1]} : vector<1x192xf32> to vector<1x64xf32>
    %186 = arith.mulf %185, %167 : vector<1x64xf32>
    %187 = vector.extract_strided_slice %182 {offsets = [0, 0], sizes = [1, 64], strides = [1, 1]} : vector<1x192xf32> to vector<1x64xf32>
    %188 = arith.mulf %187, %184 : vector<1x64xf32>
    %189 = arith.addf %186, %188 : vector<1x64xf32>
    %190 = vector.extract_strided_slice %182 {offsets = [0, 128], sizes = [1, 64], strides = [1, 1]} : vector<1x192xf32> to vector<1x64xf32>
    %191 = math.tanh %189 : vector<1x64xf32>
    %192 = arith.mulf %190, %191 : vector<1x64xf32>
    %c4_111 = arith.constant 4 : index
    %c0_112 = arith.constant 0 : index
    %193 = vector.load %arg22[%c4_111, %c0_112] : memref<8x64xf32, #tpu.memory_space<vmem>>, vector<1x64xf32>
    tpu.vector_store %arg22[%c4_111, %c0_112], %192 {strides = array<i32>} : memref<8x64xf32, #tpu.memory_space<vmem>>, vector<1x64xf32>,
    %c5_113 = arith.constant 5 : index
    %c0_114 = arith.constant 0 : index
    %194 = vector.load %arg21[%c5_113, %c0_114] : memref<8x512xf32, #tpu.memory_space<vmem>>, vector<1x256xf32>
    %c2_115 = arith.constant 2 : index
    %c256_116 = arith.constant 256 : index
    %195 = vector.load %arg21[%c2_115, %c256_116] : memref<8x512xf32, #tpu.memory_space<vmem>>, vector<1x256xf32>
    %196 = arith.addf %194, %195 : vector<1x256xf32>
    %cst_117 = arith.constant dense<0.000000e+00> : vector<1x256xf32>
    %197 = tpu.matmul %192, %81, %cst_117 {dimension_numbers = #tpu.dot_dimension_numbers<[1], [0], [0], [1], [0, 0, 1, 1], [], []>} : vector<1x64xf32>, vector<64x256xf32>, vector<1x256xf32> -> vector<1x256xf32>
    %198 = arith.addf %196, %197 : vector<1x256xf32>
    %199 = vector.extract_strided_slice %198 {offsets = [0, 0], sizes = [1, 192], strides = [1, 1]} : vector<1x256xf32> to vector<1x192xf32>
    %200 = arith.negf %199 : vector<1x192xf32>
    %201 = math.exp %200 : vector<1x192xf32>
    %cst_118 = arith.constant 1.000000e+00 : f32
    %202 = vector.broadcast %cst_118 : f32 to vector<1x192xf32>
    %203 = arith.addf %202, %201 : vector<1x192xf32>
    %204 = arith.divf %202, %203 : vector<1x192xf32>
    %205 = vector.extract_strided_slice %198 {offsets = [0, 192], sizes = [1, 64], strides = [1, 1]} : vector<1x256xf32> to vector<1x64xf32>
    %206 = math.tanh %205 : vector<1x64xf32>
    %207 = vector.extract_strided_slice %204 {offsets = [0, 64], sizes = [1, 64], strides = [1, 1]} : vector<1x192xf32> to vector<1x64xf32>
    %208 = arith.mulf %207, %189 : vector<1x64xf32>
    %209 = vector.extract_strided_slice %204 {offsets = [0, 0], sizes = [1, 64], strides = [1, 1]} : vector<1x192xf32> to vector<1x64xf32>
    %210 = arith.mulf %209, %206 : vector<1x64xf32>
    %211 = arith.addf %208, %210 : vector<1x64xf32>
    %212 = vector.extract_strided_slice %204 {offsets = [0, 128], sizes = [1, 64], strides = [1, 1]} : vector<1x192xf32> to vector<1x64xf32>
    %213 = math.tanh %211 : vector<1x64xf32>
    %214 = arith.mulf %212, %213 : vector<1x64xf32>
    %c5_119 = arith.constant 5 : index
    %c0_120 = arith.constant 0 : index
    %215 = vector.load %arg22[%c5_119, %c0_120] : memref<8x64xf32, #tpu.memory_space<vmem>>, vector<1x64xf32>
    tpu.vector_store %arg22[%c5_119, %c0_120], %214 {strides = array<i32>} : memref<8x64xf32, #tpu.memory_space<vmem>>, vector<1x64xf32>,
    %c6_121 = arith.constant 6 : index
    %c0_122 = arith.constant 0 : index
    %216 = vector.load %arg21[%c6_121, %c0_122] : memref<8x512xf32, #tpu.memory_space<vmem>>, vector<1x256xf32>
    %c1_123 = arith.constant 1 : index
    %c256_124 = arith.constant 256 : index
    %217 = vector.load %arg21[%c1_123, %c256_124] : memref<8x512xf32, #tpu.memory_space<vmem>>, vector<1x256xf32>
    %218 = arith.addf %216, %217 : vector<1x256xf32>
    %cst_125 = arith.constant dense<0.000000e+00> : vector<1x256xf32>
    %219 = tpu.matmul %214, %81, %cst_125 {dimension_numbers = #tpu.dot_dimension_numbers<[1], [0], [0], [1], [0, 0, 1, 1], [], []>} : vector<1x64xf32>, vector<64x256xf32>, vector<1x256xf32> -> vector<1x256xf32>
    %220 = arith.addf %218, %219 : vector<1x256xf32>
    %221 = vector.extract_strided_slice %220 {offsets = [0, 0], sizes = [1, 192], strides = [1, 1]} : vector<1x256xf32> to vector<1x192xf32>
    %222 = arith.negf %221 : vector<1x192xf32>
    %223 = math.exp %222 : vector<1x192xf32>
    %cst_126 = arith.constant 1.000000e+00 : f32
    %224 = vector.broadcast %cst_126 : f32 to vector<1x192xf32>
    %225 = arith.addf %224, %223 : vector<1x192xf32>
    %226 = arith.divf %224, %225 : vector<1x192xf32>
    %227 = vector.extract_strided_slice %220 {offsets = [0, 192], sizes = [1, 64], strides = [1, 1]} : vector<1x256xf32> to vector<1x64xf32>
    %228 = math.tanh %227 : vector<1x64xf32>
    %229 = vector.extract_strided_slice %226 {offsets = [0, 64], sizes = [1, 64], strides = [1, 1]} : vector<1x192xf32> to vector<1x64xf32>
    %230 = arith.mulf %229, %211 : vector<1x64xf32>
    %231 = vector.extract_strided_slice %226 {offsets = [0, 0], sizes = [1, 64], strides = [1, 1]} : vector<1x192xf32> to vector<1x64xf32>
    %232 = arith.mulf %231, %228 : vector<1x64xf32>
    %233 = arith.addf %230, %232 : vector<1x64xf32>
    %234 = vector.extract_strided_slice %226 {offsets = [0, 128], sizes = [1, 64], strides = [1, 1]} : vector<1x192xf32> to vector<1x64xf32>
    %235 = math.tanh %233 : vector<1x64xf32>
    %236 = arith.mulf %234, %235 : vector<1x64xf32>
    %c6_127 = arith.constant 6 : index
    %c0_128 = arith.constant 0 : index
    %237 = vector.load %arg22[%c6_127, %c0_128] : memref<8x64xf32, #tpu.memory_space<vmem>>, vector<1x64xf32>
    tpu.vector_store %arg22[%c6_127, %c0_128], %236 {strides = array<i32>} : memref<8x64xf32, #tpu.memory_space<vmem>>, vector<1x64xf32>,
    %c7_129 = arith.constant 7 : index
    %c0_130 = arith.constant 0 : index
    %238 = vector.load %arg21[%c7_129, %c0_130] : memref<8x512xf32, #tpu.memory_space<vmem>>, vector<1x256xf32>
    %c0_131 = arith.constant 0 : index
    %c256_132 = arith.constant 256 : index
    %239 = vector.load %arg21[%c0_131, %c256_132] : memref<8x512xf32, #tpu.memory_space<vmem>>, vector<1x256xf32>
    %240 = arith.addf %238, %239 : vector<1x256xf32>
    %cst_133 = arith.constant dense<0.000000e+00> : vector<1x256xf32>
    %241 = tpu.matmul %236, %81, %cst_133 {dimension_numbers = #tpu.dot_dimension_numbers<[1], [0], [0], [1], [0, 0, 1, 1], [], []>} : vector<1x64xf32>, vector<64x256xf32>, vector<1x256xf32> -> vector<1x256xf32>
    %242 = arith.addf %240, %241 : vector<1x256xf32>
    %243 = vector.extract_strided_slice %242 {offsets = [0, 0], sizes = [1, 192], strides = [1, 1]} : vector<1x256xf32> to vector<1x192xf32>
    %244 = arith.negf %243 : vector<1x192xf32>
    %245 = math.exp %244 : vector<1x192xf32>
    %cst_134 = arith.constant 1.000000e+00 : f32
    %246 = vector.broadcast %cst_134 : f32 to vector<1x192xf32>
    %247 = arith.addf %246, %245 : vector<1x192xf32>
    %248 = arith.divf %246, %247 : vector<1x192xf32>
    %249 = vector.extract_strided_slice %242 {offsets = [0, 192], sizes = [1, 64], strides = [1, 1]} : vector<1x256xf32> to vector<1x64xf32>
    %250 = math.tanh %249 : vector<1x64xf32>
    %251 = vector.extract_strided_slice %248 {offsets = [0, 64], sizes = [1, 64], strides = [1, 1]} : vector<1x192xf32> to vector<1x64xf32>
    %252 = arith.mulf %251, %233 : vector<1x64xf32>
    %253 = vector.extract_strided_slice %248 {offsets = [0, 0], sizes = [1, 64], strides = [1, 1]} : vector<1x192xf32> to vector<1x64xf32>
    %254 = arith.mulf %253, %250 : vector<1x64xf32>
    %255 = arith.addf %252, %254 : vector<1x64xf32>
    %256 = vector.extract_strided_slice %248 {offsets = [0, 128], sizes = [1, 64], strides = [1, 1]} : vector<1x192xf32> to vector<1x64xf32>
    %257 = math.tanh %255 : vector<1x64xf32>
    %258 = arith.mulf %256, %257 : vector<1x64xf32>
    %c7_135 = arith.constant 7 : index
    %c0_136 = arith.constant 0 : index
    %259 = vector.load %arg22[%c7_135, %c0_136] : memref<8x64xf32, #tpu.memory_space<vmem>>, vector<1x64xf32>
    tpu.vector_store %arg22[%c7_135, %c0_136], %258 {strides = array<i32>} : memref<8x64xf32, #tpu.memory_space<vmem>>, vector<1x64xf32>,
    %c0_137 = arith.constant 0 : index
    %c0_138 = arith.constant 0 : index
    %260 = vector.load %arg22[%c0_137, %c0_138] : memref<8x64xf32, #tpu.memory_space<vmem>>, vector<8x32xf32>
    %c0_139 = arith.constant 0 : index
    %c0_140 = arith.constant 0 : index
    %261 = vector.load %arg20[%c0_139, %c0_140] : memref<8x64xf32, #tpu.memory_space<vmem>>, vector<8x32xf32>
    tpu.vector_store %arg20[%c0_139, %c0_140], %260 {strides = array<i32>} : memref<8x64xf32, #tpu.memory_space<vmem>>, vector<8x32xf32>,
    %c0_141 = arith.constant 0 : index
    %c32 = arith.constant 32 : index
    %262 = vector.load %arg22[%c0_141, %c32] : memref<8x64xf32, #tpu.memory_space<vmem>>, vector<1x32xf32>
    %c7_142 = arith.constant 7 : index
    %c32_143 = arith.constant 32 : index
    %263 = vector.load %arg20[%c7_142, %c32_143] : memref<8x64xf32, #tpu.memory_space<vmem>>, vector<1x32xf32>
    tpu.vector_store %arg20[%c7_142, %c32_143], %262 {strides = array<i32>} : memref<8x64xf32, #tpu.memory_space<vmem>>, vector<1x32xf32>,
    %c1_144 = arith.constant 1 : index
    %c32_145 = arith.constant 32 : index
    %264 = vector.load %arg22[%c1_144, %c32_145] : memref<8x64xf32, #tpu.memory_space<vmem>>, vector<1x32xf32>
    %c6_146 = arith.constant 6 : index
    %c32_147 = arith.constant 32 : index
    %265 = vector.load %arg20[%c6_146, %c32_147] : memref<8x64xf32, #tpu.memory_space<vmem>>, vector<1x32xf32>
    tpu.vector_store %arg20[%c6_146, %c32_147], %264 {strides = array<i32>} : memref<8x64xf32, #tpu.memory_space<vmem>>, vector<1x32xf32>,
    %c2_148 = arith.constant 2 : index
    %c32_149 = arith.constant 32 : index
    %266 = vector.load %arg22[%c2_148, %c32_149] : memref<8x64xf32, #tpu.memory_space<vmem>>, vector<1x32xf32>
    %c5_150 = arith.constant 5 : index
    %c32_151 = arith.constant 32 : index
    %267 = vector.load %arg20[%c5_150, %c32_151] : memref<8x64xf32, #tpu.memory_space<vmem>>, vector<1x32xf32>
    tpu.vector_store %arg20[%c5_150, %c32_151], %266 {strides = array<i32>} : memref<8x64xf32, #tpu.memory_space<vmem>>, vector<1x32xf32>,
    %c3_152 = arith.constant 3 : index
    %c32_153 = arith.constant 32 : index
    %268 = vector.load %arg22[%c3_152, %c32_153] : memref<8x64xf32, #tpu.memory_space<vmem>>, vector<1x32xf32>
    %c4_154 = arith.constant 4 : index
    %c32_155 = arith.constant 32 : index
    %269 = vector.load %arg20[%c4_154, %c32_155] : memref<8x64xf32, #tpu.memory_space<vmem>>, vector<1x32xf32>
    tpu.vector_store %arg20[%c4_154, %c32_155], %268 {strides = array<i32>} : memref<8x64xf32, #tpu.memory_space<vmem>>, vector<1x32xf32>,
    %c4_156 = arith.constant 4 : index
    %c32_157 = arith.constant 32 : index
    %270 = vector.load %arg22[%c4_156, %c32_157] : memref<8x64xf32, #tpu.memory_space<vmem>>, vector<1x32xf32>
    %c3_158 = arith.constant 3 : index
    %c32_159 = arith.constant 32 : index
    %271 = vector.load %arg20[%c3_158, %c32_159] : memref<8x64xf32, #tpu.memory_space<vmem>>, vector<1x32xf32>
    tpu.vector_store %arg20[%c3_158, %c32_159], %270 {strides = array<i32>} : memref<8x64xf32, #tpu.memory_space<vmem>>, vector<1x32xf32>,
    %c5_160 = arith.constant 5 : index
    %c32_161 = arith.constant 32 : index
    %272 = vector.load %arg22[%c5_160, %c32_161] : memref<8x64xf32, #tpu.memory_space<vmem>>, vector<1x32xf32>
    %c2_162 = arith.constant 2 : index
    %c32_163 = arith.constant 32 : index
    %273 = vector.load %arg20[%c2_162, %c32_163] : memref<8x64xf32, #tpu.memory_space<vmem>>, vector<1x32xf32>
    tpu.vector_store %arg20[%c2_162, %c32_163], %272 {strides = array<i32>} : memref<8x64xf32, #tpu.memory_space<vmem>>, vector<1x32xf32>,
    %c6_164 = arith.constant 6 : index
    %c32_165 = arith.constant 32 : index
    %274 = vector.load %arg22[%c6_164, %c32_165] : memref<8x64xf32, #tpu.memory_space<vmem>>, vector<1x32xf32>
    %c1_166 = arith.constant 1 : index
    %c32_167 = arith.constant 32 : index
    %275 = vector.load %arg20[%c1_166, %c32_167] : memref<8x64xf32, #tpu.memory_space<vmem>>, vector<1x32xf32>
    tpu.vector_store %arg20[%c1_166, %c32_167], %274 {strides = array<i32>} : memref<8x64xf32, #tpu.memory_space<vmem>>, vector<1x32xf32>,
    %c7_168 = arith.constant 7 : index
    %c32_169 = arith.constant 32 : index
    %276 = vector.load %arg22[%c7_168, %c32_169] : memref<8x64xf32, #tpu.memory_space<vmem>>, vector<1x32xf32>
    %c0_170 = arith.constant 0 : index
    %c32_171 = arith.constant 32 : index
    %277 = vector.load %arg20[%c0_170, %c32_171] : memref<8x64xf32, #tpu.memory_space<vmem>>, vector<1x32xf32>
    tpu.vector_store %arg20[%c0_170, %c32_171], %276 {strides = array<i32>} : memref<8x64xf32, #tpu.memory_space<vmem>>, vector<1x32xf32>,
    %c0_172 = arith.constant 0 : index
    %c0_173 = arith.constant 0 : index
    %278 = vector.load %arg20[%c0_172, %c0_173] : memref<8x64xf32, #tpu.memory_space<vmem>>, vector<8x64xf32>
    %279 = arith.truncf %278 : vector<8x64xf32> to vector<8x64xbf16>
    %c1_174 = arith.constant 1 : index
    %c0_175 = arith.constant 0 : index
    %c0_176 = arith.constant 0 : index
    %280 = vector.load %arg10[%c1_174, %c0_175, %c0_176] : memref<3x64x512xbf16, #tpu.memory_space<vmem>>, vector<1x64x512xbf16>
    %281 = vector.shape_cast %280 : vector<1x64x512xbf16> to vector<64x512xbf16>
    %cst_177 = arith.constant dense<0.000000e+00> : vector<8x512xf32>
    %282 = tpu.matmul %279, %281, %cst_177 {dimension_numbers = #tpu.dot_dimension_numbers<[1], [0], [0], [1], [0, 0, 1, 1], [], []>} : vector<8x64xbf16>, vector<64x512xbf16>, vector<8x512xf32> -> vector<8x512xf32>
    %c1_178 = arith.constant 1 : index
    %c0_179 = arith.constant 0 : index
    %c0_180 = arith.constant 0 : index
    %283 = vector.load %arg11[%c1_178, %c0_179, %c0_180] : memref<3x1x512xf32, #tpu.memory_space<vmem>>, vector<1x1x512xf32>
    %284 = vector.shape_cast %283 : vector<1x1x512xf32> to vector<1x512xf32>
    %285 = vector.broadcast %284 : vector<1x512xf32> to vector<8x512xf32>
    %286 = arith.addf %282, %285 : vector<8x512xf32>
    %c0_181 = arith.constant 0 : index
    %c0_182 = arith.constant 0 : index
    %287 = vector.load %arg21[%c0_181, %c0_182] : memref<8x512xf32, #tpu.memory_space<vmem>>, vector<8x512xf32>
    tpu.vector_store %arg21[%c0_181, %c0_182], %286 {strides = array<i32>} : memref<8x512xf32, #tpu.memory_space<vmem>>, vector<8x512xf32>,
    %c1_183 = arith.constant 1 : index
    %c0_184 = arith.constant 0 : index
    %c0_185 = arith.constant 0 : index
    %288 = vector.load %arg12[%c1_183, %c0_184, %c0_185] : memref<3x64x256xf32, #tpu.memory_space<vmem>>, vector<1x64x256xf32>
    %289 = vector.shape_cast %288 : vector<1x64x256xf32> to vector<64x256xf32>
    %cst_186 = arith.constant 0.000000e+00 : f32
    %290 = vector.broadcast %cst_186 : f32 to vector<1x64xf32>
    %cst_187 = arith.constant 0.000000e+00 : f32
    %291 = vector.broadcast %cst_187 : f32 to vector<1x64xf32>
    %c0_188 = arith.constant 0 : index
    %c0_189 = arith.constant 0 : index
    %292 = vector.load %arg21[%c0_188, %c0_189] : memref<8x512xf32, #tpu.memory_space<vmem>>, vector<1x256xf32>
    %c7_190 = arith.constant 7 : index
    %c256_191 = arith.constant 256 : index
    %293 = vector.load %arg21[%c7_190, %c256_191] : memref<8x512xf32, #tpu.memory_space<vmem>>, vector<1x256xf32>
    %294 = arith.addf %292, %293 : vector<1x256xf32>
    %cst_192 = arith.constant dense<0.000000e+00> : vector<1x256xf32>
    %295 = tpu.matmul %290, %289, %cst_192 {dimension_numbers = #tpu.dot_dimension_numbers<[1], [0], [0], [1], [0, 0, 1, 1], [], []>} : vector<1x64xf32>, vector<64x256xf32>, vector<1x256xf32> -> vector<1x256xf32>
    %296 = arith.addf %294, %295 : vector<1x256xf32>
    %297 = vector.extract_strided_slice %296 {offsets = [0, 0], sizes = [1, 192], strides = [1, 1]} : vector<1x256xf32> to vector<1x192xf32>
    %298 = arith.negf %297 : vector<1x192xf32>
    %299 = math.exp %298 : vector<1x192xf32>
    %cst_193 = arith.constant 1.000000e+00 : f32
    %300 = vector.broadcast %cst_193 : f32 to vector<1x192xf32>
    %301 = arith.addf %300, %299 : vector<1x192xf32>
    %302 = arith.divf %300, %301 : vector<1x192xf32>
    %303 = vector.extract_strided_slice %296 {offsets = [0, 192], sizes = [1, 64], strides = [1, 1]} : vector<1x256xf32> to vector<1x64xf32>
    %304 = math.tanh %303 : vector<1x64xf32>
    %305 = vector.extract_strided_slice %302 {offsets = [0, 64], sizes = [1, 64], strides = [1, 1]} : vector<1x192xf32> to vector<1x64xf32>
    %306 = arith.mulf %305, %291 : vector<1x64xf32>
    %307 = vector.extract_strided_slice %302 {offsets = [0, 0], sizes = [1, 64], strides = [1, 1]} : vector<1x192xf32> to vector<1x64xf32>
    %308 = arith.mulf %307, %304 : vector<1x64xf32>
    %309 = arith.addf %306, %308 : vector<1x64xf32>
    %310 = vector.extract_strided_slice %302 {offsets = [0, 128], sizes = [1, 64], strides = [1, 1]} : vector<1x192xf32> to vector<1x64xf32>
    %311 = math.tanh %309 : vector<1x64xf32>
    %312 = arith.mulf %310, %311 : vector<1x64xf32>
    %c0_194 = arith.constant 0 : index
    %c0_195 = arith.constant 0 : index
    %313 = vector.load %arg22[%c0_194, %c0_195] : memref<8x64xf32, #tpu.memory_space<vmem>>, vector<1x64xf32>
    tpu.vector_store %arg22[%c0_194, %c0_195], %312 {strides = array<i32>} : memref<8x64xf32, #tpu.memory_space<vmem>>, vector<1x64xf32>,
    %c1_196 = arith.constant 1 : index
    %c0_197 = arith.constant 0 : index
    %314 = vector.load %arg21[%c1_196, %c0_197] : memref<8x512xf32, #tpu.memory_space<vmem>>, vector<1x256xf32>
    %c6_198 = arith.constant 6 : index
    %c256_199 = arith.constant 256 : index
    %315 = vector.load %arg21[%c6_198, %c256_199] : memref<8x512xf32, #tpu.memory_space<vmem>>, vector<1x256xf32>
    %316 = arith.addf %314, %315 : vector<1x256xf32>
    %cst_200 = arith.constant dense<0.000000e+00> : vector<1x256xf32>
    %317 = tpu.matmul %312, %289, %cst_200 {dimension_numbers = #tpu.dot_dimension_numbers<[1], [0], [0], [1], [0, 0, 1, 1], [], []>} : vector<1x64xf32>, vector<64x256xf32>, vector<1x256xf32> -> vector<1x256xf32>
    %318 = arith.addf %316, %317 : vector<1x256xf32>
    %319 = vector.extract_strided_slice %318 {offsets = [0, 0], sizes = [1, 192], strides = [1, 1]} : vector<1x256xf32> to vector<1x192xf32>
    %320 = arith.negf %319 : vector<1x192xf32>
    %321 = math.exp %320 : vector<1x192xf32>
    %cst_201 = arith.constant 1.000000e+00 : f32
    %322 = vector.broadcast %cst_201 : f32 to vector<1x192xf32>
    %323 = arith.addf %322, %321 : vector<1x192xf32>
    %324 = arith.divf %322, %323 : vector<1x192xf32>
    %325 = vector.extract_strided_slice %318 {offsets = [0, 192], sizes = [1, 64], strides = [1, 1]} : vector<1x256xf32> to vector<1x64xf32>
    %326 = math.tanh %325 : vector<1x64xf32>
    %327 = vector.extract_strided_slice %324 {offsets = [0, 64], sizes = [1, 64], strides = [1, 1]} : vector<1x192xf32> to vector<1x64xf32>
    %328 = arith.mulf %327, %309 : vector<1x64xf32>
    %329 = vector.extract_strided_slice %324 {offsets = [0, 0], sizes = [1, 64], strides = [1, 1]} : vector<1x192xf32> to vector<1x64xf32>
    %330 = arith.mulf %329, %326 : vector<1x64xf32>
    %331 = arith.addf %328, %330 : vector<1x64xf32>
    %332 = vector.extract_strided_slice %324 {offsets = [0, 128], sizes = [1, 64], strides = [1, 1]} : vector<1x192xf32> to vector<1x64xf32>
    %333 = math.tanh %331 : vector<1x64xf32>
    %334 = arith.mulf %332, %333 : vector<1x64xf32>
    %c1_202 = arith.constant 1 : index
    %c0_203 = arith.constant 0 : index
    %335 = vector.load %arg22[%c1_202, %c0_203] : memref<8x64xf32, #tpu.memory_space<vmem>>, vector<1x64xf32>
    tpu.vector_store %arg22[%c1_202, %c0_203], %334 {strides = array<i32>} : memref<8x64xf32, #tpu.memory_space<vmem>>, vector<1x64xf32>,
    %c2_204 = arith.constant 2 : index
    %c0_205 = arith.constant 0 : index
    %336 = vector.load %arg21[%c2_204, %c0_205] : memref<8x512xf32, #tpu.memory_space<vmem>>, vector<1x256xf32>
    %c5_206 = arith.constant 5 : index
    %c256_207 = arith.constant 256 : index
    %337 = vector.load %arg21[%c5_206, %c256_207] : memref<8x512xf32, #tpu.memory_space<vmem>>, vector<1x256xf32>
    %338 = arith.addf %336, %337 : vector<1x256xf32>
    %cst_208 = arith.constant dense<0.000000e+00> : vector<1x256xf32>
    %339 = tpu.matmul %334, %289, %cst_208 {dimension_numbers = #tpu.dot_dimension_numbers<[1], [0], [0], [1], [0, 0, 1, 1], [], []>} : vector<1x64xf32>, vector<64x256xf32>, vector<1x256xf32> -> vector<1x256xf32>
    %340 = arith.addf %338, %339 : vector<1x256xf32>
    %341 = vector.extract_strided_slice %340 {offsets = [0, 0], sizes = [1, 192], strides = [1, 1]} : vector<1x256xf32> to vector<1x192xf32>
    %342 = arith.negf %341 : vector<1x192xf32>
    %343 = math.exp %342 : vector<1x192xf32>
    %cst_209 = arith.constant 1.000000e+00 : f32
    %344 = vector.broadcast %cst_209 : f32 to vector<1x192xf32>
    %345 = arith.addf %344, %343 : vector<1x192xf32>
    %346 = arith.divf %344, %345 : vector<1x192xf32>
    %347 = vector.extract_strided_slice %340 {offsets = [0, 192], sizes = [1, 64], strides = [1, 1]} : vector<1x256xf32> to vector<1x64xf32>
    %348 = math.tanh %347 : vector<1x64xf32>
    %349 = vector.extract_strided_slice %346 {offsets = [0, 64], sizes = [1, 64], strides = [1, 1]} : vector<1x192xf32> to vector<1x64xf32>
    %350 = arith.mulf %349, %331 : vector<1x64xf32>
    %351 = vector.extract_strided_slice %346 {offsets = [0, 0], sizes = [1, 64], strides = [1, 1]} : vector<1x192xf32> to vector<1x64xf32>
    %352 = arith.mulf %351, %348 : vector<1x64xf32>
    %353 = arith.addf %350, %352 : vector<1x64xf32>
    %354 = vector.extract_strided_slice %346 {offsets = [0, 128], sizes = [1, 64], strides = [1, 1]} : vector<1x192xf32> to vector<1x64xf32>
    %355 = math.tanh %353 : vector<1x64xf32>
    %356 = arith.mulf %354, %355 : vector<1x64xf32>
    %c2_210 = arith.constant 2 : index
    %c0_211 = arith.constant 0 : index
    %357 = vector.load %arg22[%c2_210, %c0_211] : memref<8x64xf32, #tpu.memory_space<vmem>>, vector<1x64xf32>
    tpu.vector_store %arg22[%c2_210, %c0_211], %356 {strides = array<i32>} : memref<8x64xf32, #tpu.memory_space<vmem>>, vector<1x64xf32>,
    %c3_212 = arith.constant 3 : index
    %c0_213 = arith.constant 0 : index
    %358 = vector.load %arg21[%c3_212, %c0_213] : memref<8x512xf32, #tpu.memory_space<vmem>>, vector<1x256xf32>
    %c4_214 = arith.constant 4 : index
    %c256_215 = arith.constant 256 : index
    %359 = vector.load %arg21[%c4_214, %c256_215] : memref<8x512xf32, #tpu.memory_space<vmem>>, vector<1x256xf32>
    %360 = arith.addf %358, %359 : vector<1x256xf32>
    %cst_216 = arith.constant dense<0.000000e+00> : vector<1x256xf32>
    %361 = tpu.matmul %356, %289, %cst_216 {dimension_numbers = #tpu.dot_dimension_numbers<[1], [0], [0], [1], [0, 0, 1, 1], [], []>} : vector<1x64xf32>, vector<64x256xf32>, vector<1x256xf32> -> vector<1x256xf32>
    %362 = arith.addf %360, %361 : vector<1x256xf32>
    %363 = vector.extract_strided_slice %362 {offsets = [0, 0], sizes = [1, 192], strides = [1, 1]} : vector<1x256xf32> to vector<1x192xf32>
    %364 = arith.negf %363 : vector<1x192xf32>
    %365 = math.exp %364 : vector<1x192xf32>
    %cst_217 = arith.constant 1.000000e+00 : f32
    %366 = vector.broadcast %cst_217 : f32 to vector<1x192xf32>
    %367 = arith.addf %366, %365 : vector<1x192xf32>
    %368 = arith.divf %366, %367 : vector<1x192xf32>
    %369 = vector.extract_strided_slice %362 {offsets = [0, 192], sizes = [1, 64], strides = [1, 1]} : vector<1x256xf32> to vector<1x64xf32>
    %370 = math.tanh %369 : vector<1x64xf32>
    %371 = vector.extract_strided_slice %368 {offsets = [0, 64], sizes = [1, 64], strides = [1, 1]} : vector<1x192xf32> to vector<1x64xf32>
    %372 = arith.mulf %371, %353 : vector<1x64xf32>
    %373 = vector.extract_strided_slice %368 {offsets = [0, 0], sizes = [1, 64], strides = [1, 1]} : vector<1x192xf32> to vector<1x64xf32>
    %374 = arith.mulf %373, %370 : vector<1x64xf32>
    %375 = arith.addf %372, %374 : vector<1x64xf32>
    %376 = vector.extract_strided_slice %368 {offsets = [0, 128], sizes = [1, 64], strides = [1, 1]} : vector<1x192xf32> to vector<1x64xf32>
    %377 = math.tanh %375 : vector<1x64xf32>
    %378 = arith.mulf %376, %377 : vector<1x64xf32>
    %c3_218 = arith.constant 3 : index
    %c0_219 = arith.constant 0 : index
    %379 = vector.load %arg22[%c3_218, %c0_219] : memref<8x64xf32, #tpu.memory_space<vmem>>, vector<1x64xf32>
    tpu.vector_store %arg22[%c3_218, %c0_219], %378 {strides = array<i32>} : memref<8x64xf32, #tpu.memory_space<vmem>>, vector<1x64xf32>,
    %c4_220 = arith.constant 4 : index
    %c0_221 = arith.constant 0 : index
    %380 = vector.load %arg21[%c4_220, %c0_221] : memref<8x512xf32, #tpu.memory_space<vmem>>, vector<1x256xf32>
    %c3_222 = arith.constant 3 : index
    %c256_223 = arith.constant 256 : index
    %381 = vector.load %arg21[%c3_222, %c256_223] : memref<8x512xf32, #tpu.memory_space<vmem>>, vector<1x256xf32>
    %382 = arith.addf %380, %381 : vector<1x256xf32>
    %cst_224 = arith.constant dense<0.000000e+00> : vector<1x256xf32>
    %383 = tpu.matmul %378, %289, %cst_224 {dimension_numbers = #tpu.dot_dimension_numbers<[1], [0], [0], [1], [0, 0, 1, 1], [], []>} : vector<1x64xf32>, vector<64x256xf32>, vector<1x256xf32> -> vector<1x256xf32>
    %384 = arith.addf %382, %383 : vector<1x256xf32>
    %385 = vector.extract_strided_slice %384 {offsets = [0, 0], sizes = [1, 192], strides = [1, 1]} : vector<1x256xf32> to vector<1x192xf32>
    %386 = arith.negf %385 : vector<1x192xf32>
    %387 = math.exp %386 : vector<1x192xf32>
    %cst_225 = arith.constant 1.000000e+00 : f32
    %388 = vector.broadcast %cst_225 : f32 to vector<1x192xf32>
    %389 = arith.addf %388, %387 : vector<1x192xf32>
    %390 = arith.divf %388, %389 : vector<1x192xf32>
    %391 = vector.extract_strided_slice %384 {offsets = [0, 192], sizes = [1, 64], strides = [1, 1]} : vector<1x256xf32> to vector<1x64xf32>
    %392 = math.tanh %391 : vector<1x64xf32>
    %393 = vector.extract_strided_slice %390 {offsets = [0, 64], sizes = [1, 64], strides = [1, 1]} : vector<1x192xf32> to vector<1x64xf32>
    %394 = arith.mulf %393, %375 : vector<1x64xf32>
    %395 = vector.extract_strided_slice %390 {offsets = [0, 0], sizes = [1, 64], strides = [1, 1]} : vector<1x192xf32> to vector<1x64xf32>
    %396 = arith.mulf %395, %392 : vector<1x64xf32>
    %397 = arith.addf %394, %396 : vector<1x64xf32>
    %398 = vector.extract_strided_slice %390 {offsets = [0, 128], sizes = [1, 64], strides = [1, 1]} : vector<1x192xf32> to vector<1x64xf32>
    %399 = math.tanh %397 : vector<1x64xf32>
    %400 = arith.mulf %398, %399 : vector<1x64xf32>
    %c4_226 = arith.constant 4 : index
    %c0_227 = arith.constant 0 : index
    %401 = vector.load %arg22[%c4_226, %c0_227] : memref<8x64xf32, #tpu.memory_space<vmem>>, vector<1x64xf32>
    tpu.vector_store %arg22[%c4_226, %c0_227], %400 {strides = array<i32>} : memref<8x64xf32, #tpu.memory_space<vmem>>, vector<1x64xf32>,
    %c5_228 = arith.constant 5 : index
    %c0_229 = arith.constant 0 : index
    %402 = vector.load %arg21[%c5_228, %c0_229] : memref<8x512xf32, #tpu.memory_space<vmem>>, vector<1x256xf32>
    %c2_230 = arith.constant 2 : index
    %c256_231 = arith.constant 256 : index
    %403 = vector.load %arg21[%c2_230, %c256_231] : memref<8x512xf32, #tpu.memory_space<vmem>>, vector<1x256xf32>
    %404 = arith.addf %402, %403 : vector<1x256xf32>
    %cst_232 = arith.constant dense<0.000000e+00> : vector<1x256xf32>
    %405 = tpu.matmul %400, %289, %cst_232 {dimension_numbers = #tpu.dot_dimension_numbers<[1], [0], [0], [1], [0, 0, 1, 1], [], []>} : vector<1x64xf32>, vector<64x256xf32>, vector<1x256xf32> -> vector<1x256xf32>
    %406 = arith.addf %404, %405 : vector<1x256xf32>
    %407 = vector.extract_strided_slice %406 {offsets = [0, 0], sizes = [1, 192], strides = [1, 1]} : vector<1x256xf32> to vector<1x192xf32>
    %408 = arith.negf %407 : vector<1x192xf32>
    %409 = math.exp %408 : vector<1x192xf32>
    %cst_233 = arith.constant 1.000000e+00 : f32
    %410 = vector.broadcast %cst_233 : f32 to vector<1x192xf32>
    %411 = arith.addf %410, %409 : vector<1x192xf32>
    %412 = arith.divf %410, %411 : vector<1x192xf32>
    %413 = vector.extract_strided_slice %406 {offsets = [0, 192], sizes = [1, 64], strides = [1, 1]} : vector<1x256xf32> to vector<1x64xf32>
    %414 = math.tanh %413 : vector<1x64xf32>
    %415 = vector.extract_strided_slice %412 {offsets = [0, 64], sizes = [1, 64], strides = [1, 1]} : vector<1x192xf32> to vector<1x64xf32>
    %416 = arith.mulf %415, %397 : vector<1x64xf32>
    %417 = vector.extract_strided_slice %412 {offsets = [0, 0], sizes = [1, 64], strides = [1, 1]} : vector<1x192xf32> to vector<1x64xf32>
    %418 = arith.mulf %417, %414 : vector<1x64xf32>
    %419 = arith.addf %416, %418 : vector<1x64xf32>
    %420 = vector.extract_strided_slice %412 {offsets = [0, 128], sizes = [1, 64], strides = [1, 1]} : vector<1x192xf32> to vector<1x64xf32>
    %421 = math.tanh %419 : vector<1x64xf32>
    %422 = arith.mulf %420, %421 : vector<1x64xf32>
    %c5_234 = arith.constant 5 : index
    %c0_235 = arith.constant 0 : index
    %423 = vector.load %arg22[%c5_234, %c0_235] : memref<8x64xf32, #tpu.memory_space<vmem>>, vector<1x64xf32>
    tpu.vector_store %arg22[%c5_234, %c0_235], %422 {strides = array<i32>} : memref<8x64xf32, #tpu.memory_space<vmem>>, vector<1x64xf32>,
    %c6_236 = arith.constant 6 : index
    %c0_237 = arith.constant 0 : index
    %424 = vector.load %arg21[%c6_236, %c0_237] : memref<8x512xf32, #tpu.memory_space<vmem>>, vector<1x256xf32>
    %c1_238 = arith.constant 1 : index
    %c256_239 = arith.constant 256 : index
    %425 = vector.load %arg21[%c1_238, %c256_239] : memref<8x512xf32, #tpu.memory_space<vmem>>, vector<1x256xf32>
    %426 = arith.addf %424, %425 : vector<1x256xf32>
    %cst_240 = arith.constant dense<0.000000e+00> : vector<1x256xf32>
    %427 = tpu.matmul %422, %289, %cst_240 {dimension_numbers = #tpu.dot_dimension_numbers<[1], [0], [0], [1], [0, 0, 1, 1], [], []>} : vector<1x64xf32>, vector<64x256xf32>, vector<1x256xf32> -> vector<1x256xf32>
    %428 = arith.addf %426, %427 : vector<1x256xf32>
    %429 = vector.extract_strided_slice %428 {offsets = [0, 0], sizes = [1, 192], strides = [1, 1]} : vector<1x256xf32> to vector<1x192xf32>
    %430 = arith.negf %429 : vector<1x192xf32>
    %431 = math.exp %430 : vector<1x192xf32>
    %cst_241 = arith.constant 1.000000e+00 : f32
    %432 = vector.broadcast %cst_241 : f32 to vector<1x192xf32>
    %433 = arith.addf %432, %431 : vector<1x192xf32>
    %434 = arith.divf %432, %433 : vector<1x192xf32>
    %435 = vector.extract_strided_slice %428 {offsets = [0, 192], sizes = [1, 64], strides = [1, 1]} : vector<1x256xf32> to vector<1x64xf32>
    %436 = math.tanh %435 : vector<1x64xf32>
    %437 = vector.extract_strided_slice %434 {offsets = [0, 64], sizes = [1, 64], strides = [1, 1]} : vector<1x192xf32> to vector<1x64xf32>
    %438 = arith.mulf %437, %419 : vector<1x64xf32>
    %439 = vector.extract_strided_slice %434 {offsets = [0, 0], sizes = [1, 64], strides = [1, 1]} : vector<1x192xf32> to vector<1x64xf32>
    %440 = arith.mulf %439, %436 : vector<1x64xf32>
    %441 = arith.addf %438, %440 : vector<1x64xf32>
    %442 = vector.extract_strided_slice %434 {offsets = [0, 128], sizes = [1, 64], strides = [1, 1]} : vector<1x192xf32> to vector<1x64xf32>
    %443 = math.tanh %441 : vector<1x64xf32>
    %444 = arith.mulf %442, %443 : vector<1x64xf32>
    %c6_242 = arith.constant 6 : index
    %c0_243 = arith.constant 0 : index
    %445 = vector.load %arg22[%c6_242, %c0_243] : memref<8x64xf32, #tpu.memory_space<vmem>>, vector<1x64xf32>
    tpu.vector_store %arg22[%c6_242, %c0_243], %444 {strides = array<i32>} : memref<8x64xf32, #tpu.memory_space<vmem>>, vector<1x64xf32>,
    %c7_244 = arith.constant 7 : index
    %c0_245 = arith.constant 0 : index
    %446 = vector.load %arg21[%c7_244, %c0_245] : memref<8x512xf32, #tpu.memory_space<vmem>>, vector<1x256xf32>
    %c0_246 = arith.constant 0 : index
    %c256_247 = arith.constant 256 : index
    %447 = vector.load %arg21[%c0_246, %c256_247] : memref<8x512xf32, #tpu.memory_space<vmem>>, vector<1x256xf32>
    %448 = arith.addf %446, %447 : vector<1x256xf32>
    %cst_248 = arith.constant dense<0.000000e+00> : vector<1x256xf32>
    %449 = tpu.matmul %444, %289, %cst_248 {dimension_numbers = #tpu.dot_dimension_numbers<[1], [0], [0], [1], [0, 0, 1, 1], [], []>} : vector<1x64xf32>, vector<64x256xf32>, vector<1x256xf32> -> vector<1x256xf32>
    %450 = arith.addf %448, %449 : vector<1x256xf32>
    %451 = vector.extract_strided_slice %450 {offsets = [0, 0], sizes = [1, 192], strides = [1, 1]} : vector<1x256xf32> to vector<1x192xf32>
    %452 = arith.negf %451 : vector<1x192xf32>
    %453 = math.exp %452 : vector<1x192xf32>
    %cst_249 = arith.constant 1.000000e+00 : f32
    %454 = vector.broadcast %cst_249 : f32 to vector<1x192xf32>
    %455 = arith.addf %454, %453 : vector<1x192xf32>
    %456 = arith.divf %454, %455 : vector<1x192xf32>
    %457 = vector.extract_strided_slice %450 {offsets = [0, 192], sizes = [1, 64], strides = [1, 1]} : vector<1x256xf32> to vector<1x64xf32>
    %458 = math.tanh %457 : vector<1x64xf32>
    %459 = vector.extract_strided_slice %456 {offsets = [0, 64], sizes = [1, 64], strides = [1, 1]} : vector<1x192xf32> to vector<1x64xf32>
    %460 = arith.mulf %459, %441 : vector<1x64xf32>
    %461 = vector.extract_strided_slice %456 {offsets = [0, 0], sizes = [1, 64], strides = [1, 1]} : vector<1x192xf32> to vector<1x64xf32>
    %462 = arith.mulf %461, %458 : vector<1x64xf32>
    %463 = arith.addf %460, %462 : vector<1x64xf32>
    %464 = vector.extract_strided_slice %456 {offsets = [0, 128], sizes = [1, 64], strides = [1, 1]} : vector<1x192xf32> to vector<1x64xf32>
    %465 = math.tanh %463 : vector<1x64xf32>
    %466 = arith.mulf %464, %465 : vector<1x64xf32>
    %c7_250 = arith.constant 7 : index
    %c0_251 = arith.constant 0 : index
    %467 = vector.load %arg22[%c7_250, %c0_251] : memref<8x64xf32, #tpu.memory_space<vmem>>, vector<1x64xf32>
    tpu.vector_store %arg22[%c7_250, %c0_251], %466 {strides = array<i32>} : memref<8x64xf32, #tpu.memory_space<vmem>>, vector<1x64xf32>,
    %c0_252 = arith.constant 0 : index
    %c0_253 = arith.constant 0 : index
    %468 = vector.load %arg22[%c0_252, %c0_253] : memref<8x64xf32, #tpu.memory_space<vmem>>, vector<8x32xf32>
    %c0_254 = arith.constant 0 : index
    %c0_255 = arith.constant 0 : index
    %469 = vector.load %arg20[%c0_254, %c0_255] : memref<8x64xf32, #tpu.memory_space<vmem>>, vector<8x32xf32>
    tpu.vector_store %arg20[%c0_254, %c0_255], %468 {strides = array<i32>} : memref<8x64xf32, #tpu.memory_space<vmem>>, vector<8x32xf32>,
    %c0_256 = arith.constant 0 : index
    %c32_257 = arith.constant 32 : index
    %470 = vector.load %arg22[%c0_256, %c32_257] : memref<8x64xf32, #tpu.memory_space<vmem>>, vector<1x32xf32>
    %c7_258 = arith.constant 7 : index
    %c32_259 = arith.constant 32 : index
    %471 = vector.load %arg20[%c7_258, %c32_259] : memref<8x64xf32, #tpu.memory_space<vmem>>, vector<1x32xf32>
    tpu.vector_store %arg20[%c7_258, %c32_259], %470 {strides = array<i32>} : memref<8x64xf32, #tpu.memory_space<vmem>>, vector<1x32xf32>,
    %c1_260 = arith.constant 1 : index
    %c32_261 = arith.constant 32 : index
    %472 = vector.load %arg22[%c1_260, %c32_261] : memref<8x64xf32, #tpu.memory_space<vmem>>, vector<1x32xf32>
    %c6_262 = arith.constant 6 : index
    %c32_263 = arith.constant 32 : index
    %473 = vector.load %arg20[%c6_262, %c32_263] : memref<8x64xf32, #tpu.memory_space<vmem>>, vector<1x32xf32>
    tpu.vector_store %arg20[%c6_262, %c32_263], %472 {strides = array<i32>} : memref<8x64xf32, #tpu.memory_space<vmem>>, vector<1x32xf32>,
    %c2_264 = arith.constant 2 : index
    %c32_265 = arith.constant 32 : index
    %474 = vector.load %arg22[%c2_264, %c32_265] : memref<8x64xf32, #tpu.memory_space<vmem>>, vector<1x32xf32>
    %c5_266 = arith.constant 5 : index
    %c32_267 = arith.constant 32 : index
    %475 = vector.load %arg20[%c5_266, %c32_267] : memref<8x64xf32, #tpu.memory_space<vmem>>, vector<1x32xf32>
    tpu.vector_store %arg20[%c5_266, %c32_267], %474 {strides = array<i32>} : memref<8x64xf32, #tpu.memory_space<vmem>>, vector<1x32xf32>,
    %c3_268 = arith.constant 3 : index
    %c32_269 = arith.constant 32 : index
    %476 = vector.load %arg22[%c3_268, %c32_269] : memref<8x64xf32, #tpu.memory_space<vmem>>, vector<1x32xf32>
    %c4_270 = arith.constant 4 : index
    %c32_271 = arith.constant 32 : index
    %477 = vector.load %arg20[%c4_270, %c32_271] : memref<8x64xf32, #tpu.memory_space<vmem>>, vector<1x32xf32>
    tpu.vector_store %arg20[%c4_270, %c32_271], %476 {strides = array<i32>} : memref<8x64xf32, #tpu.memory_space<vmem>>, vector<1x32xf32>,
    %c4_272 = arith.constant 4 : index
    %c32_273 = arith.constant 32 : index
    %478 = vector.load %arg22[%c4_272, %c32_273] : memref<8x64xf32, #tpu.memory_space<vmem>>, vector<1x32xf32>
    %c3_274 = arith.constant 3 : index
    %c32_275 = arith.constant 32 : index
    %479 = vector.load %arg20[%c3_274, %c32_275] : memref<8x64xf32, #tpu.memory_space<vmem>>, vector<1x32xf32>
    tpu.vector_store %arg20[%c3_274, %c32_275], %478 {strides = array<i32>} : memref<8x64xf32, #tpu.memory_space<vmem>>, vector<1x32xf32>,
    %c5_276 = arith.constant 5 : index
    %c32_277 = arith.constant 32 : index
    %480 = vector.load %arg22[%c5_276, %c32_277] : memref<8x64xf32, #tpu.memory_space<vmem>>, vector<1x32xf32>
    %c2_278 = arith.constant 2 : index
    %c32_279 = arith.constant 32 : index
    %481 = vector.load %arg20[%c2_278, %c32_279] : memref<8x64xf32, #tpu.memory_space<vmem>>, vector<1x32xf32>
    tpu.vector_store %arg20[%c2_278, %c32_279], %480 {strides = array<i32>} : memref<8x64xf32, #tpu.memory_space<vmem>>, vector<1x32xf32>,
    %c6_280 = arith.constant 6 : index
    %c32_281 = arith.constant 32 : index
    %482 = vector.load %arg22[%c6_280, %c32_281] : memref<8x64xf32, #tpu.memory_space<vmem>>, vector<1x32xf32>
    %c1_282 = arith.constant 1 : index
    %c32_283 = arith.constant 32 : index
    %483 = vector.load %arg20[%c1_282, %c32_283] : memref<8x64xf32, #tpu.memory_space<vmem>>, vector<1x32xf32>
    tpu.vector_store %arg20[%c1_282, %c32_283], %482 {strides = array<i32>} : memref<8x64xf32, #tpu.memory_space<vmem>>, vector<1x32xf32>,
    %c7_284 = arith.constant 7 : index
    %c32_285 = arith.constant 32 : index
    %484 = vector.load %arg22[%c7_284, %c32_285] : memref<8x64xf32, #tpu.memory_space<vmem>>, vector<1x32xf32>
    %c0_286 = arith.constant 0 : index
    %c32_287 = arith.constant 32 : index
    %485 = vector.load %arg20[%c0_286, %c32_287] : memref<8x64xf32, #tpu.memory_space<vmem>>, vector<1x32xf32>
    tpu.vector_store %arg20[%c0_286, %c32_287], %484 {strides = array<i32>} : memref<8x64xf32, #tpu.memory_space<vmem>>, vector<1x32xf32>,
    %c0_288 = arith.constant 0 : index
    %c0_289 = arith.constant 0 : index
    %486 = vector.load %arg20[%c0_288, %c0_289] : memref<8x64xf32, #tpu.memory_space<vmem>>, vector<8x64xf32>
    %487 = arith.truncf %486 : vector<8x64xf32> to vector<8x64xbf16>
    %c2_290 = arith.constant 2 : index
    %c0_291 = arith.constant 0 : index
    %c0_292 = arith.constant 0 : index
    %488 = vector.load %arg10[%c2_290, %c0_291, %c0_292] : memref<3x64x512xbf16, #tpu.memory_space<vmem>>, vector<1x64x512xbf16>
    %489 = vector.shape_cast %488 : vector<1x64x512xbf16> to vector<64x512xbf16>
    %cst_293 = arith.constant dense<0.000000e+00> : vector<8x512xf32>
    %490 = tpu.matmul %487, %489, %cst_293 {dimension_numbers = #tpu.dot_dimension_numbers<[1], [0], [0], [1], [0, 0, 1, 1], [], []>} : vector<8x64xbf16>, vector<64x512xbf16>, vector<8x512xf32> -> vector<8x512xf32>
    %c2_294 = arith.constant 2 : index
    %c0_295 = arith.constant 0 : index
    %c0_296 = arith.constant 0 : index
    %491 = vector.load %arg11[%c2_294, %c0_295, %c0_296] : memref<3x1x512xf32, #tpu.memory_space<vmem>>, vector<1x1x512xf32>
    %492 = vector.shape_cast %491 : vector<1x1x512xf32> to vector<1x512xf32>
    %493 = vector.broadcast %492 : vector<1x512xf32> to vector<8x512xf32>
    %494 = arith.addf %490, %493 : vector<8x512xf32>
    %c0_297 = arith.constant 0 : index
    %c0_298 = arith.constant 0 : index
    %495 = vector.load %arg21[%c0_297, %c0_298] : memref<8x512xf32, #tpu.memory_space<vmem>>, vector<8x512xf32>
    tpu.vector_store %arg21[%c0_297, %c0_298], %494 {strides = array<i32>} : memref<8x512xf32, #tpu.memory_space<vmem>>, vector<8x512xf32>,
    %c2_299 = arith.constant 2 : index
    %c0_300 = arith.constant 0 : index
    %c0_301 = arith.constant 0 : index
    %496 = vector.load %arg12[%c2_299, %c0_300, %c0_301] : memref<3x64x256xf32, #tpu.memory_space<vmem>>, vector<1x64x256xf32>
    %497 = vector.shape_cast %496 : vector<1x64x256xf32> to vector<64x256xf32>
    %cst_302 = arith.constant 0.000000e+00 : f32
    %498 = vector.broadcast %cst_302 : f32 to vector<1x64xf32>
    %cst_303 = arith.constant 0.000000e+00 : f32
    %499 = vector.broadcast %cst_303 : f32 to vector<1x64xf32>
    %c0_304 = arith.constant 0 : index
    %c0_305 = arith.constant 0 : index
    %500 = vector.load %arg21[%c0_304, %c0_305] : memref<8x512xf32, #tpu.memory_space<vmem>>, vector<1x256xf32>
    %c7_306 = arith.constant 7 : index
    %c256_307 = arith.constant 256 : index
    %501 = vector.load %arg21[%c7_306, %c256_307] : memref<8x512xf32, #tpu.memory_space<vmem>>, vector<1x256xf32>
    %502 = arith.addf %500, %501 : vector<1x256xf32>
    %cst_308 = arith.constant dense<0.000000e+00> : vector<1x256xf32>
    %503 = tpu.matmul %498, %497, %cst_308 {dimension_numbers = #tpu.dot_dimension_numbers<[1], [0], [0], [1], [0, 0, 1, 1], [], []>} : vector<1x64xf32>, vector<64x256xf32>, vector<1x256xf32> -> vector<1x256xf32>
    %504 = arith.addf %502, %503 : vector<1x256xf32>
    %505 = vector.extract_strided_slice %504 {offsets = [0, 0], sizes = [1, 192], strides = [1, 1]} : vector<1x256xf32> to vector<1x192xf32>
    %506 = arith.negf %505 : vector<1x192xf32>
    %507 = math.exp %506 : vector<1x192xf32>
    %cst_309 = arith.constant 1.000000e+00 : f32
    %508 = vector.broadcast %cst_309 : f32 to vector<1x192xf32>
    %509 = arith.addf %508, %507 : vector<1x192xf32>
    %510 = arith.divf %508, %509 : vector<1x192xf32>
    %511 = vector.extract_strided_slice %504 {offsets = [0, 192], sizes = [1, 64], strides = [1, 1]} : vector<1x256xf32> to vector<1x64xf32>
    %512 = math.tanh %511 : vector<1x64xf32>
    %513 = vector.extract_strided_slice %510 {offsets = [0, 64], sizes = [1, 64], strides = [1, 1]} : vector<1x192xf32> to vector<1x64xf32>
    %514 = arith.mulf %513, %499 : vector<1x64xf32>
    %515 = vector.extract_strided_slice %510 {offsets = [0, 0], sizes = [1, 64], strides = [1, 1]} : vector<1x192xf32> to vector<1x64xf32>
    %516 = arith.mulf %515, %512 : vector<1x64xf32>
    %517 = arith.addf %514, %516 : vector<1x64xf32>
    %518 = vector.extract_strided_slice %510 {offsets = [0, 128], sizes = [1, 64], strides = [1, 1]} : vector<1x192xf32> to vector<1x64xf32>
    %519 = math.tanh %517 : vector<1x64xf32>
    %520 = arith.mulf %518, %519 : vector<1x64xf32>
    %c0_310 = arith.constant 0 : index
    %c0_311 = arith.constant 0 : index
    %521 = vector.load %arg22[%c0_310, %c0_311] : memref<8x64xf32, #tpu.memory_space<vmem>>, vector<1x64xf32>
    tpu.vector_store %arg22[%c0_310, %c0_311], %520 {strides = array<i32>} : memref<8x64xf32, #tpu.memory_space<vmem>>, vector<1x64xf32>,
    %c1_312 = arith.constant 1 : index
    %c0_313 = arith.constant 0 : index
    %522 = vector.load %arg21[%c1_312, %c0_313] : memref<8x512xf32, #tpu.memory_space<vmem>>, vector<1x256xf32>
    %c6_314 = arith.constant 6 : index
    %c256_315 = arith.constant 256 : index
    %523 = vector.load %arg21[%c6_314, %c256_315] : memref<8x512xf32, #tpu.memory_space<vmem>>, vector<1x256xf32>
    %524 = arith.addf %522, %523 : vector<1x256xf32>
    %cst_316 = arith.constant dense<0.000000e+00> : vector<1x256xf32>
    %525 = tpu.matmul %520, %497, %cst_316 {dimension_numbers = #tpu.dot_dimension_numbers<[1], [0], [0], [1], [0, 0, 1, 1], [], []>} : vector<1x64xf32>, vector<64x256xf32>, vector<1x256xf32> -> vector<1x256xf32>
    %526 = arith.addf %524, %525 : vector<1x256xf32>
    %527 = vector.extract_strided_slice %526 {offsets = [0, 0], sizes = [1, 192], strides = [1, 1]} : vector<1x256xf32> to vector<1x192xf32>
    %528 = arith.negf %527 : vector<1x192xf32>
    %529 = math.exp %528 : vector<1x192xf32>
    %cst_317 = arith.constant 1.000000e+00 : f32
    %530 = vector.broadcast %cst_317 : f32 to vector<1x192xf32>
    %531 = arith.addf %530, %529 : vector<1x192xf32>
    %532 = arith.divf %530, %531 : vector<1x192xf32>
    %533 = vector.extract_strided_slice %526 {offsets = [0, 192], sizes = [1, 64], strides = [1, 1]} : vector<1x256xf32> to vector<1x64xf32>
    %534 = math.tanh %533 : vector<1x64xf32>
    %535 = vector.extract_strided_slice %532 {offsets = [0, 64], sizes = [1, 64], strides = [1, 1]} : vector<1x192xf32> to vector<1x64xf32>
    %536 = arith.mulf %535, %517 : vector<1x64xf32>
    %537 = vector.extract_strided_slice %532 {offsets = [0, 0], sizes = [1, 64], strides = [1, 1]} : vector<1x192xf32> to vector<1x64xf32>
    %538 = arith.mulf %537, %534 : vector<1x64xf32>
    %539 = arith.addf %536, %538 : vector<1x64xf32>
    %540 = vector.extract_strided_slice %532 {offsets = [0, 128], sizes = [1, 64], strides = [1, 1]} : vector<1x192xf32> to vector<1x64xf32>
    %541 = math.tanh %539 : vector<1x64xf32>
    %542 = arith.mulf %540, %541 : vector<1x64xf32>
    %c1_318 = arith.constant 1 : index
    %c0_319 = arith.constant 0 : index
    %543 = vector.load %arg22[%c1_318, %c0_319] : memref<8x64xf32, #tpu.memory_space<vmem>>, vector<1x64xf32>
    tpu.vector_store %arg22[%c1_318, %c0_319], %542 {strides = array<i32>} : memref<8x64xf32, #tpu.memory_space<vmem>>, vector<1x64xf32>,
    %c2_320 = arith.constant 2 : index
    %c0_321 = arith.constant 0 : index
    %544 = vector.load %arg21[%c2_320, %c0_321] : memref<8x512xf32, #tpu.memory_space<vmem>>, vector<1x256xf32>
    %c5_322 = arith.constant 5 : index
    %c256_323 = arith.constant 256 : index
    %545 = vector.load %arg21[%c5_322, %c256_323] : memref<8x512xf32, #tpu.memory_space<vmem>>, vector<1x256xf32>
    %546 = arith.addf %544, %545 : vector<1x256xf32>
    %cst_324 = arith.constant dense<0.000000e+00> : vector<1x256xf32>
    %547 = tpu.matmul %542, %497, %cst_324 {dimension_numbers = #tpu.dot_dimension_numbers<[1], [0], [0], [1], [0, 0, 1, 1], [], []>} : vector<1x64xf32>, vector<64x256xf32>, vector<1x256xf32> -> vector<1x256xf32>
    %548 = arith.addf %546, %547 : vector<1x256xf32>
    %549 = vector.extract_strided_slice %548 {offsets = [0, 0], sizes = [1, 192], strides = [1, 1]} : vector<1x256xf32> to vector<1x192xf32>
    %550 = arith.negf %549 : vector<1x192xf32>
    %551 = math.exp %550 : vector<1x192xf32>
    %cst_325 = arith.constant 1.000000e+00 : f32
    %552 = vector.broadcast %cst_325 : f32 to vector<1x192xf32>
    %553 = arith.addf %552, %551 : vector<1x192xf32>
    %554 = arith.divf %552, %553 : vector<1x192xf32>
    %555 = vector.extract_strided_slice %548 {offsets = [0, 192], sizes = [1, 64], strides = [1, 1]} : vector<1x256xf32> to vector<1x64xf32>
    %556 = math.tanh %555 : vector<1x64xf32>
    %557 = vector.extract_strided_slice %554 {offsets = [0, 64], sizes = [1, 64], strides = [1, 1]} : vector<1x192xf32> to vector<1x64xf32>
    %558 = arith.mulf %557, %539 : vector<1x64xf32>
    %559 = vector.extract_strided_slice %554 {offsets = [0, 0], sizes = [1, 64], strides = [1, 1]} : vector<1x192xf32> to vector<1x64xf32>
    %560 = arith.mulf %559, %556 : vector<1x64xf32>
    %561 = arith.addf %558, %560 : vector<1x64xf32>
    %562 = vector.extract_strided_slice %554 {offsets = [0, 128], sizes = [1, 64], strides = [1, 1]} : vector<1x192xf32> to vector<1x64xf32>
    %563 = math.tanh %561 : vector<1x64xf32>
    %564 = arith.mulf %562, %563 : vector<1x64xf32>
    %c2_326 = arith.constant 2 : index
    %c0_327 = arith.constant 0 : index
    %565 = vector.load %arg22[%c2_326, %c0_327] : memref<8x64xf32, #tpu.memory_space<vmem>>, vector<1x64xf32>
    tpu.vector_store %arg22[%c2_326, %c0_327], %564 {strides = array<i32>} : memref<8x64xf32, #tpu.memory_space<vmem>>, vector<1x64xf32>,
    %c3_328 = arith.constant 3 : index
    %c0_329 = arith.constant 0 : index
    %566 = vector.load %arg21[%c3_328, %c0_329] : memref<8x512xf32, #tpu.memory_space<vmem>>, vector<1x256xf32>
    %c4_330 = arith.constant 4 : index
    %c256_331 = arith.constant 256 : index
    %567 = vector.load %arg21[%c4_330, %c256_331] : memref<8x512xf32, #tpu.memory_space<vmem>>, vector<1x256xf32>
    %568 = arith.addf %566, %567 : vector<1x256xf32>
    %cst_332 = arith.constant dense<0.000000e+00> : vector<1x256xf32>
    %569 = tpu.matmul %564, %497, %cst_332 {dimension_numbers = #tpu.dot_dimension_numbers<[1], [0], [0], [1], [0, 0, 1, 1], [], []>} : vector<1x64xf32>, vector<64x256xf32>, vector<1x256xf32> -> vector<1x256xf32>
    %570 = arith.addf %568, %569 : vector<1x256xf32>
    %571 = vector.extract_strided_slice %570 {offsets = [0, 0], sizes = [1, 192], strides = [1, 1]} : vector<1x256xf32> to vector<1x192xf32>
    %572 = arith.negf %571 : vector<1x192xf32>
    %573 = math.exp %572 : vector<1x192xf32>
    %cst_333 = arith.constant 1.000000e+00 : f32
    %574 = vector.broadcast %cst_333 : f32 to vector<1x192xf32>
    %575 = arith.addf %574, %573 : vector<1x192xf32>
    %576 = arith.divf %574, %575 : vector<1x192xf32>
    %577 = vector.extract_strided_slice %570 {offsets = [0, 192], sizes = [1, 64], strides = [1, 1]} : vector<1x256xf32> to vector<1x64xf32>
    %578 = math.tanh %577 : vector<1x64xf32>
    %579 = vector.extract_strided_slice %576 {offsets = [0, 64], sizes = [1, 64], strides = [1, 1]} : vector<1x192xf32> to vector<1x64xf32>
    %580 = arith.mulf %579, %561 : vector<1x64xf32>
    %581 = vector.extract_strided_slice %576 {offsets = [0, 0], sizes = [1, 64], strides = [1, 1]} : vector<1x192xf32> to vector<1x64xf32>
    %582 = arith.mulf %581, %578 : vector<1x64xf32>
    %583 = arith.addf %580, %582 : vector<1x64xf32>
    %584 = vector.extract_strided_slice %576 {offsets = [0, 128], sizes = [1, 64], strides = [1, 1]} : vector<1x192xf32> to vector<1x64xf32>
    %585 = math.tanh %583 : vector<1x64xf32>
    %586 = arith.mulf %584, %585 : vector<1x64xf32>
    %c3_334 = arith.constant 3 : index
    %c0_335 = arith.constant 0 : index
    %587 = vector.load %arg22[%c3_334, %c0_335] : memref<8x64xf32, #tpu.memory_space<vmem>>, vector<1x64xf32>
    tpu.vector_store %arg22[%c3_334, %c0_335], %586 {strides = array<i32>} : memref<8x64xf32, #tpu.memory_space<vmem>>, vector<1x64xf32>,
    %c4_336 = arith.constant 4 : index
    %c0_337 = arith.constant 0 : index
    %588 = vector.load %arg21[%c4_336, %c0_337] : memref<8x512xf32, #tpu.memory_space<vmem>>, vector<1x256xf32>
    %c3_338 = arith.constant 3 : index
    %c256_339 = arith.constant 256 : index
    %589 = vector.load %arg21[%c3_338, %c256_339] : memref<8x512xf32, #tpu.memory_space<vmem>>, vector<1x256xf32>
    %590 = arith.addf %588, %589 : vector<1x256xf32>
    %cst_340 = arith.constant dense<0.000000e+00> : vector<1x256xf32>
    %591 = tpu.matmul %586, %497, %cst_340 {dimension_numbers = #tpu.dot_dimension_numbers<[1], [0], [0], [1], [0, 0, 1, 1], [], []>} : vector<1x64xf32>, vector<64x256xf32>, vector<1x256xf32> -> vector<1x256xf32>
    %592 = arith.addf %590, %591 : vector<1x256xf32>
    %593 = vector.extract_strided_slice %592 {offsets = [0, 0], sizes = [1, 192], strides = [1, 1]} : vector<1x256xf32> to vector<1x192xf32>
    %594 = arith.negf %593 : vector<1x192xf32>
    %595 = math.exp %594 : vector<1x192xf32>
    %cst_341 = arith.constant 1.000000e+00 : f32
    %596 = vector.broadcast %cst_341 : f32 to vector<1x192xf32>
    %597 = arith.addf %596, %595 : vector<1x192xf32>
    %598 = arith.divf %596, %597 : vector<1x192xf32>
    %599 = vector.extract_strided_slice %592 {offsets = [0, 192], sizes = [1, 64], strides = [1, 1]} : vector<1x256xf32> to vector<1x64xf32>
    %600 = math.tanh %599 : vector<1x64xf32>
    %601 = vector.extract_strided_slice %598 {offsets = [0, 64], sizes = [1, 64], strides = [1, 1]} : vector<1x192xf32> to vector<1x64xf32>
    %602 = arith.mulf %601, %583 : vector<1x64xf32>
    %603 = vector.extract_strided_slice %598 {offsets = [0, 0], sizes = [1, 64], strides = [1, 1]} : vector<1x192xf32> to vector<1x64xf32>
    %604 = arith.mulf %603, %600 : vector<1x64xf32>
    %605 = arith.addf %602, %604 : vector<1x64xf32>
    %606 = vector.extract_strided_slice %598 {offsets = [0, 128], sizes = [1, 64], strides = [1, 1]} : vector<1x192xf32> to vector<1x64xf32>
    %607 = math.tanh %605 : vector<1x64xf32>
    %608 = arith.mulf %606, %607 : vector<1x64xf32>
    %c4_342 = arith.constant 4 : index
    %c0_343 = arith.constant 0 : index
    %609 = vector.load %arg22[%c4_342, %c0_343] : memref<8x64xf32, #tpu.memory_space<vmem>>, vector<1x64xf32>
    tpu.vector_store %arg22[%c4_342, %c0_343], %608 {strides = array<i32>} : memref<8x64xf32, #tpu.memory_space<vmem>>, vector<1x64xf32>,
    %c5_344 = arith.constant 5 : index
    %c0_345 = arith.constant 0 : index
    %610 = vector.load %arg21[%c5_344, %c0_345] : memref<8x512xf32, #tpu.memory_space<vmem>>, vector<1x256xf32>
    %c2_346 = arith.constant 2 : index
    %c256_347 = arith.constant 256 : index
    %611 = vector.load %arg21[%c2_346, %c256_347] : memref<8x512xf32, #tpu.memory_space<vmem>>, vector<1x256xf32>
    %612 = arith.addf %610, %611 : vector<1x256xf32>
    %cst_348 = arith.constant dense<0.000000e+00> : vector<1x256xf32>
    %613 = tpu.matmul %608, %497, %cst_348 {dimension_numbers = #tpu.dot_dimension_numbers<[1], [0], [0], [1], [0, 0, 1, 1], [], []>} : vector<1x64xf32>, vector<64x256xf32>, vector<1x256xf32> -> vector<1x256xf32>
    %614 = arith.addf %612, %613 : vector<1x256xf32>
    %615 = vector.extract_strided_slice %614 {offsets = [0, 0], sizes = [1, 192], strides = [1, 1]} : vector<1x256xf32> to vector<1x192xf32>
    %616 = arith.negf %615 : vector<1x192xf32>
    %617 = math.exp %616 : vector<1x192xf32>
    %cst_349 = arith.constant 1.000000e+00 : f32
    %618 = vector.broadcast %cst_349 : f32 to vector<1x192xf32>
    %619 = arith.addf %618, %617 : vector<1x192xf32>
    %620 = arith.divf %618, %619 : vector<1x192xf32>
    %621 = vector.extract_strided_slice %614 {offsets = [0, 192], sizes = [1, 64], strides = [1, 1]} : vector<1x256xf32> to vector<1x64xf32>
    %622 = math.tanh %621 : vector<1x64xf32>
    %623 = vector.extract_strided_slice %620 {offsets = [0, 64], sizes = [1, 64], strides = [1, 1]} : vector<1x192xf32> to vector<1x64xf32>
    %624 = arith.mulf %623, %605 : vector<1x64xf32>
    %625 = vector.extract_strided_slice %620 {offsets = [0, 0], sizes = [1, 64], strides = [1, 1]} : vector<1x192xf32> to vector<1x64xf32>
    %626 = arith.mulf %625, %622 : vector<1x64xf32>
    %627 = arith.addf %624, %626 : vector<1x64xf32>
    %628 = vector.extract_strided_slice %620 {offsets = [0, 128], sizes = [1, 64], strides = [1, 1]} : vector<1x192xf32> to vector<1x64xf32>
    %629 = math.tanh %627 : vector<1x64xf32>
    %630 = arith.mulf %628, %629 : vector<1x64xf32>
    %c5_350 = arith.constant 5 : index
    %c0_351 = arith.constant 0 : index
    %631 = vector.load %arg22[%c5_350, %c0_351] : memref<8x64xf32, #tpu.memory_space<vmem>>, vector<1x64xf32>
    tpu.vector_store %arg22[%c5_350, %c0_351], %630 {strides = array<i32>} : memref<8x64xf32, #tpu.memory_space<vmem>>, vector<1x64xf32>,
    %c6_352 = arith.constant 6 : index
    %c0_353 = arith.constant 0 : index
    %632 = vector.load %arg21[%c6_352, %c0_353] : memref<8x512xf32, #tpu.memory_space<vmem>>, vector<1x256xf32>
    %c1_354 = arith.constant 1 : index
    %c256_355 = arith.constant 256 : index
    %633 = vector.load %arg21[%c1_354, %c256_355] : memref<8x512xf32, #tpu.memory_space<vmem>>, vector<1x256xf32>
    %634 = arith.addf %632, %633 : vector<1x256xf32>
    %cst_356 = arith.constant dense<0.000000e+00> : vector<1x256xf32>
    %635 = tpu.matmul %630, %497, %cst_356 {dimension_numbers = #tpu.dot_dimension_numbers<[1], [0], [0], [1], [0, 0, 1, 1], [], []>} : vector<1x64xf32>, vector<64x256xf32>, vector<1x256xf32> -> vector<1x256xf32>
    %636 = arith.addf %634, %635 : vector<1x256xf32>
    %637 = vector.extract_strided_slice %636 {offsets = [0, 0], sizes = [1, 192], strides = [1, 1]} : vector<1x256xf32> to vector<1x192xf32>
    %638 = arith.negf %637 : vector<1x192xf32>
    %639 = math.exp %638 : vector<1x192xf32>
    %cst_357 = arith.constant 1.000000e+00 : f32
    %640 = vector.broadcast %cst_357 : f32 to vector<1x192xf32>
    %641 = arith.addf %640, %639 : vector<1x192xf32>
    %642 = arith.divf %640, %641 : vector<1x192xf32>
    %643 = vector.extract_strided_slice %636 {offsets = [0, 192], sizes = [1, 64], strides = [1, 1]} : vector<1x256xf32> to vector<1x64xf32>
    %644 = math.tanh %643 : vector<1x64xf32>
    %645 = vector.extract_strided_slice %642 {offsets = [0, 64], sizes = [1, 64], strides = [1, 1]} : vector<1x192xf32> to vector<1x64xf32>
    %646 = arith.mulf %645, %627 : vector<1x64xf32>
    %647 = vector.extract_strided_slice %642 {offsets = [0, 0], sizes = [1, 64], strides = [1, 1]} : vector<1x192xf32> to vector<1x64xf32>
    %648 = arith.mulf %647, %644 : vector<1x64xf32>
    %649 = arith.addf %646, %648 : vector<1x64xf32>
    %650 = vector.extract_strided_slice %642 {offsets = [0, 128], sizes = [1, 64], strides = [1, 1]} : vector<1x192xf32> to vector<1x64xf32>
    %651 = math.tanh %649 : vector<1x64xf32>
    %652 = arith.mulf %650, %651 : vector<1x64xf32>
    %c6_358 = arith.constant 6 : index
    %c0_359 = arith.constant 0 : index
    %653 = vector.load %arg22[%c6_358, %c0_359] : memref<8x64xf32, #tpu.memory_space<vmem>>, vector<1x64xf32>
    tpu.vector_store %arg22[%c6_358, %c0_359], %652 {strides = array<i32>} : memref<8x64xf32, #tpu.memory_space<vmem>>, vector<1x64xf32>,
    %c7_360 = arith.constant 7 : index
    %c0_361 = arith.constant 0 : index
    %654 = vector.load %arg21[%c7_360, %c0_361] : memref<8x512xf32, #tpu.memory_space<vmem>>, vector<1x256xf32>
    %c0_362 = arith.constant 0 : index
    %c256_363 = arith.constant 256 : index
    %655 = vector.load %arg21[%c0_362, %c256_363] : memref<8x512xf32, #tpu.memory_space<vmem>>, vector<1x256xf32>
    %656 = arith.addf %654, %655 : vector<1x256xf32>
    %cst_364 = arith.constant dense<0.000000e+00> : vector<1x256xf32>
    %657 = tpu.matmul %652, %497, %cst_364 {dimension_numbers = #tpu.dot_dimension_numbers<[1], [0], [0], [1], [0, 0, 1, 1], [], []>} : vector<1x64xf32>, vector<64x256xf32>, vector<1x256xf32> -> vector<1x256xf32>
    %658 = arith.addf %656, %657 : vector<1x256xf32>
    %659 = vector.extract_strided_slice %658 {offsets = [0, 0], sizes = [1, 192], strides = [1, 1]} : vector<1x256xf32> to vector<1x192xf32>
    %660 = arith.negf %659 : vector<1x192xf32>
    %661 = math.exp %660 : vector<1x192xf32>
    %cst_365 = arith.constant 1.000000e+00 : f32
    %662 = vector.broadcast %cst_365 : f32 to vector<1x192xf32>
    %663 = arith.addf %662, %661 : vector<1x192xf32>
    %664 = arith.divf %662, %663 : vector<1x192xf32>
    %665 = vector.extract_strided_slice %658 {offsets = [0, 192], sizes = [1, 64], strides = [1, 1]} : vector<1x256xf32> to vector<1x64xf32>
    %666 = math.tanh %665 : vector<1x64xf32>
    %667 = vector.extract_strided_slice %664 {offsets = [0, 64], sizes = [1, 64], strides = [1, 1]} : vector<1x192xf32> to vector<1x64xf32>
    %668 = arith.mulf %667, %649 : vector<1x64xf32>
    %669 = vector.extract_strided_slice %664 {offsets = [0, 0], sizes = [1, 64], strides = [1, 1]} : vector<1x192xf32> to vector<1x64xf32>
    %670 = arith.mulf %669, %666 : vector<1x64xf32>
    %671 = arith.addf %668, %670 : vector<1x64xf32>
    %672 = vector.extract_strided_slice %664 {offsets = [0, 128], sizes = [1, 64], strides = [1, 1]} : vector<1x192xf32> to vector<1x64xf32>
    %673 = math.tanh %671 : vector<1x64xf32>
    %674 = arith.mulf %672, %673 : vector<1x64xf32>
    %c7_366 = arith.constant 7 : index
    %c0_367 = arith.constant 0 : index
    %675 = vector.load %arg22[%c7_366, %c0_367] : memref<8x64xf32, #tpu.memory_space<vmem>>, vector<1x64xf32>
    tpu.vector_store %arg22[%c7_366, %c0_367], %674 {strides = array<i32>} : memref<8x64xf32, #tpu.memory_space<vmem>>, vector<1x64xf32>,
    %c0_368 = arith.constant 0 : index
    %c0_369 = arith.constant 0 : index
    %676 = vector.load %arg22[%c0_368, %c0_369] : memref<8x64xf32, #tpu.memory_space<vmem>>, vector<8x32xf32>
    %c0_370 = arith.constant 0 : index
    %c0_371 = arith.constant 0 : index
    %677 = vector.load %arg20[%c0_370, %c0_371] : memref<8x64xf32, #tpu.memory_space<vmem>>, vector<8x32xf32>
    tpu.vector_store %arg20[%c0_370, %c0_371], %676 {strides = array<i32>} : memref<8x64xf32, #tpu.memory_space<vmem>>, vector<8x32xf32>,
    %c0_372 = arith.constant 0 : index
    %c32_373 = arith.constant 32 : index
    %678 = vector.load %arg22[%c0_372, %c32_373] : memref<8x64xf32, #tpu.memory_space<vmem>>, vector<1x32xf32>
    %c7_374 = arith.constant 7 : index
    %c32_375 = arith.constant 32 : index
    %679 = vector.load %arg20[%c7_374, %c32_375] : memref<8x64xf32, #tpu.memory_space<vmem>>, vector<1x32xf32>
    tpu.vector_store %arg20[%c7_374, %c32_375], %678 {strides = array<i32>} : memref<8x64xf32, #tpu.memory_space<vmem>>, vector<1x32xf32>,
    %c1_376 = arith.constant 1 : index
    %c32_377 = arith.constant 32 : index
    %680 = vector.load %arg22[%c1_376, %c32_377] : memref<8x64xf32, #tpu.memory_space<vmem>>, vector<1x32xf32>
    %c6_378 = arith.constant 6 : index
    %c32_379 = arith.constant 32 : index
    %681 = vector.load %arg20[%c6_378, %c32_379] : memref<8x64xf32, #tpu.memory_space<vmem>>, vector<1x32xf32>
    tpu.vector_store %arg20[%c6_378, %c32_379], %680 {strides = array<i32>} : memref<8x64xf32, #tpu.memory_space<vmem>>, vector<1x32xf32>,
    %c2_380 = arith.constant 2 : index
    %c32_381 = arith.constant 32 : index
    %682 = vector.load %arg22[%c2_380, %c32_381] : memref<8x64xf32, #tpu.memory_space<vmem>>, vector<1x32xf32>
    %c5_382 = arith.constant 5 : index
    %c32_383 = arith.constant 32 : index
    %683 = vector.load %arg20[%c5_382, %c32_383] : memref<8x64xf32, #tpu.memory_space<vmem>>, vector<1x32xf32>
    tpu.vector_store %arg20[%c5_382, %c32_383], %682 {strides = array<i32>} : memref<8x64xf32, #tpu.memory_space<vmem>>, vector<1x32xf32>,
    %c3_384 = arith.constant 3 : index
    %c32_385 = arith.constant 32 : index
    %684 = vector.load %arg22[%c3_384, %c32_385] : memref<8x64xf32, #tpu.memory_space<vmem>>, vector<1x32xf32>
    %c4_386 = arith.constant 4 : index
    %c32_387 = arith.constant 32 : index
    %685 = vector.load %arg20[%c4_386, %c32_387] : memref<8x64xf32, #tpu.memory_space<vmem>>, vector<1x32xf32>
    tpu.vector_store %arg20[%c4_386, %c32_387], %684 {strides = array<i32>} : memref<8x64xf32, #tpu.memory_space<vmem>>, vector<1x32xf32>,
    %c4_388 = arith.constant 4 : index
    %c32_389 = arith.constant 32 : index
    %686 = vector.load %arg22[%c4_388, %c32_389] : memref<8x64xf32, #tpu.memory_space<vmem>>, vector<1x32xf32>
    %c3_390 = arith.constant 3 : index
    %c32_391 = arith.constant 32 : index
    %687 = vector.load %arg20[%c3_390, %c32_391] : memref<8x64xf32, #tpu.memory_space<vmem>>, vector<1x32xf32>
    tpu.vector_store %arg20[%c3_390, %c32_391], %686 {strides = array<i32>} : memref<8x64xf32, #tpu.memory_space<vmem>>, vector<1x32xf32>,
    %c5_392 = arith.constant 5 : index
    %c32_393 = arith.constant 32 : index
    %688 = vector.load %arg22[%c5_392, %c32_393] : memref<8x64xf32, #tpu.memory_space<vmem>>, vector<1x32xf32>
    %c2_394 = arith.constant 2 : index
    %c32_395 = arith.constant 32 : index
    %689 = vector.load %arg20[%c2_394, %c32_395] : memref<8x64xf32, #tpu.memory_space<vmem>>, vector<1x32xf32>
    tpu.vector_store %arg20[%c2_394, %c32_395], %688 {strides = array<i32>} : memref<8x64xf32, #tpu.memory_space<vmem>>, vector<1x32xf32>,
    %c6_396 = arith.constant 6 : index
    %c32_397 = arith.constant 32 : index
    %690 = vector.load %arg22[%c6_396, %c32_397] : memref<8x64xf32, #tpu.memory_space<vmem>>, vector<1x32xf32>
    %c1_398 = arith.constant 1 : index
    %c32_399 = arith.constant 32 : index
    %691 = vector.load %arg20[%c1_398, %c32_399] : memref<8x64xf32, #tpu.memory_space<vmem>>, vector<1x32xf32>
    tpu.vector_store %arg20[%c1_398, %c32_399], %690 {strides = array<i32>} : memref<8x64xf32, #tpu.memory_space<vmem>>, vector<1x32xf32>,
    %c7_400 = arith.constant 7 : index
    %c32_401 = arith.constant 32 : index
    %692 = vector.load %arg22[%c7_400, %c32_401] : memref<8x64xf32, #tpu.memory_space<vmem>>, vector<1x32xf32>
    %c0_402 = arith.constant 0 : index
    %c32_403 = arith.constant 32 : index
    %693 = vector.load %arg20[%c0_402, %c32_403] : memref<8x64xf32, #tpu.memory_space<vmem>>, vector<1x32xf32>
    tpu.vector_store %arg20[%c0_402, %c32_403], %692 {strides = array<i32>} : memref<8x64xf32, #tpu.memory_space<vmem>>, vector<1x32xf32>,
    %c7_404 = arith.constant 7 : index
    %c0_405 = arith.constant 0 : index
    %694 = vector.load %arg20[%c7_404, %c0_405] : memref<8x64xf32, #tpu.memory_space<vmem>>, vector<1x64xf32>
    %c0_406 = arith.constant 0 : index
    %c0_407 = arith.constant 0 : index
    %c0_408 = arith.constant 0 : index
    %695 = vector.load %arg16[%c0_406, %c0_407, %c0_408] : memref<1x1x64xf32, #tpu.memory_space<vmem>>, vector<1x1x64xf32>
    %696 = vector.shape_cast %695 : vector<1x1x64xf32> to vector<1x64xf32>
    %697 = vector.shape_cast %694 : vector<1x64xf32> to vector<1x1x64xf32>
    tpu.vector_store %arg16[%c0_406, %c0_407, %c0_408], %697 {strides = array<i32>} : memref<1x1x64xf32, #tpu.memory_space<vmem>>, vector<1x1x64xf32>,
    %c0_409 = arith.constant 0 : index
    %c0_410 = arith.constant 0 : index
    %698 = vector.load %arg13[%c0_409, %c0_410] : memref<64x9xf32, #tpu.memory_space<vmem>>, vector<64x9xf32>
    %cst_411 = arith.constant dense<0.000000e+00> : vector<1x9xf32>
    %699 = tpu.matmul %694, %698, %cst_411 {dimension_numbers = #tpu.dot_dimension_numbers<[1], [0], [0], [1], [0, 0, 1, 1], [], []>} : vector<1x64xf32>, vector<64x9xf32>, vector<1x9xf32> -> vector<1x9xf32>
    %c0_412 = arith.constant 0 : index
    %c0_413 = arith.constant 0 : index
    %700 = vector.load %arg14[%c0_412, %c0_413] : memref<1x9xf32, #tpu.memory_space<vmem>>, vector<1x9xf32>
    %701 = arith.addf %699, %700 : vector<1x9xf32>
    %c0_414 = arith.constant 0 : index
    %c0_415 = arith.constant 0 : index
    %c0_416 = arith.constant 0 : index
    %702 = vector.load %arg17[%c0_414, %c0_415, %c0_416] : memref<1x1x9xf32, #tpu.memory_space<vmem>>, vector<1x1x9xf32>
    %703 = vector.shape_cast %702 : vector<1x1x9xf32> to vector<1x9xf32>
    %704 = vector.shape_cast %701 : vector<1x9xf32> to vector<1x1x9xf32>
    tpu.vector_store %arg17[%c0_414, %c0_415, %c0_416], %704 {strides = array<i32>} : memref<1x1x9xf32, #tpu.memory_space<vmem>>, vector<1x1x9xf32>,
    return
  }
  func.func @transform_0(%arg0: i32) -> (i32, i32, i32) {
    %c0_i32 = arith.constant 0 : i32
    %c0_i32_0 = arith.constant 0 : i32
    %c0_i32_1 = arith.constant 0 : i32
    return %arg0, %c0_i32, %c0_i32_0 : i32, i32, i32
  }
  func.func @transform_1(%arg0: i32) -> (i32, i32, i32) {
    %c0_i32 = arith.constant 0 : i32
    %c0_i32_0 = arith.constant 0 : i32
    %c0_i32_1 = arith.constant 0 : i32
    return %arg0, %c0_i32, %c0_i32_0 : i32, i32, i32
  }
  func.func @transform_2(%arg0: i32) -> (i32, i32) {
    %c0_i32 = arith.constant 0 : i32
    %c0_i32_0 = arith.constant 0 : i32
    %c0_i32_1 = arith.constant 0 : i32
    return %c0_i32, %c0_i32_0 : i32, i32
  }
  func.func @transform_3(%arg0: i32) -> (i32, i32) {
    %c0_i32 = arith.constant 0 : i32
    %c0_i32_0 = arith.constant 0 : i32
    %c0_i32_1 = arith.constant 0 : i32
    return %c0_i32, %c0_i32_0 : i32, i32
  }
  func.func @transform_4(%arg0: i32) -> (i32, i32) {
    %c0_i32 = arith.constant 0 : i32
    %c0_i32_0 = arith.constant 0 : i32
    %c0_i32_1 = arith.constant 0 : i32
    return %c0_i32, %c0_i32_0 : i32, i32
  }
  func.func @transform_5(%arg0: i32) -> (i32, i32) {
    %c0_i32 = arith.constant 0 : i32
    %c0_i32_0 = arith.constant 0 : i32
    %c0_i32_1 = arith.constant 0 : i32
    return %c0_i32, %c0_i32_0 : i32, i32
  }
  func.func @transform_6(%arg0: i32) -> (i32, i32, i32) {
    %c0_i32 = arith.constant 0 : i32
    %c0_i32_0 = arith.constant 0 : i32
    %c0_i32_1 = arith.constant 0 : i32
    %c0_i32_2 = arith.constant 0 : i32
    return %c0_i32, %c0_i32_0, %c0_i32_1 : i32, i32, i32
  }
  func.func @transform_7(%arg0: i32) -> (i32, i32) {
    %c0_i32 = arith.constant 0 : i32
    %c0_i32_0 = arith.constant 0 : i32
    %c0_i32_1 = arith.constant 0 : i32
    return %c0_i32, %c0_i32_0 : i32, i32
  }
  func.func @transform_8(%arg0: i32) -> (i32, i32) {
    %c0_i32 = arith.constant 0 : i32
    %c0_i32_0 = arith.constant 0 : i32
    %c0_i32_1 = arith.constant 0 : i32
    return %c0_i32, %c0_i32_0 : i32, i32
  }
  func.func @transform_9(%arg0: i32) -> (i32, i32, i32) {
    %c0_i32 = arith.constant 0 : i32
    %c0_i32_0 = arith.constant 0 : i32
    %c0_i32_1 = arith.constant 0 : i32
    %c0_i32_2 = arith.constant 0 : i32
    return %c0_i32, %c0_i32_0, %c0_i32_1 : i32, i32, i32
  }
  func.func @transform_10(%arg0: i32) -> (i32, i32, i32) {
    %c0_i32 = arith.constant 0 : i32
    %c0_i32_0 = arith.constant 0 : i32
    %c0_i32_1 = arith.constant 0 : i32
    %c0_i32_2 = arith.constant 0 : i32
    return %c0_i32, %c0_i32_0, %c0_i32_1 : i32, i32, i32
  }
  func.func @transform_11(%arg0: i32) -> (i32, i32, i32) {
    %c0_i32 = arith.constant 0 : i32
    %c0_i32_0 = arith.constant 0 : i32
    %c0_i32_1 = arith.constant 0 : i32
    %c0_i32_2 = arith.constant 0 : i32
    return %c0_i32, %c0_i32_0, %c0_i32_1 : i32, i32, i32
  }
  func.func @transform_12(%arg0: i32) -> (i32, i32) {
    %c0_i32 = arith.constant 0 : i32
    %c0_i32_0 = arith.constant 0 : i32
    %c0_i32_1 = arith.constant 0 : i32
    return %c0_i32, %c0_i32_0 : i32, i32
  }
  func.func @transform_13(%arg0: i32) -> (i32, i32) {
    %c0_i32 = arith.constant 0 : i32
    %c0_i32_0 = arith.constant 0 : i32
    %c0_i32_1 = arith.constant 0 : i32
    return %c0_i32, %c0_i32_0 : i32, i32
  }
  func.func @transform_14(%arg0: i32) -> (i32, i32, i32) {
    %c0_i32 = arith.constant 0 : i32
    %c0_i32_0 = arith.constant 0 : i32
    %c0_i32_1 = arith.constant 0 : i32
    return %arg0, %c0_i32, %c0_i32_0 : i32, i32, i32
  }
  func.func @transform_15(%arg0: i32) -> (i32, i32, i32) {
    %c0_i32 = arith.constant 0 : i32
    %c0_i32_0 = arith.constant 0 : i32
    %c0_i32_1 = arith.constant 0 : i32
    return %arg0, %c0_i32, %c0_i32_0 : i32, i32, i32
  }
  func.func @transform_16(%arg0: i32) -> (i32, i32, i32) {
    %c0_i32 = arith.constant 0 : i32
    %c0_i32_0 = arith.constant 0 : i32
    %c0_i32_1 = arith.constant 0 : i32
    return %arg0, %c0_i32, %c0_i32_0 : i32, i32, i32
  }
}

</mosaic_0001>

<bundles_post_ra>
// kernel: conv1dlstm_forward.1
= control target key start
LH: loop header
LB: loop body
LE: loop exit
PB: predicated region body
PF: predicated region fallthrough
CT: control target
= control target key end

     0   :  { %s8321_s0 = inlined_call_operand.vmem [shape: bf16[2,9,512], index: 0, kind: input, shape index: {}]   ;;  %s8322_s1 = inlined_call_operand.vmem [shape: bf16[2,8,512], index: 1, kind: input, shape index: {}]   ;;  %s8323_s2 = inlined_call_operand.vmem [shape: bf16[512,64], index: 2, kind: input, shape index: {}]   ;;  %s8324_s3 = inlined_call_operand.vmem [shape: bf16[512,64], index: 3, kind: input, shape index: {}]   ;;  %s8325_s4 = inlined_call_operand.vmem [shape: f32[1,32], index: 4, kind: input, shape index: {}]   ;;  %s8326_s5 = inlined_call_operand.vmem [shape: f32[1,32], index: 5, kind: input, shape index: {}]   ;;  %s8327_s6 = inlined_call_operand.vmem [shape: f32[3,32,64], index: 6, kind: input, shape index: {}]   ;;  %s8328_s7 = inlined_call_operand.vmem [shape: f32[1,64], index: 7, kind: input, shape index: {}]   ;;  %s8329_s8 = inlined_call_operand.vmem [shape: f32[1,64], index: 8, kind: input, shape index: {}]   ;;  %s8330_s9 = inlined_call_operand.vmem [shape: bf16[3,64,512], index: 9, kind: input, shape index: {}]   ;;  %s8331_s10 = inlined_call_operand.vmem [shape: f32[3,1,512], index: 10, kind: input, shape index: {}]   ;;  %s8332_s11 = inlined_call_operand.vmem [shape: f32[3,64,256], index: 11, kind: input, shape index: {}]   ;;  %s8333_s12 = inlined_call_operand.vmem [shape: f32[64,9], index: 12, kind: input, shape index: {}]   ;;  %s8334_s13 = inlined_call_operand.vmem [shape: f32[1,9], index: 13, kind: input, shape index: {}]   ;;  %s8335_s14 = inlined_call_operand.hbm [shape: f32[2,8,64], index: 14, kind: output, shape index: {0}]   ;;  %s8336_s15 = inlined_call_operand.hbm [shape: f32[2,1,64], index: 15, kind: output, shape index: {1}]   ;;  %s8337_s16 = inlined_call_operand.hbm [shape: f32[2,1,9], index: 16, kind: output, shape index: {2}]  }
   0x1   :  { %8348 = sst [smem:[#allocation20_spill]] %s8321_s0 }
   0x2   :  { %8349 = sst [smem:[#allocation21_spill]] %s8322_s1 }
   0x3   :  { %8350 = sst [smem:[#allocation22_spill]] %s8323_s2 }
   0x4   :  { %8351 = sst [smem:[#allocation23_spill]] %s8324_s3 }
   0x5   :  { %8352 = sst [smem:[#allocation24_spill]] %s8334_s13 }
   0x6   :  { %8353 = sst [smem:[#allocation25_spill]] %s8337_s16 }
   0x7   :  { %22 = vsyncpa [#allocation8], 0 }
   0x8   :  { %24 = vsyncpa [#allocation8 + $0x1], 0 }
   0x9   :  { %25 = vsyncpa [#allocation10], 0 }
   0xa   :  { %27 = vsyncpa [#allocation10 + $0x1], 0  ;;  %s7055_s21 = smov 0   ;;  %s7057_s22 = smov 0  }
   0xb   :  { %s7059_s23 = smov 0   ;;  %s7061_s24 = smov 0  }
   0xc LB: > { %8354 = sst [smem:[#allocation14_spill]] %s6945_s21  ;;  %s7076_s25 = sadd.s32 4294967295, %s6957_s24   ;;  %s6957_s24 = sphi %s7061_s24, %s8374_s24   ;;  %s6953_s23 = sphi %s7059_s23, %s8376_s23   ;;  %s6949_s22 = sphi %s7057_s22, %s8378_s22   ;;  %s6945_s21 = sphi %s7055_s21, %s8377_s21  }
   0xd   : > { %8355 = sst [smem:[#allocation15_spill]] %s6953_s23  ;;  %s8338_s26 = sadd.s32 4294967294, %s6957_s24  }
   0xe   : > { %8356 = sst [smem:[#allocation16_spill]] %s6957_s24  ;;  %s7080_s27 = sadd.s32 1, %s6957_s24  }
   0xf   : > { %8357 = sst [smem:[#allocation17_spill]] %s7080_s27  ;;  %s344_s28 = sadd.s32 1, %s6953_s23 }
  0x10   : > { %s341_s29 = ssub.s32 %s6957_s24, %s7080_s27  ;;  %p354_p0 = scmp.ne.s32.totalorder %s6953_s23, %s6949_s22 }
  0x11   : > { %p342_p1 = scmp.eq.s32.totalorder %s341_s29, 0  ;;  %p355_p2 = scmp.eq.s32.totalorder %s7076_s25, 1 }
  0x12   : > { %p360_p3 = scmp.ne.s32.totalorder %s6949_s22, %s6945_s21  ;;  %p361_p4 = scmp.eq.s32.totalorder %s8338_s26, 1 }
  0x13   : > { %s7093_s30 = scalar_select %p342_p1, %s6953_s23, %s344_s28  }
  0x14   : > { %p7095_p5 = por %p355_p2, %p354_p0  ;;  %p7099_p6 = por %p361_p4, %p360_p3 }
  0x15   : > { %8358 = sst [smem:[#allocation18_spill]] %s7093_s30  ;;  %p5591_p7 = scmp.ge.s32.totalorder %s6957_s24, 1 }
  0x16   : > { %s8360_s17 = scalar_select %p7099_p6, 1, 0 }
  0x17   : > { %p483_p8 = scmp.lt.s32.totalorder %s6957_s24, 3 }
  0x18   : > { %8361 = sst [smem:[#allocation19_spill]] %s8360_s17 }
  0x19   : > { %p484_p9 = pnand %p5591_p7, %p483_p8 }
  0x1a   : > { %s8362_s2 = sld [smem:[#allocation22_spill]] (!%p484_p9)  ;;  %p546_p10 = scmp.lt.s32.totalorder (!%p484_p9), %s7076_s25, 1  ;;  %vm1316_vm0 = vcmask (!%p484_p9), 253952   ;;  %vm6962_vm1 = vmmov (!%p484_p9), 0   ;;  %vm1308_vm2 = vcmask (!%p484_p9), 1046528   ;;  %vm1319_vm3 = vcmask (!%p484_p9), 261120  }
  0x1b   : > { %487 = sbr.rel (%p484_p9) target bundleno = 15353 (0x3bf9), region = 76  ;;  %s8363_s29 = sld [smem:[#allocation20_spill]] (!%p484_p9)  ;;  %vm1575_vm4 = vcmask (!%p484_p9), 516096   ;;  %vm1578_vm5 = vcmask (!%p484_p9), 523264   ;;  %vm2828_vm6 = vcmask (!%p484_p9), 516352  }
  0x1c   : > { %s8364_s3 = sld [smem:[#allocation23_spill]] (!%p484_p9)  ;;  %s8365_s1 = sld [smem:[#allocation21_spill]] (!%p484_p9) }
  0x1d   : > { %s6959_s18 = smov (!%p484_p9), 32   ;;  %s6963_s24 = smov (!%p484_p9), 96  }
  0x1e   : > { %s7501_s16 = sand.u32 (!%p484_p9), 1, %s6949_s22  }
  0x20   : > { %v6497_v0 = vld [vmem:[%s8362_s2 + $0x40] sm:$0xff] (!%p484_p9)   ;;  %v6501_v4 = vld [vmem:[%s8362_s2 + $0x48] sm:$0xff] (!%p484_p9)   ;;  %v6505_v8 = vld [vmem:[%s8362_s2 + $0x50] sm:$0xff] (!%p484_p9)  }
  0x21   : > { %v6498_v1 = vld [vmem:[%s8362_s2 + $0xc0] sm:$0xff] (!%p484_p9)   ;;  %5858 = vmatprep.subr.bf16.mxu0 (!%p484_p9), %v6497_v0  ;;  %v6502_v5 = vld [vmem:[%s8362_s2 + $0xc8] sm:$0xff] (!%p484_p9)   ;;  %v6506_v9 = vld [vmem:[%s8362_s2 + $0xd0] sm:$0xff] (!%p484_p9)  }
  0x22   : > { %v6499_v2 = vld [vmem:[%s8362_s2] sm:$0xff]   ;;  %5880 = vmatprep.subr.bf16.mxu1 %v6498_v1  ;;  %v6503_v6 = vld [vmem:[%s8362_s2 + $0x8] sm:$0xff]   ;;  %v6507_v10 = vld [vmem:[%s8362_s2 + $0x10] sm:$0xff]   ;;  %s7176_s23 = scalar_select %p546_p10, %s7076_s25, 1 }
  0x23   : > { %v6500_v3 = vld [vmem:[%s8362_s2 + $0x80] sm:$0xff]   ;;  %5859 = vmatpush3.bf16.msra.mxu0 %v6499_v2  ;;  %v6504_v7 = vld [vmem:[%s8362_s2 + $0x88] sm:$0xff]   ;;  %v6508_v11 = vld [vmem:[%s8362_s2 + $0x90] sm:$0xff]  }
  0x24   : > { %5881 = vmatpush3.bf16.msra.mxu1 %v6500_v3  ;;  %5860 = vmatprep.subr.bf16.mxu0 %v6501_v4  ;;  %v6509_v12 = vld [vmem:[%s8362_s2 + $0x58] sm:$0xff]   ;;  %v6513_v16 = vld [vmem:[%s8362_s2 + $0x60] sm:$0xff]   ;;  %v6517_v20 = vld [vmem:[%s8362_s2 + $0x68] sm:$0xff]   ;;  %s5856_s28 = sshll.u32 %s7176_s23, 5  ;;  %s5857_s13 = sshll.u32 %s7176_s23, 4 }
  0x25   : > { %5882 = vmatprep.subr.bf16.mxu1 %v6502_v5  ;;  %v6510_v13 = vld [vmem:[%s8362_s2 + $0xd8] sm:$0xff]   ;;  %v6514_v17 = vld [vmem:[%s8362_s2 + $0xe0] sm:$0xff]   ;;  %v6518_v21 = vld [vmem:[%s8362_s2 + $0xe8] sm:$0xff]   ;;  %s550_s26 = scalar_lea.vmem %s8363_s29, %s5856_s28  ;;  %s555_s21 = scalar_lea.vmem %s8365_s1, %s5857_s13 }
  0x26   : > { %v6511_v14 = vld [vmem:[%s8362_s2 + $0x18] sm:$0xff]   ;;  %v6515_v18 = vld [vmem:[%s8362_s2 + $0x20] sm:$0xff]   ;;  %v6519_v22 = vld [vmem:[%s8362_s2 + $0x28] sm:$0xff]   ;;  %s5592_s28 = sshll.u32 %s7501_s16, 3  ;;  %s6966_s29 = smov 64  }
  0x27   : > { %5861 = vmatpush3.bf16.msra.mxu0 %v6503_v6  ;;  %v6512_v15 = vld [vmem:[%s8362_s2 + $0x98] sm:$0xff]   ;;  %v6516_v19 = vld [vmem:[%s8362_s2 + $0xa0] sm:$0xff]   ;;  %v6520_v23 = vld [vmem:[%s8362_s2 + $0xa8] sm:$0xff]   ;;  %s7510_s20 = scalar_lea.vmem [#allocation7], %s5592_s28  ;;  %s8347_s28 = sshll.u32 %s7076_s25, 4 }
  0x28   : > { %5883 = vmatpush3.bf16.msra.mxu1 %v6504_v7  ;;  %5862 = vmatprep.subr.bf16.mxu0 %v6505_v8  ;;  %v6521_v24 = vld [vmem:[%s8362_s2 + $0x70] sm:$0xff]   ;;  %v6525_v28 = vld [vmem:[%s8362_s2 + $0x78] sm:$0xff]   ;;  %v6535_v36 = vld [vmem:[%s8364_s3 + $0x40] sm:$0xff]   ;;  %s6967_s23 = smov [#allocation9]  }
  0x29   : > { %5884 = vmatprep.subr.bf16.mxu1 %v6506_v9  ;;  %v6522_v25 = vld [vmem:[%s8362_s2 + $0xf0] sm:$0xff]   ;;  %v6526_v29 = vld [vmem:[%s8362_s2 + $0xf8] sm:$0xff]   ;;  %v6536_v37 = vld [vmem:[%s8364_s3 + $0xc0] sm:$0xff]   ;;  %s6839_s30 = sshll.u32 %s6967_s23, 4  ;;  %s6840_s30 = int_to_ptr.vmem [resolvable:$false] %s6839_s30 }
  0x2a   : > { %v6523_v26 = vld [vmem:[%s8362_s2 + $0x30] sm:$0xff]   ;;  %v6527_v30 = vld [vmem:[%s8362_s2 + $0x38] sm:$0xff]   ;;  %v6537_v38 = vld [vmem:[%s8364_s3] sm:$0xff]   ;;  %s6841_s27 = scalar_lea.vmem %s6840_s30, 32 }
  0x2b   : > { %5863 = vmatpush3.bf16.msra.mxu0 %v6507_v10  ;;  %v6524_v27 = vld [vmem:[%s8362_s2 + $0xb0] sm:$0xff]   ;;  %v6528_v31 = vld [vmem:[%s8362_s2 + $0xb8] sm:$0xff]   ;;  %v6538_v39 = vld [vmem:[%s8364_s3 + $0x80] sm:$0xff]  }
  0x2c   : > { %5885 = vmatpush3.bf16.msra.mxu1 %v6508_v11  ;;  %5864 = vmatprep.subr.bf16.mxu0 %v6509_v12  ;;  %v6529_v32 = vld [vmem:[%s550_s26] ss:$16 sps:$4 sm:$0x1f]   ;;  %v6531_v33 = vld [vmem:[%s550_s26 + $0x4] ss:$16 sps:$4 sm:$0x1f]  }
  0x2d   : > { %5886 = vmatprep.subr.bf16.mxu1 %v6510_v13  ;;  %v6532_v34 = vld [vmem:[%s550_s26 + $0x8] ss:$16 sps:$4 sm:$0x1f]   ;;  %v6534_v35 = vld [vmem:[%s550_s26 + $0xc] ss:$16 sps:$4 sm:$0x1f]   ;;  %869 = vmatprep.mubr.bf16.mxu0 %v6531_v33 }
  0x2e   : > { %910 = vmatprep.mubr.bf16.mxu1 %v6534_v35  ;;  %v6539_v40 = vld [vmem:[%s8364_s3 + $0x48] sm:$0xff]   ;;  %v6543_v44 = vld [vmem:[%s8364_s3 + $0x50] sm:$0xff]   ;;  %v6547_v48 = vld [vmem:[%s8364_s3 + $0x58] sm:$0xff]  }
  0x2f   : > { %5865 = vmatpush3.bf16.msra.mxu0 %v6511_v14  ;;  %v6540_v41 = vld [vmem:[%s8364_s3 + $0xc8] sm:$0xff]   ;;  %v6544_v45 = vld [vmem:[%s8364_s3 + $0xd0] sm:$0xff]   ;;  %v6548_v49 = vld [vmem:[%s8364_s3 + $0xd8] sm:$0xff]  }
  0x30   : > { %5887 = vmatpush3.bf16.msra.mxu1 %v6512_v15  ;;  %5866 = vmatprep.subr.bf16.mxu0 %v6513_v16  ;;  %v6541_v42 = vld [vmem:[%s8364_s3 + $0x8] sm:$0xff]   ;;  %v6545_v46 = vld [vmem:[%s8364_s3 + $0x10] sm:$0xff]   ;;  %v6549_v50 = vld [vmem:[%s8364_s3 + $0x18] sm:$0xff]  }
  0x31   : > { %5888 = vmatprep.subr.bf16.mxu1 %v6514_v17  ;;  %v6542_v43 = vld [vmem:[%s8364_s3 + $0x88] sm:$0xff]   ;;  %v6546_v47 = vld [vmem:[%s8364_s3 + $0x90] sm:$0xff]   ;;  %v6550_v51 = vld [vmem:[%s8364_s3 + $0x98] sm:$0xff]  }
  0x32   : > { %v6551_v52 = vld [vmem:[%s8364_s3 + $0x60] sm:$0xff]   ;;  %v6555_v56 = vld [vmem:[%s8364_s3 + $0x68] sm:$0xff]   ;;  %v6559_v60 = vld [vmem:[%s8364_s3 + $0x70] sm:$0xff]  }
  0x33   : > { %5867 = vmatpush3.bf16.msra.mxu0 %v6515_v18  ;;  %v6552_v53 = vld [vmem:[%s8364_s3 + $0xe0] sm:$0xff]   ;;  %v6556_v57 = vld [vmem:[%s8364_s3 + $0xe8] sm:$0xff]   ;;  %v6560_v61 = vld [vmem:[%s8364_s3 + $0xf0] sm:$0xff]  }
  0x34   : > { %5889 = vmatpush3.bf16.msra.mxu1 %v6516_v19  ;;  %5868 = vmatprep.subr.bf16.mxu0 %v6517_v20  ;;  %v6553_v54 = vld [vmem:[%s8364_s3 + $0x20] sm:$0xff]   ;;  %v6557_v58 = vld [vmem:[%s8364_s3 + $0x28] sm:$0xff]   ;;  %v6561_v62 = vld [vmem:[%s8364_s3 + $0x30] sm:$0xff]  }
  0x35   : > { %5890 = vmatprep.subr.bf16.mxu1 %v6518_v21  ;;  %v6554_v55 = vld [vmem:[%s8364_s3 + $0xa0] sm:$0xff]   ;;  %v6558_v59 = vld [vmem:[%s8364_s3 + $0xa8] sm:$0xff]   ;;  %v6562_v63 = vld [vmem:[%s8364_s3 + $0xb0] sm:$0xff]  }
  0x36   : > { %v6563_v0 = vld [vmem:[%s8364_s3 + $0x78] sm:$0xff]   ;;  %v919_v4 = vld [vmem:[%s555_s21] sm:$0xff]  ;;  %v920_v5 = vld [vmem:[%s555_s21 + $0x8] sm:$0xff] }
  0x37   : > { %5869 = vmatpush3.bf16.msra.mxu0 %v6519_v22  ;;  %v6564_v1 = vld [vmem:[%s8364_s3 + $0xf8] sm:$0xff]   ;;  %v7312_v6 = vld [vmem:[%s8325_s4] ss:$0 sm:$0xff]  ;;  %v5633_v7 = vcombine.low %v919_v4, %v919_v4  ;;  %v5634_v8 = vcombine.high %v919_v4, %v919_v4  ;;  %v5635_v9 = vcombine.low %v920_v5, %v920_v5  ;;  %v5636_v10 = vcombine.high %v920_v5, %v920_v5  ;;  %v1324_v4 = vld [vmem:[%s8327_s6 + $0x10] sm:$0xff] }
  0x38   : > { %5891 = vmatpush3.bf16.msra.mxu1 %v6520_v23  ;;  %5870 = vmatprep.subr.bf16.mxu0 %v6521_v24  ;;  %v6565_v2 = vld [vmem:[%s8364_s3 + $0x38] sm:$0xff]   ;;  %v7317_v11 = vld [vmem:[%s8326_s5] ss:$0 sm:$0xff] }
  0x39   : > { %5892 = vmatprep.subr.bf16.mxu1 %v6522_v25  ;;  %v6566_v3 = vld [vmem:[%s8364_s3 + $0xb8] sm:$0xff]   ;;  %1294 = vrot.lane.b32.xlu0 %v7312_v6, %s6959_s18 }
  0x3a   : > { %v1325_v5 = vld [vmem:[%s8327_s6 + $0x18] sm:$0xff] }
  0x3b   : > { %5871 = vmatpush3.bf16.msra.mxu0 %v6523_v26 }
  0x3c   : > { %5893 = vmatpush3.bf16.msra.mxu1 %v6524_v27  ;;  %5872 = vmatprep.subr.bf16.mxu0 %v6525_v28 }
  0x3d   : > { %5894 = vmatprep.subr.bf16.mxu1 %v6526_v29  ;;  %1299 = vrot.lane.b32.xlu0 %v7317_v11, %s6959_s18  ;;  %s8226_s18 = scalar_lea.hbm %s8336_s15, %s8347_s28 }
  0x3f   : > { %5873 = vmatpush3.bf16.msra.mxu0 %v6527_v30 }
  0x40   : > { %5895 = vmatpush3.bf16.msra.mxu1 %v6528_v31  ;;  %5902 = vmatprep.subr.bf16.mxu0 %v6535_v36 }
  0x41   : > { %5924 = vmatprep.subr.bf16.mxu1 %v6536_v37 }
  0x42   : > { %870 = vmatmul.mubr.bf16.vlgmr.msra.gmra.mrb[0].mxu0 %v6529_v32 }
  0x43   : > { %911 = vmatmul.mubr.bf16.vlgmr.msra.gmra.mrb[0].mxu1 %v6532_v34  ;;  %5903 = vmatpush3.bf16.msra.mxu0 %v6537_v38 }
  0x44   : > { %5925 = vmatpush3.bf16.msra.mxu1 %v6538_v39  ;;  %5904 = vmatprep.subr.bf16.mxu0 %v6539_v40  ;;  %v5671_v40 = vld [vmem:[%s8327_s6 + $0x20] sm:$0xff] }
  0x45   : > { %5926 = vmatprep.subr.bf16.mxu1 %v6540_v41  ;;  %1223 = vmatprep.mubr.bf16.mxu0 %v5634_v8  ;;  %v5672_v41 = vld [vmem:[%s8327_s6 + $0x28] sm:$0xff]  ;;  %v5677_v8 = vld [vmem:[%s8327_s6 + $0x40] sm:$0xff] }
  0x46   : > { %1263 = vmatprep.mubr.bf16.mxu1 %v5636_v10 }
  0x47   : > { %5905 = vmatpush3.bf16.msra.mxu0 %v6541_v42  ;;  %v6023_v42 = vpack.c.bf16 %v5672_v41, %v5671_v40  ;;  %v1802_v41 = vld [vmem:[%s8332_s11 + $0x40] sm:$0xff] }
  0x48   : > { %5927 = vmatpush3.bf16.msra.mxu1 %v6542_v43  ;;  %5906 = vmatprep.subr.bf16.mxu0 %v6543_v44 }
  0x49   : > { %5928 = vmatprep.subr.bf16.mxu1 %v6544_v45  ;;  %v6960_v45 = vmov 0.0|0.0  }
  0x4b   : > { %5907 = vmatpush3.bf16.msra.mxu0 %v6545_v46  ;;  %v5673_v46 = vld [vmem:[%s8327_s6 + $0x30] sm:$0xff] }
  0x4c   : > { %5929 = vmatpush3.bf16.msra.mxu1 %v6546_v47  ;;  %5908 = vmatprep.subr.bf16.mxu0 %v6547_v48  ;;  %v5674_v47 = vld [vmem:[%s8327_s6 + $0x38] sm:$0xff]  ;;  %v6961_v48 = vmov 0.0  }
  0x4d   : > { %5930 = vmatprep.subr.bf16.mxu1 %v6548_v49  ;;  %1317 = vst.msk [vmem:[#allocation2] sm:$0x1] %vm1316_vm0, %v6961_v48  ;;  %1318 = vst.msk [vmem:[#allocation2 + $0x9] sm:$0x1] %vm1316_vm0, %v6961_v48 }
  0x4e   : > { %1576 = vst.msk [vmem:[#allocation3] sm:$0x1] %vm1575_vm4, %v6961_v48  ;;  %1577 = vst.msk [vmem:[#allocation3 + $0x9] sm:$0x1] %vm1575_vm4, %v6961_v48 }
  0x4f   : > { %5909 = vmatpush3.bf16.msra.mxu0 %v6549_v50  ;;  %v6026_v50 = vpack.c.bf16 %v5674_v47, %v5673_v46  ;;  %v1809_v46 = vld [vmem:[%s8332_s11 + $0x78] sm:$0xff] }
  0x50   : > { %5931 = vmatpush3.bf16.msra.mxu1 %v6550_v51  ;;  %5910 = vmatprep.subr.bf16.mxu0 %v6551_v52 }
  0x51   : > { %5932 = vmatprep.subr.bf16.mxu1 %v6552_v53 }
  0x53   : > { %5911 = vmatpush3.bf16.msra.mxu0 %v6553_v54 }
  0x54   : > { %5933 = vmatpush3.bf16.msra.mxu1 %v6554_v55  ;;  %5912 = vmatprep.subr.bf16.mxu0 %v6555_v56 }
  0x55   : > { %5934 = vmatprep.subr.bf16.mxu1 %v6556_v57 }
  0x57   : > { %5913 = vmatpush3.bf16.msra.mxu0 %v6557_v58 }
  0x58   : > { %5935 = vmatpush3.bf16.msra.mxu1 %v6558_v59  ;;  %5914 = vmatprep.subr.bf16.mxu0 %v6559_v60 }
  0x59   : > { %5936 = vmatprep.subr.bf16.mxu1 %v6560_v61 }
  0x5b   : > { %5915 = vmatpush3.bf16.msra.mxu0 %v6561_v62 }
  0x5c   : > { %5937 = vmatpush3.bf16.msra.mxu1 %v6562_v63  ;;  %5916 = vmatprep.subr.bf16.mxu0 %v6563_v0 }
  0x5d   : > { %5938 = vmatprep.subr.bf16.mxu1 %v6564_v1  ;;  %v1322_v1 = vld [vmem:[%s8327_s6] sm:$0xff] }
  0x5f   : > { %5917 = vmatpush3.bf16.msra.mxu0 %v6565_v2  ;;  %v1323_v2 = vld [vmem:[%s8327_s6 + $0x8] sm:$0xff] }
  0x60   : > { %5939 = vmatpush3.bf16.msra.mxu1 %v6566_v3  ;;  %6022 = vmatprep.subr.bf16.mxu0 %v6960_v45  ;;  %v6029_v3 = vpack.c.bf16 %v1323_v2, %v1322_v1  ;;  %v6588_v2 = vld [vmem:[%s8330_s9 + $0x2c] ss:$16 sps:$4 sm:$0xff]  }
  0x62   : > { %1224 = vmatmul.mubr.bf16.vlgmr.msra.gmra.mrb[4].mxu0 %v5633_v7  ;;  %v6032_v7 = vpack.c.bf16 %v1325_v5, %v1324_v4  ;;  %v6591_v4 = vld [vmem:[%s8330_s9 + $0x4c] ss:$16 sps:$4 sm:$0xff]   ;;  %v6589_v5 = vld [vmem:[%s8330_s9 + $0x48] ss:$16 sps:$4 sm:$0xff]  }
  0x63   : > { %1264 = vmatmul.mubr.bf16.vlgmr.msra.gmra.mrb[4].mxu1 %v5635_v9  ;;  %6024 = vmatpush3.bf16.msra.mxu0 %v6023_v42  ;;  %v5678_v9 = vld [vmem:[%s8327_s6 + $0x48] sm:$0xff]  ;;  %v1804_v42 = vld [vmem:[%s8332_s11 + $0x50] sm:$0xff] }
  0x64   : > { %5978 = vmatprep.mubr.msk.f32.mxu0 %vm6962_vm1, %v6961_v48  ;;  %6025 = vmatprep.subr.bf16.mxu0 %v6960_v45  ;;  %v6035_v10 = vpack.c.bf16 %v5678_v9, %v5677_v8 }
  0x67   : > { %6027 = vmatpush3.bf16.msra.mxu0 %v6026_v50  ;;  %v1808_v50 = vld [vmem:[%s8332_s11 + $0x70] sm:$0xff] }
  0x68   : > { %6028 = vmatprep.subr.bf16.mxu0 %v6960_v45 }
  0xab   : > { %v1295_v26 = vpop.permute.xlu0 %1294 }
  0xaf   : > { %v1300_v49 = vpop.permute.xlu0 %1299 }
 0x115   : > { %v5874_v12 = vpop.f32.mrb[0].mxu0 }
 0x116   : > { %v5896_v13 = vpop.f32.mrb[0].mxu1  ;;  %v5875_v14 = vpop.f32.mrb[1].mxu0 }
 0x117   : > { %v5876_v15 = vadd.f32 %v5875_v14, %v5874_v12  ;;  %v5897_v16 = vpop.f32.mrb[1].mxu1  ;;  %v5877_v17 = vpop.f32.mrb[2].mxu0  ;;  %v5680_v12 = vld [vmem:[%s8327_s6 + $0x58] sm:$0xff] }
 0x118   : > { %v5898_v18 = vadd.f32 %v5897_v16, %v5896_v13  ;;  %v5899_v19 = vpop.f32.mrb[2].mxu1  ;;  %v5878_v20 = vpop.f32.mrb[3].mxu0  ;;  %v6573_v16 = vld [vmem:[%s8330_s9 + $0x4] ss:$16 sps:$4 sm:$0xff]  }
 0x119   : > { %v5879_v21 = vadd.f32 %v5878_v20, %v5877_v17  ;;  %v5900_v22 = vpop.f32.mrb[3].mxu1  ;;  %v6571_v17 = vld [vmem:[%s8330_s9] ss:$16 sps:$4 sm:$0xff]   ;;  %1708 = vmatprep.subr.bf16.mxu1 %v6573_v16  ;;  %v6579_v20 = vld [vmem:[%s8330_s9 + $0x44] ss:$16 sps:$4 sm:$0xff]  }
 0x11a   : > { %v913_v23 = vadd.f32 %v5898_v18, %v5876_v15  ;;  %v5901_v24 = vadd.f32 %v5900_v22, %v5899_v19  ;;  %1709 = vmatpush1.bf16.msra.mxu1 %v6571_v17  ;;  %v6576_v18 = vld [vmem:[%s8330_s9 + $0x24] ss:$16 sps:$4 sm:$0xff]   ;;  %v6574_v19 = vld [vmem:[%s8330_s9 + $0x20] ss:$16 sps:$4 sm:$0xff]   ;;  %v6964_v22 = vmov 0  }
 0x11b   : > { %1710 = vmatprep.subr.bf16.mxu1 %v6576_v18  ;;  %1740 = vmatprep.mubr.bf16.mxu1 %v6964_v22 }
 0x11c   : > { %v916_v25 = vadd.f32 %v5901_v24, %v5879_v21  ;;  %v6577_v21 = vld [vmem:[%s8330_s9 + $0x40] ss:$16 sps:$4 sm:$0xff]  }
 0x11d   : > { %v6580_v24 = vld [vmem:[%s8330_s9 + $0x60] ss:$16 sps:$4 sm:$0xff]  }
 0x11e   : > { %1711 = vmatpush1.bf16.msra.mxu1 %v6574_v19 }
 0x11f   : > { %1712 = vmatprep.subr.bf16.mxu1 %v6579_v20 }
 0x122   : > { %1713 = vmatpush1.bf16.msra.mxu1 %v6577_v21 }
 0x135   : > { %v5918_v27 = vpop.f32.mrb[4].mxu0 }
 0x136   : > { %v5940_v28 = vpop.f32.mrb[4].mxu1  ;;  %v5919_v29 = vpop.f32.mrb[5].mxu0 }
 0x137   : > { %v5941_v30 = vpop.f32.mrb[5].mxu1  ;;  %v5920_v31 = vadd.f32 %v5919_v29, %v5918_v27  ;;  %v5921_v33 = vpop.f32.mrb[6].mxu0  ;;  %v1797_v27 = vld [vmem:[%s8332_s11 + $0x18] sm:$0xff]  ;;  %v1794_v29 = vld [vmem:[%s8332_s11] sm:$0xff] }
 0x138   : > { %v5942_v32 = vadd.f32 %v5941_v30, %v5940_v28  ;;  %v5943_v34 = vpop.f32.mrb[6].mxu1  ;;  %v5922_v35 = vpop.f32.mrb[7].mxu0  ;;  %v1796_v30 = vld [vmem:[%s8332_s11 + $0x10] sm:$0xff]  ;;  %v1801_v33 = vld [vmem:[%s8332_s11 + $0x38] sm:$0xff] }
 0x139   : > { %v5944_v36 = vpop.f32.mrb[7].mxu1  ;;  %v1798_v35 = vld [vmem:[%s8332_s11 + $0x20] sm:$0xff] }
 0x13a   : > { %v1266_v37 = vadd.f32 %v5942_v32, %v5920_v31  ;;  %v7424_v31 = vpack.c.bf16 %v1796_v30, %v1794_v29  ;;  %v1799_v32 = vld [vmem:[%s8332_s11 + $0x28] sm:$0xff]  ;;  %v1800_v36 = vld [vmem:[%s8332_s11 + $0x30] sm:$0xff] }
 0x13b   : > { %v7434_v34 = vpack.c.bf16 %v1801_v33, %v1799_v32 }
 0x13c   : > { %v1271_v38 = vadd.f32 %v1266_v37, %v913_v23  ;;  %v1273_v39 = vrot.slane %v1266_v37, 7  ;;  %v7442_v37 = vpack.c.bf16 %v1800_v36, %v1798_v35 }
 0x13e   : > { %v1275_v43 = vadd.f32 %v1273_v39, %v913_v23  ;;  %v1276_v44 = vadd.f32 %v1273_v39, %v916_v25  ;;  %v1284_v60 = vmul.f32 %v7312_v6, %v1271_v38  ;;  %v6582_v23 = vld [vmem:[%s8330_s9 + $0x64] ss:$16 sps:$4 sm:$0xff]   ;;  %v6585_v25 = vld [vmem:[%s8330_s9 + $0xc] ss:$16 sps:$4 sm:$0xff]  }
 0x13f   : > { %1714 = vmatprep.subr.bf16.mxu1 %v6582_v23  ;;  %v1803_v38 = vld [vmem:[%s8332_s11 + $0x48] sm:$0xff]  ;;  %v1805_v39 = vld [vmem:[%s8332_s11 + $0x58] sm:$0xff] }
 0x140   : > { %v1297_v51 = vmul.f32 %v1295_v26, %v1275_v43  ;;  %v1298_v52 = vmul.f32 %v1295_v26, %v1276_v44  ;;  %v1292_v61 = vadd.f32 %v7317_v11, %v1284_v60  ;;  %v5679_v11 = vld [vmem:[%s8327_s6 + $0x50] sm:$0xff]  ;;  %1715 = vmatpush1.bf16.msra.mxu1 %v6580_v24  ;;  %v1795_v26 = vld [vmem:[%s8332_s11 + $0x8] sm:$0xff]  ;;  %v7452_v40 = vpack.c.bf16 %v1805_v39, %v1803_v38 }
 0x141   : > { %v6038_v14 = vpack.c.bf16 %v5680_v12, %v5679_v11  ;;  %1749 = vmatprep.subr.bf16.mxu1 %v6585_v25  ;;  %v7416_v28 = vpack.c.bf16 %v1797_v27, %v1795_v26  ;;  %v7460_v43 = vpack.c.bf16 %v1804_v42, %v1802_v41  ;;  %v1807_v44 = vld [vmem:[%s8332_s11 + $0x68] sm:$0xff]  ;;  %v1605_v11 = vlaneseq }
 0x142   : > { %v1302_v53 = vadd.f32 %v1300_v49, %v1297_v51  ;;  %v1303_v54 = vadd.f32 %v1300_v49, %v1298_v52  ;;  %v1293_v62 = vmax.f32 %v1292_v61, 0.0  ;;  %v7470_v47 = vpack.c.bf16 %v1809_v46, %v1807_v44  ;;  %v1806_v49 = vld [vmem:[%s8332_s11 + $0x60] sm:$0xff] }
 0x143   : > { %v7478_v51 = vpack.c.bf16 %v1808_v50, %v1806_v49  ;;  %v5682_v52 = vld [vmem:[%s8328_s7] ss:$0 sm:$0xff]  ;;  %v1606_v12 = vshrl.u32 %v1605_v11, 7  ;;  %v6965_v26 = vmov 1966171168  }
 0x144   : > { %v1304_v55 = vmax.f32 %v1302_v53, 0.0  ;;  %v1305_v56 = vmax.f32 %v1303_v54, 0.0  ;;  %v5683_v54 = vld [vmem:[%s8329_s8] ss:$0 sm:$0xff]  ;;  %v1892_v27 = vunpack.c.l.s4 %v6965_v26 }
 0x145   : > { %v7551_v25 = vsub.s32 2, %v1606_v12  ;;  %v7553_v29 = vsub.s32 3, %v1606_v12 }
 0x146   : > { %v1309_v57 = vrot.slane %v1304_v55, 1  ;;  %v1310_v58 = vrot.slane %v1305_v56, 1  ;;  %v1893_v32 = vunpack.c.0.s8 %v1892_v27 }
 0x148   : > { %v1311_v59 = vsel %vm1308_vm2, %v1309_v57, %v1310_v58  ;;  %v7557_v39 = vsub.s32 %v1893_v32, %v1606_v12 }
 0x149   : > { %1312 = vrot.lane.b32.xlu1 %v1311_v59, %s6963_s24  ;;  %s5421_s24 = sand.u32 1, %s7076_s25  }
 0x14a   : > { %s8228_s26 = scalar_lea.sflag [#allocation10], %s5421_s24 }
 0x1bb   : > { %v1313_v63 = vpop.permute.xlu1 %1312 }
 0x1bc   : > { %v1315_v0 = vmax.f32 %v1293_v62, %v1313_v63 }
 0x1be   : > { %1320 = vst.msk [vmem:[#allocation2 + $0x1] sm:$0xff] %vm1319_vm3, %v1315_v0  ;;  %v6583_v0 = vld [vmem:[%s8330_s9 + $0x8] ss:$16 sps:$4 sm:$0xff]  }
 0x1c5   : > { %v1326_v6 = vld [vmem:[#allocation2 + $0x1] sm:$0xff] }
 0x1c6   : > { %5979 = vmatmul.mubr.msk.f32.vlgmr.msra.gmra.mrb[8].mxu0 %vm1319_vm3, %v1326_v6  ;;  %v1321_v13 = vld [vmem:[#allocation2] sm:$0xff]  ;;  %v6594_v6 = vld [vmem:[%s8330_s9 + $0x6c] ss:$16 sps:$4 sm:$0xff]  }
 0x1c7   : > { %6030 = vmatpush3.bf16.msra.mxu0 %v6029_v3  ;;  %5989 = vmatprep.mubr.msk.f32.mxu0 %vm6962_vm1, %v6961_v48  ;;  %v1478_v15 = vld [vmem:[#allocation2 + $0x2] sm:$0xff] }
 0x1c8   : > { %6031 = vmatprep.subr.bf16.mxu0 %v6960_v45  ;;  %v6586_v3 = vld [vmem:[%s8330_s9 + $0x28] ss:$16 sps:$4 sm:$0xff]  }
 0x1cb   : > { %6033 = vmatpush3.bf16.msra.mxu0 %v6032_v7  ;;  %v6592_v7 = vld [vmem:[%s8330_s9 + $0x68] ss:$16 sps:$4 sm:$0xff]  }
 0x1cc   : > { %6034 = vmatprep.subr.bf16.mxu0 %v6960_v45 }
 0x1ce   : > { %5990 = vmatmul.mubr.msk.f32.vlgmr.msra.gmra.mrb[8].mxu0 %vm1319_vm3, %v1321_v13  ;;  %v7542_v13 = vsub.s32 0, %v1606_v12 }
 0x1cf   : > { %6036 = vmatpush3.bf16.msra.mxu0 %v6035_v10  ;;  %6000 = vmatprep.mubr.msk.f32.mxu0 %vm6962_vm1, %v6961_v48 }
 0x1d0   : > { %6037 = vmatprep.subr.bf16.mxu0 %v6960_v45 }
 0x1d3   : > { %6039 = vmatpush3.bf16.msra.mxu0 %v6038_v14  ;;  %v1603_v14 = vld [vmem:[%s8331_s10] sm:$0xf] }
 0x1d4   : > { %6041 = vmatprep.subr.bf16.mxu0 %v7416_v28  ;;  %v1608_v16 = vrot.slane %v1603_v14, %v7542_v13  ;;  %v1616_v30 = vrot.slane %v1603_v14, %v7551_v25  ;;  %v1620_v33 = vrot.slane %v1603_v14, %v7553_v29 }
 0x1d6   : > { %6001 = vmatmul.mubr.msk.f32.vlgmr.msra.gmra.mrb[8].mxu0 %vm1319_vm3, %v1478_v15  ;;  %v7547_v15 = vsub.s32 1, %v1606_v12 }
 0x1d7   : > { %1881 = vmatprep.mubr.f32.mxu0 %v6961_v48  ;;  %6043 = vmatpush1.bf16.msra.mxu0 %v7424_v31 }
 0x1d8   : > { %6045 = vmatprep.subr.bf16.mxu0 %v7434_v34  ;;  %v1612_v17 = vrot.slane %v1603_v14, %v7547_v15 }
 0x1db   : > { %6047 = vmatpush1.bf16.msra.mxu0 %v7442_v37 }
 0x1dc   : > { %6049 = vmatprep.subr.bf16.mxu0 %v7452_v40 }
 0x1df   : > { %6051 = vmatpush1.bf16.msra.mxu0 %v7460_v43 }
 0x1e0   : > { %6053 = vmatprep.subr.bf16.mxu0 %v7470_v47 }
 0x1e3   : > { %6055 = vmatpush1.bf16.msra.mxu0 %v7478_v51 }
 0x1e4   : > { %6073 = vmatprep.subr.bf16.mxu0 %v7416_v28 }
 0x1e6   : > { %1882 = vmatmul.mubr.f32.vlgmr.msra.gmra.mrb[10].mxu0 %v6961_v48 }
 0x1e7   : > { %6075 = vmatpush1.bf16.msra.mxu0 %v7424_v31  ;;  %2135 = vmatprep.mubr.f32.mxu0 %v6961_v48 }
 0x1e8   : > { %6077 = vmatprep.subr.bf16.mxu0 %v7434_v34 }
 0x1eb   : > { %6079 = vmatpush1.bf16.msra.mxu0 %v7442_v37 }
 0x1ec   : > { %6081 = vmatprep.subr.bf16.mxu0 %v7452_v40 }
 0x1ef   : > { %6083 = vmatpush1.bf16.msra.mxu0 %v7460_v43 }
 0x1f0   : > { %6085 = vmatprep.subr.bf16.mxu0 %v7470_v47 }
 0x1f3   : > { %6087 = vmatpush1.bf16.msra.mxu0 %v7478_v51 }
 0x1f4   : > { %6105 = vmatprep.subr.bf16.mxu0 %v7416_v28 }
 0x2a9   : > { %v1553_v53 = vpop.f32.mrb[8].mxu0 }
 0x2aa   : > { %v1565_v55 = vmul.f32 %v5682_v52, %v1553_v53  ;;  %v6002_v56 = vpop.f32.mrb[9].mxu0 }
 0x2ac   : > { %v1573_v57 = vadd.f32 %v5683_v54, %v1565_v55 }
 0x2ae   : > { %v1574_v58 = vmax.f32 %v1573_v57, 0.0 }
 0x2b0   : > { %1579 = vst.msk [vmem:[#allocation3 + $0x1] sm:$0xff] %vm1578_vm5, %v1574_v58 }
 0x2b7   : > { %v1580_v59 = vld [vmem:[#allocation3] sm:$0xff] }
 0x2b8   : > { %v1581_v60 = vld [vmem:[#allocation3 + $0x1] sm:$0xff] }
 0x2b9   : > { %v1582_v61 = vmax.f32 %v1580_v59, %v1581_v60  ;;  %v1583_v62 = vld [vmem:[#allocation3 + $0x2] sm:$0xff]  ;;  %v1883_v8 = vpop.f32.mrb[10].mxu0 }
 0x2ba   : > { %v1885_v9 = vpop.f32.mrb[11].mxu0 }
 0x2bb   : > { %v1584_v63 = vmax.f32 %v1582_v61, %v1583_v62  ;;  %v1890_v10 = vcombine.low %v1883_v8, %v1885_v9 }
 0x2bd   : > { %v1586_v1 = vpack.c.bf16 %v1584_v63, %v1584_v63  ;;  %1585 = vst.msk [vmem:[%s7510_s20] sm:$0xff] %vm1578_vm5, %v1584_v63  ;;  %v1897_v46 = vrot.slane %v1890_v10, %v7557_v39 }
 0x2bf   : > { %5700 = vmatmul.mubr.msk.bf16.vlgmr.msra.gmra.mrb[8].mxu1 %vm1578_vm5, %v1586_v1  ;;  %v1904_v49 = vrot.slane %v1897_v46, %v7557_v39 }
 0x2c0   : > { %1750 = vmatpush1.bf16.msra.mxu1 %v6583_v0  ;;  %1781 = vmatprep.mubr.bf16.mxu1 %v6964_v22 }
 0x2c1   : > { %1751 = vmatprep.subr.bf16.mxu1 %v6588_v2 }
 0x2c4   : > { %1752 = vmatpush1.bf16.msra.mxu1 %v6586_v3 }
 0x2c5   : > { %1753 = vmatprep.subr.bf16.mxu1 %v6591_v4 }
 0x2c8   : > { %1754 = vmatpush1.bf16.msra.mxu1 %v6589_v5 }
 0x2c9   : > { %1755 = vmatprep.subr.bf16.mxu1 %v6594_v6 }
 0x2cc   : > { %1756 = vmatpush1.bf16.msra.mxu1 %v6592_v7 }
 0x2cd   : > { %6057 = vmatprep.subr.bf16.mxu1 %v7416_v28 }
 0x2cf   : > { %5701 = vmatmul.mubr.msk.bf16.vlgmr.msra.gmra.mrb[12].mxu1 %vm1578_vm5, %v1586_v1 }
 0x2d0   : > { %6059 = vmatpush1.bf16.msra.mxu1 %v7424_v31  ;;  %2008 = vmatprep.mubr.f32.mxu1 %v6961_v48 }
 0x2d1   : > { %6061 = vmatprep.subr.bf16.mxu1 %v7434_v34 }
 0x2d4   : > { %6063 = vmatpush1.bf16.msra.mxu1 %v7442_v37 }
 0x2d5   : > { %6065 = vmatprep.subr.bf16.mxu1 %v7452_v40 }
 0x2d8   : > { %6067 = vmatpush1.bf16.msra.mxu1 %v7460_v43 }
 0x2d9   : > { %6069 = vmatprep.subr.bf16.mxu1 %v7470_v47 }
 0x2dc   : > { %6071 = vmatpush1.bf16.msra.mxu1 %v7478_v51 }
 0x2dd   : > { %6089 = vmatprep.subr.bf16.mxu1 %v7416_v28 }
 0x392   : > { %v1742_v18 = vpop.f32.mrb[8].mxu1 }
 0x393   : > { %v1743_v19 = vadd.f32 %v1742_v18, %v1608_v16  ;;  %v1744_v20 = vpop.f32.mrb[9].mxu1 }
 0x394   : > { %v1745_v21 = vadd.f32 %v1744_v20, %v1612_v17  ;;  %v1746_v23 = vpop.f32.mrb[10].mxu1 }
 0x395   : > { %1790 = vst [vmem:[#allocation5] sm:$0xff] %v1743_v19  ;;  %v1747_v24 = vpop.f32.mrb[11].mxu1 }
 0x396   : > { %1791 = vst [vmem:[#allocation5 + $0x8] sm:$0xff] %v1745_v21 }
 0x39d   : > { %v1810_v50 = vld [vmem:[#allocation5] ss:$8 sm:$0x3]  ;;  %v1937_v11 = vld [vmem:[#allocation5 + $0x1] ss:$8 sm:$0x3] }
 0x3a2   : > { %v1783_v35 = vpop.f32.mrb[12].mxu1 }
 0x3a3   : > { %v1784_v36 = vadd.f32 %v1783_v35, %v1616_v30  ;;  %v1785_v38 = vpop.f32.mrb[13].mxu1 }
 0x3a4   : > { %v1786_v41 = vadd.f32 %v1785_v38, %v1620_v33  ;;  %v1787_v42 = vpop.f32.mrb[14].mxu1 }
 0x3a5   : > { %1792 = vst [vmem:[#allocation5 + $0x10] sm:$0xff] %v1784_v36  ;;  %v1788_v44 = vpop.f32.mrb[15].mxu1 }
 0x3a6   : > { %1793 = vst [vmem:[#allocation5 + $0x18] sm:$0xff] %v1786_v41 }
 0x3ad   : > { %v1812_v52 = vld [vmem:[#allocation5 + $0x17] ss:$8 sm:$0x3]  ;;  %v1939_v9 = vld [vmem:[#allocation5 + $0x16] ss:$8 sm:$0x3] }
 0x3ae   : > { %v1813_v53 = vadd.f32 %v1812_v52, %v1810_v50  ;;  %v1940_v14 = vadd.f32 %v1939_v9, %v1937_v11  ;;  %v2066_v46 = vld [vmem:[#allocation5 + $0x15] ss:$8 sm:$0x3]  ;;  %v2064_v50 = vld [vmem:[#allocation5 + $0x2] ss:$8 sm:$0x3] }
 0x3af   : > { %v2193_v9 = vld [vmem:[#allocation5 + $0x14] ss:$8 sm:$0x3]  ;;  %v2191_v11 = vld [vmem:[#allocation5 + $0x3] ss:$8 sm:$0x3] }
 0x3b0   : > { %v1906_v54 = vadd.f32 %v1904_v49, %v1813_v53  ;;  %v2067_v53 = vadd.f32 %v2066_v46, %v2064_v50 }
 0x3b2   : > { %1914 = vrot.lane.b32.xlu1 %v1906_v54, %s6966_s29  ;;  %v5702_v55 = vmul.f32 -1.442695, %v1906_v54 }
 0x3b4   : > { %6643 = vpow2.f32 %v5702_v55 }
 0x3be   : > { %v6644_v56 = vpop.eup %6643 }
 0x3bf   : > { %v1910_v57 = vadd.f32 1.0, %v6644_v56 }
 0x3c1   : > { %6645 = vrcp.f32 %v1910_v57 }
 0x3cb   : > { %v6646_v60 = vpop.eup %6645 }
 0x3cc   : > { %v1919_v63 = vmul.f32 0.0, %v6646_v60  ;;  %v1928_v3 = vrot.slane %v6646_v60, 1 }
 0x424   : > { %v1915_v58 = vpop.permute.xlu1 %1914 }
 0x425   : > { %v1916_v59 = vrot.slane %v1915_v58, 1 }
 0x427   : > { %6647 = vtanh.f32 %v1916_v59 }
 0x431   : > { %v6648_v61 = vpop.eup %6647 }
 0x432   : > { %v1920_v62 = vmul.f32 %v6648_v61, %v6646_v60 }
 0x434   : > { %1922 = vrot.lane.b32.xlu0 %v1920_v62, %s6966_s29 }
 0x4a6   : > { %v1923_v0 = vpop.permute.xlu0 %1922 }
 0x4a7   : > { %v1925_v1 = vadd.f32 %v1923_v0, %v1919_v63 }
 0x4a9   : > { %6649 = vtanh.f32 %v1925_v1 }
 0x4b3   : > { %v6650_v2 = vpop.eup %6649 }
 0x4b4   : > { %1931 = vrot.lane.b32.xlu1 %v6650_v2, %s6966_s29 }
 0x526   : > { %v1932_v4 = vpop.permute.xlu1 %1931 }
 0x527   : > { %v1934_v5 = vmul.f32 %v1932_v4, %v1928_v3 }
 0x529   : > { %1935 = vst.msk [vmem:[#allocation6] sm:$0x1] %vm1575_vm4, %v1934_v5  ;;  %5703 = vmatmul.mubr.msk.f32.vlgmr.msra.gmra.mrb[16].mxu1 %vm1578_vm5, %v1934_v5 }
 0x52a   : > { %6091 = vmatpush1.bf16.msra.mxu1 %v7424_v31  ;;  %2262 = vmatprep.mubr.f32.mxu1 %v6961_v48 }
 0x52b   : > { %6093 = vmatprep.subr.bf16.mxu1 %v7434_v34 }
 0x52e   : > { %6095 = vmatpush1.bf16.msra.mxu1 %v7442_v37 }
 0x52f   : > { %6097 = vmatprep.subr.bf16.mxu1 %v7452_v40 }
 0x532   : > { %6099 = vmatpush1.bf16.msra.mxu1 %v7460_v43 }
 0x533   : > { %6101 = vmatprep.subr.bf16.mxu1 %v7470_v47 }
 0x536   : > { %6103 = vmatpush1.bf16.msra.mxu1 %v7478_v51 }
 0x537   : > { %6121 = vmatprep.subr.bf16.mxu1 %v7416_v28 }
 0x5fc   : > { %v2010_v6 = vpop.f32.mrb[16].mxu1 }
 0x5fd   : > { %v2012_v7 = vpop.f32.mrb[17].mxu1 }
 0x5fe   : > { %v2017_v8 = vcombine.low %v2010_v6, %v2012_v7 }
 0x600   : > { %v2024_v10 = vrot.slane %v2017_v8, %v7557_v39 }
 0x602   : > { %v2031_v12 = vrot.slane %v2024_v10, %v7557_v39 }
 0x604   : > { %v2033_v16 = vadd.f32 %v2031_v12, %v1940_v14  ;;  %v2194_v14 = vadd.f32 %v2193_v9, %v2191_v11  ;;  %v2445_v9 = vld [vmem:[#allocation5 + $0x5] ss:$8 sm:$0x3] }
 0x606   : > { %2041 = vrot.lane.b32.xlu0 %v2033_v16, %s6966_s29  ;;  %v5704_v17 = vmul.f32 -1.442695, %v2033_v16 }
 0x608   : > { %6651 = vpow2.f32 %v5704_v17 }
 0x612   : > { %v6652_v18 = vpop.eup %6651 }
 0x613   : > { %v2037_v19 = vadd.f32 1.0, %v6652_v18 }
 0x615   : > { %6653 = vrcp.f32 %v2037_v19 }
 0x61f   : > { %v6654_v23 = vpop.eup %6653 }
 0x620   : > { %v2046_v27 = vmul.f32 %v6654_v23, %v1925_v1  ;;  %v2055_v35 = vrot.slane %v6654_v23, 1 }
 0x678   : > { %v2042_v20 = vpop.permute.xlu0 %2041 }
 0x679   : > { %v2043_v21 = vrot.slane %v2042_v20, 1 }
 0x67b   : > { %6655 = vtanh.f32 %v2043_v21 }
 0x685   : > { %v6656_v24 = vpop.eup %6655 }
 0x686   : > { %v2047_v26 = vmul.f32 %v6656_v24, %v6654_v23 }
 0x688   : > { %2049 = vrot.lane.b32.xlu1 %v2047_v26, %s6966_s29 }
 0x6fa   : > { %v2050_v30 = vpop.permute.xlu1 %2049 }
 0x6fb   : > { %v2052_v32 = vadd.f32 %v2050_v30, %v2046_v27 }
 0x6fd   : > { %6657 = vtanh.f32 %v2052_v32 }
 0x707   : > { %v6658_v33 = vpop.eup %6657 }
 0x708   : > { %2058 = vrot.lane.b32.xlu0 %v6658_v33, %s6966_s29 }
 0x77a   : > { %v2059_v36 = vpop.permute.xlu0 %2058 }
 0x77b   : > { %v2061_v38 = vmul.f32 %v2059_v36, %v2055_v35 }
 0x77d   : > { %2062 = vst.msk [vmem:[#allocation6 + $0x1] sm:$0x1] %vm1575_vm4, %v2061_v38  ;;  %5705 = vmatmul.mubr.msk.f32.vlgmr.msra.gmra.mrb[12].mxu0 %vm1578_vm5, %v2061_v38 }
 0x77e   : > { %6107 = vmatpush1.bf16.msra.mxu0 %v7424_v31  ;;  %2389 = vmatprep.mubr.f32.mxu0 %v6961_v48 }
 0x77f   : > { %6109 = vmatprep.subr.bf16.mxu0 %v7434_v34 }
 0x782   : > { %6111 = vmatpush1.bf16.msra.mxu0 %v7442_v37 }
 0x783   : > { %6113 = vmatprep.subr.bf16.mxu0 %v7452_v40 }
 0x786   : > { %6115 = vmatpush1.bf16.msra.mxu0 %v7460_v43 }
 0x787   : > { %6117 = vmatprep.subr.bf16.mxu0 %v7470_v47 }
 0x78a   : > { %6119 = vmatpush1.bf16.msra.mxu0 %v7478_v51 }
 0x78b   : > { %6137 = vmatprep.subr.bf16.mxu0 %v7416_v28 }
 0x850   : > { %v2137_v41 = vpop.f32.mrb[12].mxu0 }
 0x851   : > { %v2139_v42 = vpop.f32.mrb[13].mxu0 }
 0x852   : > { %v2144_v44 = vcombine.low %v2137_v41, %v2139_v42 }
 0x854   : > { %v2151_v49 = vrot.slane %v2144_v44, %v7557_v39  ;;  %v2320_v44 = vld [vmem:[#allocation5 + $0x13] ss:$8 sm:$0x3] }
 0x856   : > { %v2158_v52 = vrot.slane %v2151_v49, %v7557_v39  ;;  %v2318_v49 = vld [vmem:[#allocation5 + $0x4] ss:$8 sm:$0x3] }
 0x858   : > { %v2160_v54 = vadd.f32 %v2158_v52, %v2067_v53  ;;  %v2321_v52 = vadd.f32 %v2320_v44, %v2318_v49 }
 0x85a   : > { %2168 = vrot.lane.b32.xlu1 %v2160_v54, %s6966_s29  ;;  %v5706_v55 = vmul.f32 -1.442695, %v2160_v54 }
 0x85c   : > { %6659 = vpow2.f32 %v5706_v55 }
 0x866   : > { %v6660_v56 = vpop.eup %6659 }
 0x867   : > { %v2164_v57 = vadd.f32 1.0, %v6660_v56 }
 0x869   : > { %6661 = vrcp.f32 %v2164_v57 }
 0x873   : > { %v6662_v60 = vpop.eup %6661 }
 0x874   : > { %v2173_v63 = vmul.f32 %v6662_v60, %v2052_v32  ;;  %v2182_v3 = vrot.slane %v6662_v60, 1 }
 0x8cc   : > { %v2169_v58 = vpop.permute.xlu1 %2168 }
 0x8cd   : > { %v2170_v59 = vrot.slane %v2169_v58, 1 }
 0x8cf   : > { %6663 = vtanh.f32 %v2170_v59 }
 0x8d9   : > { %v6664_v61 = vpop.eup %6663 }
 0x8da   : > { %v2174_v62 = vmul.f32 %v6664_v61, %v6662_v60 }
 0x8dc   : > { %2176 = vrot.lane.b32.xlu0 %v2174_v62, %s6966_s29 }
 0x94e   : > { %v2177_v0 = vpop.permute.xlu0 %2176 }
 0x94f   : > { %v2179_v1 = vadd.f32 %v2177_v0, %v2173_v63 }
 0x951   : > { %6665 = vtanh.f32 %v2179_v1 }
 0x95b   : > { %v6666_v2 = vpop.eup %6665 }
 0x95c   : > { %2185 = vrot.lane.b32.xlu1 %v6666_v2, %s6966_s29 }
 0x9ce   : > { %v2186_v4 = vpop.permute.xlu1 %2185 }
 0x9cf   : > { %v2188_v5 = vmul.f32 %v2186_v4, %v2182_v3 }
 0x9d1   : > { %2189 = vst.msk [vmem:[#allocation6 + $0x2] sm:$0x1] %vm1575_vm4, %v2188_v5  ;;  %5707 = vmatmul.mubr.msk.f32.vlgmr.msra.gmra.mrb[18].mxu1 %vm1578_vm5, %v2188_v5 }
 0x9d2   : > { %6123 = vmatpush1.bf16.msra.mxu1 %v7424_v31  ;;  %2516 = vmatprep.mubr.f32.mxu1 %v6961_v48 }
 0x9d3   : > { %6125 = vmatprep.subr.bf16.mxu1 %v7434_v34 }
 0x9d6   : > { %6127 = vmatpush1.bf16.msra.mxu1 %v7442_v37 }
 0x9d7   : > { %6129 = vmatprep.subr.bf16.mxu1 %v7452_v40 }
 0x9da   : > { %6131 = vmatpush1.bf16.msra.mxu1 %v7460_v43 }
 0x9db   : > { %6133 = vmatprep.subr.bf16.mxu1 %v7470_v47 }
 0x9de   : > { %6135 = vmatpush1.bf16.msra.mxu1 %v7478_v51 }
 0x9df   : > { %6153 = vmatprep.subr.bf16.mxu1 %v7416_v28 }
 0xaa4   : > { %v2264_v6 = vpop.f32.mrb[18].mxu1 }
 0xaa5   : > { %v2266_v7 = vpop.f32.mrb[19].mxu1 }
 0xaa6   : > { %v2271_v8 = vcombine.low %v2264_v6, %v2266_v7 }
 0xaa8   : > { %v2278_v10 = vrot.slane %v2271_v8, %v7557_v39  ;;  %v2447_v8 = vld [vmem:[#allocation5 + $0x12] ss:$8 sm:$0x3] }
 0xaaa   : > { %v2285_v12 = vrot.slane %v2278_v10, %v7557_v39 }
 0xaac   : > { %v2287_v16 = vadd.f32 %v2285_v12, %v2194_v14 }
 0xaae   : > { %2295 = vrot.lane.b32.xlu0 %v2287_v16, %s6966_s29  ;;  %v5708_v17 = vmul.f32 -1.442695, %v2287_v16 }
 0xab0   : > { %6667 = vpow2.f32 %v5708_v17 }
 0xaba   : > { %v6668_v18 = vpop.eup %6667 }
 0xabb   : > { %v2291_v19 = vadd.f32 1.0, %v6668_v18 }
 0xabd   : > { %6669 = vrcp.f32 %v2291_v19 }
 0xac7   : > { %v6670_v28 = vpop.eup %6669 }
 0xac8   : > { %v2300_v26 = vmul.f32 %v6670_v28, %v2179_v1  ;;  %v2309_v33 = vrot.slane %v6670_v28, 1 }
 0xb20   : > { %v2296_v20 = vpop.permute.xlu0 %2295 }
 0xb21   : > { %v2297_v21 = vrot.slane %v2296_v20, 1 }
 0xb23   : > { %6671 = vtanh.f32 %v2297_v21 }
 0xb2d   : > { %v6672_v23 = vpop.eup %6671 }
 0xb2e   : > { %v2301_v24 = vmul.f32 %v6672_v23, %v6670_v28 }
 0xb30   : > { %2303 = vrot.lane.b32.xlu1 %v2301_v24, %s6966_s29 }
 0xba2   : > { %v2304_v27 = vpop.permute.xlu1 %2303 }
 0xba3   : > { %v2306_v30 = vadd.f32 %v2304_v27, %v2300_v26 }
 0xba5   : > { %6673 = vtanh.f32 %v2306_v30 }
 0xbaf   : > { %v6674_v32 = vpop.eup %6673 }
 0xbb0   : > { %2312 = vrot.lane.b32.xlu0 %v6674_v32, %s6966_s29 }
 0xc22   : > { %v2313_v35 = vpop.permute.xlu0 %2312 }
 0xc23   : > { %v2315_v36 = vmul.f32 %v2313_v35, %v2309_v33  ;;  %v2572_v33 = vld [vmem:[#allocation5 + $0x6] ss:$8 sm:$0x3] }
 0xc25   : > { %2316 = vst.msk [vmem:[#allocation6 + $0x3] sm:$0x1] %vm1575_vm4, %v2315_v36  ;;  %5709 = vmatmul.mubr.msk.f32.vlgmr.msra.gmra.mrb[14].mxu0 %vm1578_vm5, %v2315_v36 }
 0xc26   : > { %6139 = vmatpush1.bf16.msra.mxu0 %v7424_v31  ;;  %2643 = vmatprep.mubr.f32.mxu0 %v6961_v48 }
 0xc27   : > { %6141 = vmatprep.subr.bf16.mxu0 %v7434_v34 }
 0xc2a   : > { %6143 = vmatpush1.bf16.msra.mxu0 %v7442_v37 }
 0xc2b   : > { %6145 = vmatprep.subr.bf16.mxu0 %v7452_v40 }
 0xc2e   : > { %6147 = vmatpush1.bf16.msra.mxu0 %v7460_v43 }
 0xc2f   : > { %6149 = vmatprep.subr.bf16.mxu0 %v7470_v47 }
 0xc32   : > { %6151 = vmatpush1.bf16.msra.mxu0 %v7478_v51 }
 0xcf8   : > { %v2391_v38 = vpop.f32.mrb[14].mxu0 }
 0xcf9   : > { %v2393_v41 = vpop.f32.mrb[15].mxu0 }
 0xcfa   : > { %v2398_v42 = vcombine.low %v2391_v38, %v2393_v41 }
 0xcfc   : > { %v2405_v46 = vrot.slane %v2398_v42, %v7557_v39 }
 0xcfe   : > { %v2412_v50 = vrot.slane %v2405_v46, %v7557_v39 }
 0xd00   : > { %v2414_v53 = vadd.f32 %v2412_v50, %v2321_v52 }
 0xd02   : > { %2422 = vrot.lane.b32.xlu1 %v2414_v53, %s6966_s29  ;;  %v5710_v54 = vmul.f32 -1.442695, %v2414_v53 }
 0xd04   : > { %6675 = vpow2.f32 %v5710_v54 }
 0xd0e   : > { %v6676_v55 = vpop.eup %6675 }
 0xd0f   : > { %v2418_v56 = vadd.f32 1.0, %v6676_v55 }
 0xd11   : > { %6677 = vrcp.f32 %v2418_v56 }
 0xd1b   : > { %v6678_v59 = vpop.eup %6677 }
 0xd1c   : > { %v2427_v62 = vmul.f32 %v6678_v59, %v2306_v30  ;;  %v2436_v2 = vrot.slane %v6678_v59, 1  ;;  %v2574_v30 = vld [vmem:[#allocation5 + $0x11] ss:$8 sm:$0x3] }
 0xd1d   : > { %v2575_v36 = vadd.f32 %v2574_v30, %v2572_v33  ;;  %v5753_v30 = vld [vmem:[%s8332_s11 + $0x88] sm:$0xff]  ;;  %v6613_v33 = vld [vmem:[%s8330_s9 + $0xe0] ss:$16 sps:$4 sm:$0xff]  }
 0xd74   : > { %v2423_v57 = vpop.permute.xlu1 %2422 }
 0xd75   : > { %v2424_v58 = vrot.slane %v2423_v57, 1 }
 0xd77   : > { %6679 = vtanh.f32 %v2424_v58 }
 0xd81   : > { %v6680_v60 = vpop.eup %6679 }
 0xd82   : > { %v2428_v61 = vmul.f32 %v6680_v60, %v6678_v59 }
 0xd84   : > { %2430 = vrot.lane.b32.xlu0 %v2428_v61, %s6966_s29 }
 0xdf6   : > { %v2431_v63 = vpop.permute.xlu0 %2430 }
 0xdf7   : > { %v2433_v0 = vadd.f32 %v2431_v63, %v2427_v62 }
 0xdf9   : > { %6681 = vtanh.f32 %v2433_v0 }
 0xe03   : > { %v6682_v1 = vpop.eup %6681 }
 0xe04   : > { %2439 = vrot.lane.b32.xlu1 %v6682_v1, %s6966_s29 }
 0xe76   : > { %v2440_v3 = vpop.permute.xlu1 %2439 }
 0xe77   : > { %v2442_v4 = vmul.f32 %v2440_v3, %v2436_v2  ;;  %v2699_v2 = vld [vmem:[#allocation5 + $0x7] ss:$8 sm:$0x3] }
 0xe79   : > { %2443 = vst.msk [vmem:[#allocation6 + $0x4] sm:$0x1] %vm1575_vm4, %v2442_v4  ;;  %5711 = vmatmul.mubr.msk.f32.vlgmr.msra.gmra.mrb[20].mxu1 %vm1578_vm5, %v2442_v4 }
 0xe7a   : > { %6155 = vmatpush1.bf16.msra.mxu1 %v7424_v31  ;;  %2770 = vmatprep.mubr.f32.mxu1 %v6961_v48 }
 0xe7b   : > { %6157 = vmatprep.subr.bf16.mxu1 %v7434_v34  ;;  %v2448_v34 = vadd.f32 %v2447_v8, %v2445_v9 }
 0xe7e   : > { %6159 = vmatpush1.bf16.msra.mxu1 %v7442_v37 }
 0xe7f   : > { %6161 = vmatprep.subr.bf16.mxu1 %v7452_v40 }
 0xe82   : > { %6163 = vmatpush1.bf16.msra.mxu1 %v7460_v43 }
 0xe83   : > { %6165 = vmatprep.subr.bf16.mxu1 %v7470_v47 }
 0xe86   : > { %6167 = vmatpush1.bf16.msra.mxu1 %v7478_v51 }
 0xf4c   : > { %v2518_v5 = vpop.f32.mrb[20].mxu1 }
 0xf4d   : > { %v2520_v6 = vpop.f32.mrb[21].mxu1 }
 0xf4e   : > { %v2525_v7 = vcombine.low %v2518_v5, %v2520_v6 }
 0xf50   : > { %v2532_v31 = vrot.slane %v2525_v7, %v7557_v39 }
 0xf52   : > { %v2539_v10 = vrot.slane %v2532_v31, %v7557_v39 }
 0xf54   : > { %v2541_v11 = vadd.f32 %v2539_v10, %v2448_v34 }
 0xf56   : > { %2549 = vrot.lane.b32.xlu0 %v2541_v11, %s6966_s29  ;;  %v5712_v37 = vmul.f32 -1.442695, %v2541_v11 }
 0xf58   : > { %6683 = vpow2.f32 %v5712_v37 }
 0xf62   : > { %v6684_v40 = vpop.eup %6683 }
 0xf63   : > { %v2545_v43 = vadd.f32 1.0, %v6684_v40 }
 0xf65   : > { %6685 = vrcp.f32 %v2545_v43 }
 0xf6f   : > { %v6686_v51 = vpop.eup %6685 }
 0xf70   : > { %v2554_v17 = vmul.f32 %v6686_v51, %v2433_v0  ;;  %v2563_v21 = vrot.slane %v6686_v51, 1  ;;  %v2701_v0 = vld [vmem:[#allocation5 + $0x10] ss:$8 sm:$0x3] }
 0xf71   : > { %v2702_v4 = vadd.f32 %v2701_v0, %v2699_v2  ;;  %v5758_v2 = vld [vmem:[%s8332_s11 + $0xb0] sm:$0xff] }
 0xfc8   : > { %v2550_v47 = vpop.permute.xlu0 %2549 }
 0xfc9   : > { %v2551_v12 = vrot.slane %v2550_v47, 1  ;;  %v6597_v47 = vld [vmem:[%s8330_s9 + $0x84] ss:$16 sps:$4 sm:$0xff]  }
 0xfca   : > { %2969 = vmatprep.subr.bf16.mxu0 %v6597_v47 }
 0xfcb   : > { %6687 = vtanh.f32 %v2551_v12  ;;  %v6595_v12 = vld [vmem:[%s8330_s9 + $0x80] ss:$16 sps:$4 sm:$0xff]  }
 0xfd5   : > { %v6688_v14 = vpop.eup %6687 }
 0xfd6   : > { %v2555_v16 = vmul.f32 %v6688_v14, %v6686_v51  ;;  %v6600_v51 = vld [vmem:[%s8330_s9 + $0x8c] ss:$16 sps:$4 sm:$0xff]   ;;  %v6598_v14 = vld [vmem:[%s8330_s9 + $0x88] ss:$16 sps:$4 sm:$0xff]  }
 0xfd7   : > { %3010 = vmatprep.subr.bf16.mxu1 %v6600_v51 }
 0xfd8   : > { %2557 = vrot.lane.b32.xlu1 %v2555_v16, %s6966_s29  ;;  %v6603_v16 = vld [vmem:[%s8330_s9 + $0xa4] ss:$16 sps:$4 sm:$0xff]  }
0x104a   : > { %v2558_v18 = vpop.permute.xlu1 %2557 }
0x104b   : > { %v2560_v19 = vadd.f32 %v2558_v18, %v2554_v17  ;;  %v6601_v17 = vld [vmem:[%s8330_s9 + $0xa0] ss:$16 sps:$4 sm:$0xff]   ;;  %v6606_v18 = vld [vmem:[%s8330_s9 + $0xac] ss:$16 sps:$4 sm:$0xff]  }
0x104d   : > { %6689 = vtanh.f32 %v2560_v19 }
0x1057   : > { %v6690_v20 = vpop.eup %6689 }
0x1058   : > { %2566 = vrot.lane.b32.xlu0 %v6690_v20, %s6966_s29  ;;  %v6609_v20 = vld [vmem:[%s8330_s9 + $0xc4] ss:$16 sps:$4 sm:$0xff]  }
0x10ca   : > { %v2567_v28 = vpop.permute.xlu0 %2566 }
0x10cb   : > { %v2569_v23 = vmul.f32 %v2567_v28, %v2563_v21  ;;  %v6607_v28 = vld [vmem:[%s8330_s9 + $0xc0] ss:$16 sps:$4 sm:$0xff]  }
0x10cd   : > { %2570 = vst.msk [vmem:[#allocation6 + $0x5] sm:$0x1] %vm1575_vm4, %v2569_v23  ;;  %5713 = vmatmul.mubr.msk.f32.vlgmr.msra.gmra.mrb[16].mxu0 %vm1578_vm5, %v2569_v23  ;;  %v6612_v23 = vld [vmem:[%s8330_s9 + $0xcc] ss:$16 sps:$4 sm:$0xff]  }
0x10ce   : > { %3001 = vmatprep.mubr.bf16.mxu0 %v6964_v22  ;;  %2970 = vmatpush1.bf16.msra.mxu0 %v6595_v12 }
0x10cf   : > { %2971 = vmatprep.subr.bf16.mxu0 %v6603_v16 }
0x10d2   : > { %2972 = vmatpush1.bf16.msra.mxu0 %v6601_v17 }
0x10d3   : > { %2973 = vmatprep.subr.bf16.mxu0 %v6609_v20 }
0x10d6   : > { %2974 = vmatpush1.bf16.msra.mxu0 %v6607_v28 }
0x11a0   : > { %v2645_v24 = vpop.f32.mrb[16].mxu0 }
0x11a1   : > { %v2647_v26 = vpop.f32.mrb[17].mxu0 }
0x11a2   : > { %v2652_v27 = vcombine.low %v2645_v24, %v2647_v26  ;;  %v6610_v24 = vld [vmem:[%s8330_s9 + $0xc8] ss:$16 sps:$4 sm:$0xff]   ;;  %v6615_v26 = vld [vmem:[%s8330_s9 + $0xe4] ss:$16 sps:$4 sm:$0xff]  }
0x11a3   : > { %2975 = vmatprep.subr.bf16.mxu0 %v6615_v26 }
0x11a4   : > { %v2659_v32 = vrot.slane %v2652_v27, %v7557_v39  ;;  %v6618_v27 = vld [vmem:[%s8330_s9 + $0xec] ss:$16 sps:$4 sm:$0xff]   ;;  %2976 = vmatpush1.bf16.msra.mxu0 %v6613_v33 }
0x11a6   : > { %v2666_v35 = vrot.slane %v2659_v32, %v7557_v39  ;;  %v5755_v32 = vld [vmem:[%s8332_s11 + $0x98] sm:$0xff] }
0x11a8   : > { %v2668_v38 = vadd.f32 %v2666_v35, %v2575_v36  ;;  %v6616_v35 = vld [vmem:[%s8330_s9 + $0xe8] ss:$16 sps:$4 sm:$0xff]   ;;  %v7712_v36 = vpack.c.bf16 %v5755_v32, %v5753_v30 }
0x11aa   : > { %2676 = vrot.lane.b32.xlu1 %v2668_v38, %s6966_s29  ;;  %v5714_v41 = vmul.f32 -1.442695, %v2668_v38  ;;  %6169 = vmatprep.subr.bf16.mxu0 %v7712_v36 }
0x11ac   : > { %6691 = vpow2.f32 %v5714_v41 }
0x11b6   : > { %v6692_v42 = vpop.eup %6691 }
0x11b7   : > { %v2672_v44 = vadd.f32 1.0, %v6692_v42 }
0x11b9   : > { %6693 = vrcp.f32 %v2672_v44  ;;  %v2827_v44 = vld [vmem:[#allocation6] sm:$0x1] }
0x11c3   : > { %v6694_v50 = vpop.eup %6693 }
0x11c4   : > { %v2681_v54 = vmul.f32 %v6694_v50, %v2560_v19  ;;  %v2690_v58 = vrot.slane %v6694_v50, 1  ;;  %v6604_v19 = vld [vmem:[%s8330_s9 + $0xa8] ss:$16 sps:$4 sm:$0xff]  }
0x121c   : > { %v2677_v46 = vpop.permute.xlu1 %2676 }
0x121d   : > { %v2678_v49 = vrot.slane %v2677_v46, 1  ;;  %v2830_v46 = vld [vmem:[#allocation6 + $0x1] sm:$0x1] }
0x121f   : > { %6695 = vtanh.f32 %v2678_v49  ;;  %v2832_v49 = vld [vmem:[#allocation6 + $0x2] sm:$0x1] }
0x1229   : > { %v6696_v52 = vpop.eup %6695 }
0x122a   : > { %v2682_v53 = vmul.f32 %v6696_v52, %v6694_v50  ;;  %v2834_v50 = vld [vmem:[#allocation6 + $0x3] sm:$0x1] }
0x122c   : > { %2684 = vrot.lane.b32.xlu0 %v2682_v53, %s6966_s29 }
0x129e   : > { %v2685_v55 = vpop.permute.xlu0 %2684 }
0x129f   : > { %v2687_v56 = vadd.f32 %v2685_v55, %v2681_v54  ;;  %v2836_v54 = vld [vmem:[#allocation6 + $0x4] sm:$0x1]  ;;  %v2838_v55 = vld [vmem:[#allocation6 + $0x5] sm:$0x1] }
0x12a1   : > { %6697 = vtanh.f32 %v2687_v56 }
0x12ab   : > { %v6698_v57 = vpop.eup %6697 }
0x12ac   : > { %2693 = vrot.lane.b32.xlu1 %v6698_v57, %s6966_s29  ;;  %v5752_v57 = vld [vmem:[%s8332_s11 + $0x80] sm:$0xff] }
0x131e   : > { %v2694_v59 = vpop.permute.xlu1 %2693 }
0x131f   : > { %v2696_v60 = vmul.f32 %v2694_v59, %v2690_v58  ;;  %v5754_v58 = vld [vmem:[%s8332_s11 + $0x90] sm:$0xff]  ;;  %v5757_v59 = vld [vmem:[%s8332_s11 + $0xa8] sm:$0xff] }
0x1321   : > { %2697 = vst.msk [vmem:[#allocation6 + $0x6] sm:$0x1] %vm1575_vm4, %v2696_v60  ;;  %5715 = vmatmul.mubr.msk.f32.vlgmr.msra.gmra.mrb[22].mxu1 %vm1578_vm5, %v2696_v60  ;;  %v5759_v60 = vld [vmem:[%s8332_s11 + $0xb8] sm:$0xff] }
0x1322   : > { %3042 = vmatprep.mubr.bf16.mxu1 %v6964_v22  ;;  %3011 = vmatpush1.bf16.msra.mxu1 %v6598_v14  ;;  %v7740_v0 = vpack.c.bf16 %v5759_v60, %v5757_v59 }
0x1323   : > { %3012 = vmatprep.subr.bf16.mxu1 %v6606_v18 }
0x1326   : > { %3013 = vmatpush1.bf16.msra.mxu1 %v6604_v19 }
0x1327   : > { %3014 = vmatprep.subr.bf16.mxu1 %v6612_v23 }
0x132a   : > { %3015 = vmatpush1.bf16.msra.mxu1 %v6610_v24 }
0x132b   : > { %3016 = vmatprep.subr.bf16.mxu1 %v6618_v27 }
0x132e   : > { %3017 = vmatpush1.bf16.msra.mxu1 %v6616_v35 }
0x132f   : > { %6185 = vmatprep.subr.bf16.mxu1 %v7712_v36 }
0x13f4   : > { %v2772_v61 = vpop.f32.mrb[22].mxu1 }
0x13f5   : > { %v2774_v62 = vpop.f32.mrb[23].mxu1 }
0x13f6   : > { %v2779_v63 = vcombine.low %v2772_v61, %v2774_v62  ;;  %v7738_v62 = vpack.c.bf16 %v5754_v58, %v5752_v57 }
0x13f8   : > { %v2786_v1 = vrot.slane %v2779_v63, %v7557_v39 }
0x13fa   : > { %v2793_v3 = vrot.slane %v2786_v1, %v7557_v39  ;;  %v5756_v1 = vld [vmem:[%s8332_s11 + $0xa0] sm:$0xff] }
0x13fc   : > { %v2795_v5 = vadd.f32 %v2793_v3, %v2702_v4  ;;  %v5761_v3 = vld [vmem:[%s8332_s11 + $0xc8] sm:$0xff]  ;;  %v5763_v4 = vld [vmem:[%s8332_s11 + $0xd8] sm:$0xff] }
0x13fe   : > { %2803 = vrot.lane.b32.xlu0 %v2795_v5, %s6966_s29  ;;  %v5716_v6 = vmul.f32 -1.442695, %v2795_v5  ;;  %v7757_v5 = vpack.c.bf16 %v5758_v2, %v5756_v1 }
0x1400   : > { %6699 = vpow2.f32 %v5716_v6  ;;  %v7761_v6 = vpack.c.bf16 %v5763_v4, %v5761_v3 }
0x140a   : > { %v6700_v7 = vpop.eup %6699 }
0x140b   : > { %v2799_v8 = vadd.f32 1.0, %v6700_v7  ;;  %v5760_v7 = vld [vmem:[%s8332_s11 + $0xc0] sm:$0xff] }
0x140d   : > { %6701 = vrcp.f32 %v2799_v8  ;;  %v5762_v8 = vld [vmem:[%s8332_s11 + $0xd0] sm:$0xff] }
0x1417   : > { %v6702_v10 = vpop.eup %6701 }
0x1418   : > { %v2808_v37 = vmul.f32 %v6702_v10, %v2687_v56  ;;  %v2817_v38 = vrot.slane %v6702_v10, 1  ;;  %v2840_v56 = vld [vmem:[#allocation6 + $0x6] sm:$0x1] }
0x1470   : > { %v2804_v31 = vpop.permute.xlu0 %2803 }
0x1471   : > { %v2805_v9 = vrot.slane %v2804_v31, 1  ;;  %v5765_v31 = vld [vmem:[%s8332_s11 + $0xe8] sm:$0xff] }
0x1473   : > { %6703 = vtanh.f32 %v2805_v9  ;;  %v5767_v9 = vld [vmem:[%s8332_s11 + $0xf8] sm:$0xff] }
0x147d   : > { %v6704_v34 = vpop.eup %6703 }
0x147e   : > { %v2809_v11 = vmul.f32 %v6704_v34, %v6702_v10  ;;  %v7779_v10 = vpack.c.bf16 %v5762_v8, %v5760_v7  ;;  %v7782_v34 = vpack.c.bf16 %v5767_v9, %v5765_v31 }
0x1480   : > { %2811 = vrot.lane.b32.xlu1 %v2809_v11, %s6966_s29  ;;  %v5764_v11 = vld [vmem:[%s8332_s11 + $0xe0] sm:$0xff] }
0x14f2   : > { %v2812_v40 = vpop.permute.xlu1 %2811 }
0x14f3   : > { %v2814_v43 = vadd.f32 %v2812_v40, %v2808_v37  ;;  %v5766_v37 = vld [vmem:[%s8332_s11 + $0xf0] sm:$0xff] }
0x14f4   : > { %v7793_v40 = vpack.c.bf16 %v5766_v37, %v5764_v11 }
0x14f5   : > { %6705 = vtanh.f32 %v2814_v43  ;;  %v5733_v43 = vld [vmem:[%s8331_s10 + $0x4] sm:$0xf] }
0x14f6   : > { %v2869_v47 = vrot.slane %v5733_v43, %v7542_v13  ;;  %v2877_v12 = vrot.slane %v5733_v43, %v7551_v25  ;;  %v2873_v51 = vrot.slane %v5733_v43, %v7547_v15  ;;  %v2881_v14 = vrot.slane %v5733_v43, %v7553_v29 }
0x14ff   : > { %v6706_v21 = vpop.eup %6705 }
0x1500   : > { %2820 = vrot.lane.b32.xlu0 %v6706_v21, %s6966_s29 }
0x1572   : > { %v2821_v41 = vpop.permute.xlu0 %2820 }
0x1573   : > { %v2823_v42 = vmul.f32 %v2821_v41, %v2817_v38 }
0x1575   : > { %2824 = vst.msk [vmem:[#allocation6 + $0x7] sm:$0x1] %vm1575_vm4, %v2823_v42 }
0x157c   : > { %v2825_v52 = vld [vmem:[#allocation6] sm:$0xff] }
0x157d   : > { %v2842_v53 = vld [vmem:[#allocation6 + $0x7] sm:$0x1]  ;;  %2826 = vst.msk [vmem:[#allocation4] sm:$0xff] %vm1319_vm3, %v2825_v52 }
0x157e   : > { %2843 = vst.msk [vmem:[#allocation4] sm:$0x1] %vm2828_vm6, %v2842_v53  ;;  %2829 = vst.msk [vmem:[#allocation4 + $0x7] sm:$0x1] %vm2828_vm6, %v2827_v44 }
0x157f   : > { %2831 = vst.msk [vmem:[#allocation4 + $0x6] sm:$0x1] %vm2828_vm6, %v2830_v46  ;;  %2833 = vst.msk [vmem:[#allocation4 + $0x5] sm:$0x1] %vm2828_vm6, %v2832_v49 }
0x1580   : > { %2835 = vst.msk [vmem:[#allocation4 + $0x4] sm:$0x1] %vm2828_vm6, %v2834_v50  ;;  %2837 = vst.msk [vmem:[#allocation4 + $0x3] sm:$0x1] %vm2828_vm6, %v2836_v54 }
0x1581   : > { %2839 = vst.msk [vmem:[#allocation4 + $0x2] sm:$0x1] %vm2828_vm6, %v2838_v55  ;;  %2841 = vst.msk [vmem:[#allocation4 + $0x1] sm:$0x1] %vm2828_vm6, %v2840_v56 }
0x1588   : > { %v2844_v61 = vld [vmem:[#allocation4] sm:$0xff] }
0x1589   : > { %v2845_v63 = vpack.c.bf16 %v2844_v61, %v2844_v61 }
0x158b   : > { %5750 = vmatmul.mubr.msk.bf16.vlgmr.msra.gmra.mrb[20].mxu0 %vm1578_vm5, %v2845_v63  ;;  %5751 = vmatmul.mubr.msk.bf16.vlgmr.msra.gmra.mrb[24].mxu1 %vm1578_vm5, %v2845_v63 }
0x158c   : > { %6171 = vmatpush1.bf16.msra.mxu0 %v7738_v62  ;;  %3139 = vmatprep.mubr.f32.mxu0 %v6961_v48 }
0x158d   : > { %6173 = vmatprep.subr.bf16.mxu0 %v7740_v0  ;;  %6187 = vmatpush1.bf16.msra.mxu1 %v7738_v62 }
0x158e   : > { %6189 = vmatprep.subr.bf16.mxu1 %v7740_v0  ;;  %3264 = vmatprep.mubr.f32.mxu1 %v6961_v48 }
0x1590   : > { %6175 = vmatpush1.bf16.msra.mxu0 %v7757_v5 }
0x1591   : > { %6177 = vmatprep.subr.bf16.mxu0 %v7761_v6  ;;  %6191 = vmatpush1.bf16.msra.mxu1 %v7757_v5 }
0x1592   : > { %6193 = vmatprep.subr.bf16.mxu1 %v7761_v6 }
0x1594   : > { %6179 = vmatpush1.bf16.msra.mxu0 %v7779_v10 }
0x1595   : > { %6181 = vmatprep.subr.bf16.mxu0 %v7782_v34  ;;  %6195 = vmatpush1.bf16.msra.mxu1 %v7779_v10 }
0x1596   : > { %6197 = vmatprep.subr.bf16.mxu1 %v7782_v34 }
0x1598   : > { %6183 = vmatpush1.bf16.msra.mxu0 %v7793_v40 }
0x1599   : > { %6199 = vmatpush1.bf16.msra.mxu1 %v7793_v40  ;;  %6201 = vmatprep.subr.bf16.mxu0 %v7712_v36 }
0x159a   : > { %6217 = vmatprep.subr.bf16.mxu1 %v7712_v36 }
0x159b   : > { %3140 = vmatmul.mubr.f32.vlgmr.msra.gmra.mrb[18].mxu0 %v6961_v48 }
0x159c   : > { %6203 = vmatpush1.bf16.msra.mxu0 %v7738_v62  ;;  %3389 = vmatprep.mubr.f32.mxu0 %v6961_v48 }
0x159d   : > { %6205 = vmatprep.subr.bf16.mxu0 %v7740_v0 }
0x15a0   : > { %6207 = vmatpush1.bf16.msra.mxu0 %v7757_v5 }
0x15a1   : > { %6209 = vmatprep.subr.bf16.mxu0 %v7761_v6 }
0x15a4   : > { %6211 = vmatpush1.bf16.msra.mxu0 %v7779_v10 }
0x15a5   : > { %6213 = vmatprep.subr.bf16.mxu0 %v7782_v34 }
0x15a8   : > { %6215 = vmatpush1.bf16.msra.mxu0 %v7793_v40 }
0x15a9   : > { %6233 = vmatprep.subr.bf16.mxu0 %v7712_v36 }
0x165e   : > { %v3003_v16 = vpop.f32.mrb[20].mxu0  ;;  %v3044_v17 = vpop.f32.mrb[24].mxu1 }
0x165f   : > { %v3004_v18 = vadd.f32 %v3003_v16, %v2869_v47  ;;  %v3045_v19 = vadd.f32 %v3044_v17, %v2877_v12  ;;  %v3005_v20 = vpop.f32.mrb[21].mxu0  ;;  %v3046_v21 = vpop.f32.mrb[25].mxu1 }
0x1660   : > { %v3006_v28 = vadd.f32 %v3005_v20, %v2873_v51  ;;  %v3047_v23 = vadd.f32 %v3046_v21, %v2881_v14  ;;  %v3007_v24 = vpop.f32.mrb[22].mxu0  ;;  %v3048_v26 = vpop.f32.mrb[26].mxu1 }
0x1661   : > { %3051 = vst [vmem:[#allocation5] sm:$0xff] %v3004_v18  ;;  %3053 = vst [vmem:[#allocation5 + $0x10] sm:$0xff] %v3045_v19  ;;  %v3008_v27 = vpop.f32.mrb[23].mxu0  ;;  %v3049_v30 = vpop.f32.mrb[27].mxu1 }
0x1662   : > { %3052 = vst [vmem:[#allocation5 + $0x8] sm:$0xff] %v3006_v28  ;;  %3054 = vst [vmem:[#allocation5 + $0x18] sm:$0xff] %v3047_v23 }
0x1669   : > { %v3072_v38 = vld [vmem:[#allocation5] ss:$8 sm:$0x3]  ;;  %v3073_v41 = vld [vmem:[#allocation5 + $0x17] ss:$8 sm:$0x3] }
0x166a   : > { %v3074_v46 = vadd.f32 %v3073_v41, %v3072_v38  ;;  %v3194_v31 = vld [vmem:[#allocation5 + $0x1] ss:$8 sm:$0x3]  ;;  %v3195_v9 = vld [vmem:[#allocation5 + $0x16] ss:$8 sm:$0x3] }
0x166b   : > { %v3196_v43 = vadd.f32 %v3195_v9, %v3194_v31  ;;  %v3319_v38 = vld [vmem:[#allocation5 + $0x2] ss:$8 sm:$0x3]  ;;  %v3320_v41 = vld [vmem:[#allocation5 + $0x15] ss:$8 sm:$0x3] }
0x166c   : > { %v3444_v31 = vld [vmem:[#allocation5 + $0x3] ss:$8 sm:$0x3]  ;;  %v3445_v9 = vld [vmem:[#allocation5 + $0x14] ss:$8 sm:$0x3] }
0x166e   : > { %v3141_v32 = vpop.f32.mrb[18].mxu0 }
0x166f   : > { %v3143_v33 = vpop.f32.mrb[19].mxu0 }
0x1670   : > { %v3148_v35 = vcombine.low %v3141_v32, %v3143_v33 }
0x1672   : > { %v3155_v42 = vrot.slane %v3148_v35, %v7557_v39 }
0x1674   : > { %v3162_v44 = vrot.slane %v3155_v42, %v7557_v39 }
0x1676   : > { %v3164_v49 = vadd.f32 %v3162_v44, %v3074_v46  ;;  %v3321_v46 = vadd.f32 %v3320_v41, %v3319_v38  ;;  %v3570_v38 = vld [vmem:[#allocation5 + $0x13] ss:$8 sm:$0x3] }
0x1678   : > { %3172 = vrot.lane.b32.xlu1 %v3164_v49, %s6966_s29  ;;  %v5768_v50 = vmul.f32 -1.442695, %v3164_v49 }
0x167a   : > { %6707 = vpow2.f32 %v5768_v50 }
0x1684   : > { %v6708_v52 = vpop.eup %6707 }
0x1685   : > { %v3168_v53 = vadd.f32 1.0, %v6708_v52 }
0x1687   : > { %6709 = vrcp.f32 %v3168_v53 }
0x1691   : > { %v6710_v56 = vpop.eup %6709 }
0x1692   : > { %v3177_v59 = vmul.f32 0.0, %v6710_v56  ;;  %v3186_v1 = vrot.slane %v6710_v56, 1 }
0x16ea   : > { %v3173_v54 = vpop.permute.xlu1 %3172 }
0x16eb   : > { %v3174_v55 = vrot.slane %v3173_v54, 1 }
0x16ed   : > { %6711 = vtanh.f32 %v3174_v55 }
0x16f7   : > { %v6712_v57 = vpop.eup %6711 }
0x16f8   : > { %v3178_v58 = vmul.f32 %v6712_v57, %v6710_v56 }
0x16fa   : > { %3180 = vrot.lane.b32.xlu0 %v3178_v58, %s6966_s29 }
0x176c   : > { %v3181_v60 = vpop.permute.xlu0 %3180 }
0x176d   : > { %v3183_v61 = vadd.f32 %v3181_v60, %v3177_v59 }
0x176f   : > { %6713 = vtanh.f32 %v3183_v61 }
0x1779   : > { %v6714_v63 = vpop.eup %6713 }
0x177a   : > { %3189 = vrot.lane.b32.xlu1 %v6714_v63, %s6966_s29 }
0x17ec   : > { %v3190_v2 = vpop.permute.xlu1 %3189 }
0x17ed   : > { %v3192_v3 = vmul.f32 %v3190_v2, %v3186_v1 }
0x17ef   : > { %3193 = vst.msk [vmem:[#allocation6] sm:$0x1] %vm1575_vm4, %v3192_v3  ;;  %5769 = vmatmul.mubr.msk.f32.vlgmr.msra.gmra.mrb[28].mxu1 %vm1578_vm5, %v3192_v3 }
0x17f0   : > { %6219 = vmatpush1.bf16.msra.mxu1 %v7738_v62  ;;  %3514 = vmatprep.mubr.f32.mxu1 %v6961_v48 }
0x17f1   : > { %6221 = vmatprep.subr.bf16.mxu1 %v7740_v0 }
0x17f4   : > { %6223 = vmatpush1.bf16.msra.mxu1 %v7757_v5 }
0x17f5   : > { %6225 = vmatprep.subr.bf16.mxu1 %v7761_v6 }
0x17f8   : > { %6227 = vmatpush1.bf16.msra.mxu1 %v7779_v10 }
0x17f9   : > { %6229 = vmatprep.subr.bf16.mxu1 %v7782_v34 }
0x17fc   : > { %6231 = vmatpush1.bf16.msra.mxu1 %v7793_v40 }
0x17fd   : > { %6249 = vmatprep.subr.bf16.mxu1 %v7712_v36 }
0x18c2   : > { %v3266_v4 = vpop.f32.mrb[28].mxu1 }
0x18c3   : > { %v3268_v7 = vpop.f32.mrb[29].mxu1 }
0x18c4   : > { %v3273_v8 = vcombine.low %v3266_v4, %v3268_v7 }
0x18c6   : > { %v3280_v11 = vrot.slane %v3273_v8, %v7557_v39 }
0x18c8   : > { %v3287_v37 = vrot.slane %v3280_v11, %v7557_v39 }
0x18ca   : > { %v3289_v47 = vadd.f32 %v3287_v37, %v3196_v43  ;;  %v3446_v43 = vadd.f32 %v3445_v9, %v3444_v31  ;;  %v3695_v31 = vld [vmem:[#allocation5 + $0x12] ss:$8 sm:$0x3] }
0x18cc   : > { %3297 = vrot.lane.b32.xlu0 %v3289_v47, %s6966_s29  ;;  %v5770_v12 = vmul.f32 -1.442695, %v3289_v47 }
0x18ce   : > { %6715 = vpow2.f32 %v5770_v12 }
0x18d8   : > { %v6716_v51 = vpop.eup %6715 }
0x18d9   : > { %v3293_v14 = vadd.f32 1.0, %v6716_v51 }
0x18db   : > { %6717 = vrcp.f32 %v3293_v14 }
0x18e5   : > { %v6718_v18 = vpop.eup %6717 }
0x18e6   : > { %v3302_v21 = vmul.f32 %v6718_v18, %v3183_v61  ;;  %v3311_v26 = vrot.slane %v6718_v18, 1 }
0x193e   : > { %v3298_v16 = vpop.permute.xlu0 %3297 }
0x193f   : > { %v3299_v17 = vrot.slane %v3298_v16, 1 }
0x1941   : > { %6719 = vtanh.f32 %v3299_v17 }
0x194b   : > { %v6720_v19 = vpop.eup %6719 }
0x194c   : > { %v3303_v20 = vmul.f32 %v6720_v19, %v6718_v18 }
0x194e   : > { %3305 = vrot.lane.b32.xlu1 %v3303_v20, %s6966_s29 }
0x19c0   : > { %v3306_v28 = vpop.permute.xlu1 %3305 }
0x19c1   : > { %v3308_v23 = vadd.f32 %v3306_v28, %v3302_v21 }
0x19c3   : > { %6721 = vtanh.f32 %v3308_v23 }
0x19cd   : > { %v6722_v24 = vpop.eup %6721 }
0x19ce   : > { %3314 = vrot.lane.b32.xlu0 %v6722_v24, %s6966_s29 }
0x1a40   : > { %v3315_v27 = vpop.permute.xlu0 %3314 }
0x1a41   : > { %v3317_v30 = vmul.f32 %v3315_v27, %v3311_v26 }
0x1a43   : > { %3318 = vst.msk [vmem:[#allocation6 + $0x1] sm:$0x1] %vm1575_vm4, %v3317_v30  ;;  %5771 = vmatmul.mubr.msk.f32.vlgmr.msra.gmra.mrb[24].mxu0 %vm1578_vm5, %v3317_v30 }
0x1a44   : > { %6235 = vmatpush1.bf16.msra.mxu0 %v7738_v62  ;;  %3639 = vmatprep.mubr.f32.mxu0 %v6961_v48 }
0x1a45   : > { %6237 = vmatprep.subr.bf16.mxu0 %v7740_v0 }
0x1a48   : > { %6239 = vmatpush1.bf16.msra.mxu0 %v7757_v5 }
0x1a49   : > { %6241 = vmatprep.subr.bf16.mxu0 %v7761_v6 }
0x1a4c   : > { %6243 = vmatpush1.bf16.msra.mxu0 %v7779_v10 }
0x1a4d   : > { %6245 = vmatprep.subr.bf16.mxu0 %v7782_v34 }
0x1a50   : > { %6247 = vmatpush1.bf16.msra.mxu0 %v7793_v40 }
0x1a51   : > { %6265 = vmatprep.subr.bf16.mxu0 %v7712_v36 }
0x1b16   : > { %v3391_v32 = vpop.f32.mrb[24].mxu0 }
0x1b17   : > { %v3393_v33 = vpop.f32.mrb[25].mxu0 }
0x1b18   : > { %v3398_v35 = vcombine.low %v3391_v32, %v3393_v33 }
0x1b1a   : > { %v3405_v42 = vrot.slane %v3398_v35, %v7557_v39  ;;  %v3569_v35 = vld [vmem:[#allocation5 + $0x4] ss:$8 sm:$0x3] }
0x1b1c   : > { %v3412_v44 = vrot.slane %v3405_v42, %v7557_v39 }
0x1b1e   : > { %v3414_v49 = vadd.f32 %v3412_v44, %v3321_v46  ;;  %v3571_v44 = vadd.f32 %v3570_v38, %v3569_v35 }
0x1b20   : > { %3422 = vrot.lane.b32.xlu1 %v3414_v49, %s6966_s29  ;;  %v5772_v50 = vmul.f32 -1.442695, %v3414_v49 }
0x1b22   : > { %6723 = vpow2.f32 %v5772_v50 }
0x1b2c   : > { %v6724_v52 = vpop.eup %6723 }
0x1b2d   : > { %v3418_v53 = vadd.f32 1.0, %v6724_v52 }
0x1b2f   : > { %6725 = vrcp.f32 %v3418_v53 }
0x1b39   : > { %v6726_v56 = vpop.eup %6725 }
0x1b3a   : > { %v3427_v59 = vmul.f32 %v6726_v56, %v3308_v23  ;;  %v3436_v1 = vrot.slane %v6726_v56, 1 }
0x1b92   : > { %v3423_v54 = vpop.permute.xlu1 %3422 }
0x1b93   : > { %v3424_v55 = vrot.slane %v3423_v54, 1 }
0x1b95   : > { %6727 = vtanh.f32 %v3424_v55 }
0x1b9f   : > { %v6728_v57 = vpop.eup %6727 }
0x1ba0   : > { %v3428_v58 = vmul.f32 %v6728_v57, %v6726_v56 }
0x1ba2   : > { %3430 = vrot.lane.b32.xlu0 %v3428_v58, %s6966_s29 }
0x1c14   : > { %v3431_v60 = vpop.permute.xlu0 %3430 }
0x1c15   : > { %v3433_v61 = vadd.f32 %v3431_v60, %v3427_v59 }
0x1c17   : > { %6729 = vtanh.f32 %v3433_v61 }
0x1c21   : > { %v6730_v63 = vpop.eup %6729 }
0x1c22   : > { %3439 = vrot.lane.b32.xlu1 %v6730_v63, %s6966_s29 }
0x1c94   : > { %v3440_v2 = vpop.permute.xlu1 %3439 }
0x1c95   : > { %v3442_v3 = vmul.f32 %v3440_v2, %v3436_v1 }
0x1c97   : > { %3443 = vst.msk [vmem:[#allocation6 + $0x2] sm:$0x1] %vm1575_vm4, %v3442_v3  ;;  %5773 = vmatmul.mubr.msk.f32.vlgmr.msra.gmra.mrb[30].mxu1 %vm1578_vm5, %v3442_v3 }
0x1c98   : > { %6251 = vmatpush1.bf16.msra.mxu1 %v7738_v62  ;;  %3764 = vmatprep.mubr.f32.mxu1 %v6961_v48 }
0x1c99   : > { %6253 = vmatprep.subr.bf16.mxu1 %v7740_v0 }
0x1c9c   : > { %6255 = vmatpush1.bf16.msra.mxu1 %v7757_v5 }
0x1c9d   : > { %6257 = vmatprep.subr.bf16.mxu1 %v7761_v6 }
0x1ca0   : > { %6259 = vmatpush1.bf16.msra.mxu1 %v7779_v10 }
0x1ca1   : > { %6261 = vmatprep.subr.bf16.mxu1 %v7782_v34 }
0x1ca4   : > { %6263 = vmatpush1.bf16.msra.mxu1 %v7793_v40 }
0x1ca5   : > { %6281 = vmatprep.subr.bf16.mxu1 %v7712_v36 }
0x1d6a   : > { %v3516_v4 = vpop.f32.mrb[30].mxu1 }
0x1d6b   : > { %v3518_v7 = vpop.f32.mrb[31].mxu1 }
0x1d6c   : > { %v3523_v8 = vcombine.low %v3516_v4, %v3518_v7 }
0x1d6e   : > { %v3530_v11 = vrot.slane %v3523_v8, %v7557_v39  ;;  %v3694_v8 = vld [vmem:[#allocation5 + $0x5] ss:$8 sm:$0x3] }
0x1d70   : > { %v3537_v37 = vrot.slane %v3530_v11, %v7557_v39 }
0x1d72   : > { %v3539_v47 = vadd.f32 %v3537_v37, %v3446_v43 }
0x1d74   : > { %3547 = vrot.lane.b32.xlu0 %v3539_v47, %s6966_s29  ;;  %v5774_v12 = vmul.f32 -1.442695, %v3539_v47 }
0x1d76   : > { %6731 = vpow2.f32 %v5774_v12 }
0x1d80   : > { %v6732_v51 = vpop.eup %6731 }
0x1d81   : > { %v3543_v14 = vadd.f32 1.0, %v6732_v51 }
0x1d83   : > { %6733 = vrcp.f32 %v3543_v14 }
0x1d8d   : > { %v6734_v36 = vpop.eup %6733 }
0x1d8e   : > { %v3552_v20 = vmul.f32 %v6734_v36, %v3433_v61  ;;  %v3561_v24 = vrot.slane %v6734_v36, 1 }
0x1de6   : > { %v3548_v16 = vpop.permute.xlu0 %3547 }
0x1de7   : > { %v3549_v17 = vrot.slane %v3548_v16, 1 }
0x1de9   : > { %6735 = vtanh.f32 %v3549_v17 }
0x1df3   : > { %v6736_v18 = vpop.eup %6735 }
0x1df4   : > { %v3553_v19 = vmul.f32 %v6736_v18, %v6734_v36 }
0x1df6   : > { %3555 = vrot.lane.b32.xlu1 %v3553_v19, %s6966_s29 }
0x1e68   : > { %v3556_v21 = vpop.permute.xlu1 %3555 }
0x1e69   : > { %v3558_v28 = vadd.f32 %v3556_v21, %v3552_v20 }
0x1e6b   : > { %6737 = vtanh.f32 %v3558_v28 }
0x1e75   : > { %v6738_v23 = vpop.eup %6737 }
0x1e76   : > { %3564 = vrot.lane.b32.xlu0 %v6738_v23, %s6966_s29  ;;  %v3820_v23 = vld [vmem:[#allocation5 + $0x11] ss:$8 sm:$0x3] }
0x1ee8   : > { %v3565_v26 = vpop.permute.xlu0 %3564 }
0x1ee9   : > { %v3567_v27 = vmul.f32 %v3565_v26, %v3561_v24 }
0x1eeb   : > { %3568 = vst.msk [vmem:[#allocation6 + $0x3] sm:$0x1] %vm1575_vm4, %v3567_v27  ;;  %5775 = vmatmul.mubr.msk.f32.vlgmr.msra.gmra.mrb[26].mxu0 %vm1578_vm5, %v3567_v27 }
0x1eec   : > { %6267 = vmatpush1.bf16.msra.mxu0 %v7738_v62  ;;  %3889 = vmatprep.mubr.f32.mxu0 %v6961_v48 }
0x1eed   : > { %6269 = vmatprep.subr.bf16.mxu0 %v7740_v0 }
0x1ef0   : > { %6271 = vmatpush1.bf16.msra.mxu0 %v7757_v5 }
0x1ef1   : > { %6273 = vmatprep.subr.bf16.mxu0 %v7761_v6 }
0x1ef4   : > { %6275 = vmatpush1.bf16.msra.mxu0 %v7779_v10 }
0x1ef5   : > { %6277 = vmatprep.subr.bf16.mxu0 %v7782_v34 }
0x1ef8   : > { %6279 = vmatpush1.bf16.msra.mxu0 %v7793_v40 }
0x1fbe   : > { %v3641_v30 = vpop.f32.mrb[26].mxu0 }
0x1fbf   : > { %v3643_v32 = vpop.f32.mrb[27].mxu0 }
0x1fc0   : > { %v3648_v33 = vcombine.low %v3641_v30, %v3643_v32 }
0x1fc2   : > { %v3655_v41 = vrot.slane %v3648_v33, %v7557_v39 }
0x1fc4   : > { %v3662_v42 = vrot.slane %v3655_v41, %v7557_v39 }
0x1fc6   : > { %v3664_v46 = vadd.f32 %v3662_v42, %v3571_v44 }
0x1fc8   : > { %3672 = vrot.lane.b32.xlu1 %v3664_v46, %s6966_s29  ;;  %v5776_v49 = vmul.f32 -1.442695, %v3664_v46 }
0x1fca   : > { %6739 = vpow2.f32 %v5776_v49 }
0x1fd4   : > { %v6740_v50 = vpop.eup %6739 }
0x1fd5   : > { %v3668_v52 = vadd.f32 1.0, %v6740_v50 }
0x1fd7   : > { %6741 = vrcp.f32 %v3668_v52 }
0x1fe1   : > { %v6742_v55 = vpop.eup %6741 }
0x1fe2   : > { %v3677_v58 = vmul.f32 %v6742_v55, %v3558_v28  ;;  %v3686_v63 = vrot.slane %v6742_v55, 1  ;;  %v3819_v28 = vld [vmem:[#allocation5 + $0x6] ss:$8 sm:$0x3] }
0x1fe3   : > { %v3821_v27 = vadd.f32 %v3820_v23, %v3819_v28  ;;  %v5821_v28 = vld [vmem:[%s8332_s11 + $0x118] sm:$0xff]  ;;  %v6637_v23 = vld [vmem:[%s8330_s9 + $0x160] ss:$16 sps:$4 sm:$0xff]  }
0x203a   : > { %v3673_v53 = vpop.permute.xlu1 %3672 }
0x203b   : > { %v3674_v54 = vrot.slane %v3673_v53, 1 }
0x203d   : > { %6743 = vtanh.f32 %v3674_v54 }
0x2047   : > { %v6744_v56 = vpop.eup %6743 }
0x2048   : > { %v3678_v57 = vmul.f32 %v6744_v56, %v6742_v55 }
0x204a   : > { %3680 = vrot.lane.b32.xlu0 %v3678_v57, %s6966_s29 }
0x20bc   : > { %v3681_v59 = vpop.permute.xlu0 %3680 }
0x20bd   : > { %v3683_v60 = vadd.f32 %v3681_v59, %v3677_v58 }
0x20bf   : > { %6745 = vtanh.f32 %v3683_v60 }
0x20c9   : > { %v6746_v61 = vpop.eup %6745 }
0x20ca   : > { %3689 = vrot.lane.b32.xlu1 %v6746_v61, %s6966_s29  ;;  %v3945_v61 = vld [vmem:[#allocation5 + $0x10] ss:$8 sm:$0x3] }
0x213c   : > { %v3690_v1 = vpop.permute.xlu1 %3689 }
0x213d   : > { %v3692_v2 = vmul.f32 %v3690_v1, %v3686_v63 }
0x213f   : > { %3693 = vst.msk [vmem:[#allocation6 + $0x4] sm:$0x1] %vm1575_vm4, %v3692_v2  ;;  %5777 = vmatmul.mubr.msk.f32.vlgmr.msra.gmra.mrb[32].mxu1 %vm1578_vm5, %v3692_v2 }
0x2140   : > { %6283 = vmatpush1.bf16.msra.mxu1 %v7738_v62  ;;  %4014 = vmatprep.mubr.f32.mxu1 %v6961_v48 }
0x2141   : > { %6285 = vmatprep.subr.bf16.mxu1 %v7740_v0  ;;  %v3696_v0 = vadd.f32 %v3695_v31, %v3694_v8 }
0x2144   : > { %6287 = vmatpush1.bf16.msra.mxu1 %v7757_v5 }
0x2145   : > { %6289 = vmatprep.subr.bf16.mxu1 %v7761_v6 }
0x2148   : > { %6291 = vmatpush1.bf16.msra.mxu1 %v7779_v10 }
0x2149   : > { %6293 = vmatprep.subr.bf16.mxu1 %v7782_v34 }
0x214c   : > { %6295 = vmatpush1.bf16.msra.mxu1 %v7793_v40 }
0x2212   : > { %v3766_v3 = vpop.f32.mrb[32].mxu1 }
0x2213   : > { %v3768_v4 = vpop.f32.mrb[33].mxu1 }
0x2214   : > { %v3773_v7 = vcombine.low %v3766_v3, %v3768_v4 }
0x2216   : > { %v3780_v62 = vrot.slane %v3773_v7, %v7557_v39 }
0x2218   : > { %v3787_v9 = vrot.slane %v3780_v62, %v7557_v39 }
0x221a   : > { %v3789_v11 = vadd.f32 %v3787_v9, %v3696_v0 }
0x221c   : > { %3797 = vrot.lane.b32.xlu0 %v3789_v11, %s6966_s29  ;;  %v5778_v5 = vmul.f32 -1.442695, %v3789_v11 }
0x221e   : > { %6747 = vpow2.f32 %v5778_v5 }
0x2228   : > { %v6748_v6 = vpop.eup %6747 }
0x2229   : > { %v3793_v10 = vadd.f32 1.0, %v6748_v6 }
0x222b   : > { %6749 = vrcp.f32 %v3793_v10  ;;  %v6621_v10 = vld [vmem:[%s8330_s9 + $0x104] ss:$16 sps:$4 sm:$0xff]  }
0x222c   : > { %4212 = vmatprep.subr.bf16.mxu0 %v6621_v10 }
0x2235   : > { %v6750_v40 = vpop.eup %6749 }
0x2236   : > { %v3802_v12 = vmul.f32 %v6750_v40, %v3683_v60  ;;  %v3811_v17 = vrot.slane %v6750_v40, 1  ;;  %v3944_v60 = vld [vmem:[#allocation5 + $0x7] ss:$8 sm:$0x3] }
0x2237   : > { %v3946_v2 = vadd.f32 %v3945_v61, %v3944_v60  ;;  %v5822_v60 = vld [vmem:[%s8332_s11 + $0x120] sm:$0xff]  ;;  %v5824_v61 = vld [vmem:[%s8332_s11 + $0x130] sm:$0xff] }
0x228e   : > { %v3798_v34 = vpop.permute.xlu0 %3797 }
0x228f   : > { %v3799_v37 = vrot.slane %v3798_v34, 1  ;;  %v6619_v34 = vld [vmem:[%s8330_s9 + $0x100] ss:$16 sps:$4 sm:$0xff]  }
0x2291   : > { %6751 = vtanh.f32 %v3799_v37  ;;  %v6624_v37 = vld [vmem:[%s8330_s9 + $0x10c] ss:$16 sps:$4 sm:$0xff]  }
0x2292   : > { %4253 = vmatprep.subr.bf16.mxu1 %v6624_v37 }
0x229b   : > { %v6752_v43 = vpop.eup %6751 }
0x229c   : > { %v3803_v47 = vmul.f32 %v6752_v43, %v6750_v40  ;;  %v6622_v40 = vld [vmem:[%s8330_s9 + $0x108] ss:$16 sps:$4 sm:$0xff]   ;;  %v6627_v43 = vld [vmem:[%s8330_s9 + $0x124] ss:$16 sps:$4 sm:$0xff]  }
0x229e   : > { %3805 = vrot.lane.b32.xlu1 %v3803_v47, %s6966_s29 }
0x2310   : > { %v3806_v51 = vpop.permute.xlu1 %3805 }
0x2311   : > { %v3808_v14 = vadd.f32 %v3806_v51, %v3802_v12  ;;  %v6625_v12 = vld [vmem:[%s8330_s9 + $0x120] ss:$16 sps:$4 sm:$0xff]   ;;  %v6630_v51 = vld [vmem:[%s8330_s9 + $0x12c] ss:$16 sps:$4 sm:$0xff]  }
0x2313   : > { %6753 = vtanh.f32 %v3808_v14 }
0x231d   : > { %v6754_v16 = vpop.eup %6753 }
0x231e   : > { %3814 = vrot.lane.b32.xlu0 %v6754_v16, %s6966_s29  ;;  %v6633_v16 = vld [vmem:[%s8330_s9 + $0x144] ss:$16 sps:$4 sm:$0xff]  }
0x2390   : > { %v3815_v36 = vpop.permute.xlu0 %3814 }
0x2391   : > { %v3817_v18 = vmul.f32 %v3815_v36, %v3811_v17  ;;  %v6636_v17 = vld [vmem:[%s8330_s9 + $0x14c] ss:$16 sps:$4 sm:$0xff]   ;;  %v6631_v36 = vld [vmem:[%s8330_s9 + $0x140] ss:$16 sps:$4 sm:$0xff]  }
0x2393   : > { %3818 = vst.msk [vmem:[#allocation6 + $0x5] sm:$0x1] %vm1575_vm4, %v3817_v18  ;;  %5779 = vmatmul.mubr.msk.f32.vlgmr.msra.gmra.mrb[28].mxu0 %vm1578_vm5, %v3817_v18  ;;  %v6634_v18 = vld [vmem:[%s8330_s9 + $0x148] ss:$16 sps:$4 sm:$0xff]  }
0x2394   : > { %4244 = vmatprep.mubr.bf16.mxu0 %v6964_v22  ;;  %4213 = vmatpush1.bf16.msra.mxu0 %v6619_v34 }
0x2395   : > { %4214 = vmatprep.subr.bf16.mxu0 %v6627_v43 }
0x2398   : > { %4215 = vmatpush1.bf16.msra.mxu0 %v6625_v12 }
0x2399   : > { %4216 = vmatprep.subr.bf16.mxu0 %v6633_v16 }
0x239c   : > { %4217 = vmatpush1.bf16.msra.mxu0 %v6631_v36 }
0x2466   : > { %v3891_v19 = vpop.f32.mrb[28].mxu0 }
0x2467   : > { %v3893_v20 = vpop.f32.mrb[29].mxu0 }
0x2468   : > { %v3898_v21 = vcombine.low %v3891_v19, %v3893_v20  ;;  %v6639_v19 = vld [vmem:[%s8330_s9 + $0x164] ss:$16 sps:$4 sm:$0xff]   ;;  %v6642_v20 = vld [vmem:[%s8330_s9 + $0x16c] ss:$16 sps:$4 sm:$0xff]  }
0x2469   : > { %4218 = vmatprep.subr.bf16.mxu0 %v6639_v19 }
0x246a   : > { %v3905_v24 = vrot.slane %v3898_v21, %v7557_v39  ;;  %v5819_v21 = vld [vmem:[%s8332_s11 + $0x108] sm:$0xff]  ;;  %4219 = vmatpush1.bf16.msra.mxu0 %v6637_v23 }
0x246c   : > { %v3912_v26 = vrot.slane %v3905_v24, %v7557_v39  ;;  %v6640_v24 = vld [vmem:[%s8330_s9 + $0x168] ss:$16 sps:$4 sm:$0xff]  }
0x246e   : > { %v3914_v30 = vadd.f32 %v3912_v26, %v3821_v27  ;;  %v7972_v26 = vpack.c.bf16 %v5821_v28, %v5819_v21 }
0x2470   : > { %3922 = vrot.lane.b32.xlu1 %v3914_v30, %s6966_s29  ;;  %v5780_v32 = vmul.f32 -1.442695, %v3914_v30  ;;  %6297 = vmatprep.subr.bf16.mxu0 %v7972_v26 }
0x2472   : > { %6755 = vpow2.f32 %v5780_v32 }
0x247c   : > { %v6756_v33 = vpop.eup %6755 }
0x247d   : > { %v3918_v35 = vadd.f32 1.0, %v6756_v33  ;;  %v4071_v33 = vld [vmem:[#allocation6] sm:$0x1] }
0x247f   : > { %6757 = vrcp.f32 %v3918_v35  ;;  %v4073_v35 = vld [vmem:[#allocation6 + $0x1] sm:$0x1] }
0x2489   : > { %v6758_v42 = vpop.eup %6757 }
0x248a   : > { %v3927_v49 = vmul.f32 %v6758_v42, %v3808_v14  ;;  %v3936_v54 = vrot.slane %v6758_v42, 1  ;;  %v6628_v14 = vld [vmem:[%s8330_s9 + $0x128] ss:$16 sps:$4 sm:$0xff]  }
0x24e2   : > { %v3923_v38 = vpop.permute.xlu1 %3922 }
0x24e3   : > { %v3924_v41 = vrot.slane %v3923_v38, 1  ;;  %v4075_v38 = vld [vmem:[#allocation6 + $0x2] sm:$0x1] }
0x24e5   : > { %6759 = vtanh.f32 %v3924_v41  ;;  %v4077_v41 = vld [vmem:[#allocation6 + $0x3] sm:$0x1] }
0x24ef   : > { %v6760_v44 = vpop.eup %6759 }
0x24f0   : > { %v3928_v46 = vmul.f32 %v6760_v44, %v6758_v42 }
0x24f2   : > { %3930 = vrot.lane.b32.xlu0 %v3928_v46, %s6966_s29  ;;  %v4079_v46 = vld [vmem:[#allocation6 + $0x4] sm:$0x1] }
0x2564   : > { %v3931_v50 = vpop.permute.xlu0 %3930 }
0x2565   : > { %v3933_v52 = vadd.f32 %v3931_v50, %v3927_v49  ;;  %v4081_v49 = vld [vmem:[#allocation6 + $0x5] sm:$0x1] }
0x2567   : > { %6761 = vtanh.f32 %v3933_v52 }
0x2571   : > { %v6762_v53 = vpop.eup %6761 }
0x2572   : > { %3939 = vrot.lane.b32.xlu1 %v6762_v53, %s6966_s29  ;;  %v5820_v53 = vld [vmem:[%s8332_s11 + $0x110] sm:$0xff] }
0x25e4   : > { %v3940_v55 = vpop.permute.xlu1 %3939 }
0x25e5   : > { %v3942_v56 = vmul.f32 %v3940_v55, %v3936_v54  ;;  %v5823_v54 = vld [vmem:[%s8332_s11 + $0x128] sm:$0xff]  ;;  %v5825_v55 = vld [vmem:[%s8332_s11 + $0x138] sm:$0xff] }
0x25e7   : > { %3943 = vst.msk [vmem:[#allocation6 + $0x6] sm:$0x1] %vm1575_vm4, %v3942_v56  ;;  %5781 = vmatmul.mubr.msk.f32.vlgmr.msra.gmra.mrb[34].mxu1 %vm1578_vm5, %v3942_v56 }
0x25e8   : > { %4285 = vmatprep.mubr.bf16.mxu1 %v6964_v22  ;;  %4254 = vmatpush1.bf16.msra.mxu1 %v6622_v40 }
0x25e9   : > { %4255 = vmatprep.subr.bf16.mxu1 %v6630_v51 }
0x25ec   : > { %4256 = vmatpush1.bf16.msra.mxu1 %v6628_v14 }
0x25ed   : > { %4257 = vmatprep.subr.bf16.mxu1 %v6636_v17 }
0x25ee   : > { %v4083_v50 = vld [vmem:[#allocation6 + $0x6] sm:$0x1] }
0x25f0   : > { %4258 = vmatpush1.bf16.msra.mxu1 %v6634_v18 }
0x25f1   : > { %4259 = vmatprep.subr.bf16.mxu1 %v6642_v20 }
0x25f4   : > { %4260 = vmatpush1.bf16.msra.mxu1 %v6640_v24 }
0x25f5   : > { %6313 = vmatprep.subr.bf16.mxu1 %v7972_v26 }
0x26ba   : > { %v4016_v57 = vpop.f32.mrb[34].mxu1 }
0x26bb   : > { %v4018_v58 = vpop.f32.mrb[35].mxu1 }
0x26bc   : > { %v4023_v59 = vcombine.low %v4016_v57, %v4018_v58 }
0x26be   : > { %v4030_v63 = vrot.slane %v4023_v59, %v7557_v39  ;;  %v8000_v59 = vpack.c.bf16 %v5825_v55, %v5823_v54 }
0x26c0   : > { %v4037_v1 = vrot.slane %v4030_v63, %v7557_v39  ;;  %v5827_v63 = vld [vmem:[%s8332_s11 + $0x148] sm:$0xff] }
0x26c2   : > { %v4039_v3 = vadd.f32 %v4037_v1, %v3946_v2  ;;  %v5829_v1 = vld [vmem:[%s8332_s11 + $0x158] sm:$0xff]  ;;  %v8017_v2 = vpack.c.bf16 %v5824_v61, %v5822_v60 }
0x26c4   : > { %4047 = vrot.lane.b32.xlu0 %v4039_v3, %s6966_s29  ;;  %v5782_v4 = vmul.f32 -1.442695, %v4039_v3  ;;  %v8021_v3 = vpack.c.bf16 %v5829_v1, %v5827_v63 }
0x26c6   : > { %6763 = vpow2.f32 %v5782_v4  ;;  %v5826_v4 = vld [vmem:[%s8332_s11 + $0x140] sm:$0xff] }
0x26d0   : > { %v6764_v7 = vpop.eup %6763 }
0x26d1   : > { %v4043_v8 = vadd.f32 1.0, %v6764_v7  ;;  %v5828_v7 = vld [vmem:[%s8332_s11 + $0x150] sm:$0xff] }
0x26d3   : > { %6765 = vrcp.f32 %v4043_v8  ;;  %v5831_v8 = vld [vmem:[%s8332_s11 + $0x168] sm:$0xff] }
0x26dd   : > { %v6766_v22 = vpop.eup %6765 }
0x26de   : > { %v4052_v11 = vmul.f32 %v6766_v22, %v3933_v52  ;;  %v4061_v27 = vrot.slane %v6766_v22, 1  ;;  %v5818_v52 = vld [vmem:[%s8332_s11 + $0x100] sm:$0xff] }
0x26df   : > { %v7998_v57 = vpack.c.bf16 %v5820_v53, %v5818_v52 }
0x2736   : > { %v4048_v31 = vpop.permute.xlu0 %4047 }
0x2737   : > { %v4049_v62 = vrot.slane %v4048_v31, 1  ;;  %v5833_v31 = vld [vmem:[%s8332_s11 + $0x178] sm:$0xff] }
0x2739   : > { %6767 = vtanh.f32 %v4049_v62  ;;  %v8039_v62 = vpack.c.bf16 %v5828_v7, %v5826_v4 }
0x2743   : > { %v6768_v9 = vpop.eup %6767 }
0x2744   : > { %v4053_v0 = vmul.f32 %v6768_v9, %v6766_v22  ;;  %v8042_v22 = vpack.c.bf16 %v5833_v31, %v5831_v8  ;;  %v5830_v9 = vld [vmem:[%s8332_s11 + $0x160] sm:$0xff] }
0x2746   : > { %4055 = vrot.lane.b32.xlu1 %v4053_v0, %s6966_s29  ;;  %v5832_v0 = vld [vmem:[%s8332_s11 + $0x170] sm:$0xff] }
0x27b8   : > { %v4056_v5 = vpop.permute.xlu1 %4055 }
0x27b9   : > { %v4058_v6 = vadd.f32 %v4056_v5, %v4052_v11  ;;  %v8053_v11 = vpack.c.bf16 %v5832_v0, %v5830_v9  ;;  %v5799_v5 = vld [vmem:[%s8331_s10 + $0x8] sm:$0xf] }
0x27ba   : > { %v4120_v10 = vrot.slane %v5799_v5, %v7551_v25  ;;  %v4116_v34 = vrot.slane %v5799_v5, %v7547_v15  ;;  %v4124_v37 = vrot.slane %v5799_v5, %v7553_v29 }
0x27bb   : > { %6769 = vtanh.f32 %v4058_v6  ;;  %v4112_v6 = vrot.slane %v5799_v5, %v7542_v13 }
0x27c5   : > { %v6770_v47 = vpop.eup %6769 }
0x27c6   : > { %4064 = vrot.lane.b32.xlu0 %v6770_v47, %s6966_s29 }
0x2838   : > { %v4065_v30 = vpop.permute.xlu0 %4064 }
0x2839   : > { %v4067_v32 = vmul.f32 %v4065_v30, %v4061_v27 }
0x283b   : > { %4068 = vst.msk [vmem:[#allocation6 + $0x7] sm:$0x1] %vm1575_vm4, %v4067_v32 }
0x2842   : > { %v4069_v42 = vld [vmem:[#allocation6] sm:$0xff] }
0x2843   : > { %v4085_v44 = vld [vmem:[#allocation6 + $0x7] sm:$0x1]  ;;  %4070 = vst.msk [vmem:[#allocation4] sm:$0xff] %vm1319_vm3, %v4069_v42 }
0x2844   : > { %4072 = vst.msk [vmem:[#allocation4 + $0x7] sm:$0x1] %vm2828_vm6, %v4071_v33  ;;  %4074 = vst.msk [vmem:[#allocation4 + $0x6] sm:$0x1] %vm2828_vm6, %v4073_v35 }
0x2845   : > { %4076 = vst.msk [vmem:[#allocation4 + $0x5] sm:$0x1] %vm2828_vm6, %v4075_v38  ;;  %4078 = vst.msk [vmem:[#allocation4 + $0x4] sm:$0x1] %vm2828_vm6, %v4077_v41 }
0x2846   : > { %4080 = vst.msk [vmem:[#allocation4 + $0x3] sm:$0x1] %vm2828_vm6, %v4079_v46  ;;  %4082 = vst.msk [vmem:[#allocation4 + $0x2] sm:$0x1] %vm2828_vm6, %v4081_v49 }
0x2847   : > { %4084 = vst.msk [vmem:[#allocation4 + $0x1] sm:$0x1] %vm2828_vm6, %v4083_v50  ;;  %4086 = vst.msk [vmem:[#allocation4] sm:$0x1] %vm2828_vm6, %v4085_v44 }
0x284e   : > { %v4087_v56 = vld [vmem:[#allocation4] sm:$0xff] }
0x284f   : > { %v4088_v58 = vpack.c.bf16 %v4087_v56, %v4087_v56 }
0x2851   : > { %5816 = vmatmul.mubr.msk.bf16.vlgmr.msra.gmra.mrb[32].mxu0 %vm1578_vm5, %v4088_v58  ;;  %5817 = vmatmul.mubr.msk.bf16.vlgmr.msra.gmra.mrb[36].mxu1 %vm1578_vm5, %v4088_v58 }
0x2852   : > { %6299 = vmatpush1.bf16.msra.mxu0 %v7998_v57  ;;  %4382 = vmatprep.mubr.f32.mxu0 %v6961_v48 }
0x2853   : > { %6301 = vmatprep.subr.bf16.mxu0 %v8000_v59  ;;  %6315 = vmatpush1.bf16.msra.mxu1 %v7998_v57 }
0x2854   : > { %6317 = vmatprep.subr.bf16.mxu1 %v8000_v59  ;;  %4507 = vmatprep.mubr.f32.mxu1 %v6961_v48 }
0x2856   : > { %6303 = vmatpush1.bf16.msra.mxu0 %v8017_v2 }
0x2857   : > { %6305 = vmatprep.subr.bf16.mxu0 %v8021_v3  ;;  %6319 = vmatpush1.bf16.msra.mxu1 %v8017_v2 }
0x2858   : > { %6321 = vmatprep.subr.bf16.mxu1 %v8021_v3 }
0x285a   : > { %6307 = vmatpush1.bf16.msra.mxu0 %v8039_v62 }
0x285b   : > { %6309 = vmatprep.subr.bf16.mxu0 %v8042_v22  ;;  %6323 = vmatpush1.bf16.msra.mxu1 %v8039_v62 }
0x285c   : > { %6325 = vmatprep.subr.bf16.mxu1 %v8042_v22 }
0x285e   : > { %6311 = vmatpush1.bf16.msra.mxu0 %v8053_v11 }
0x285f   : > { %6327 = vmatpush1.bf16.msra.mxu1 %v8053_v11  ;;  %6329 = vmatprep.subr.bf16.mxu0 %v7972_v26 }
0x2860   : > { %6345 = vmatprep.subr.bf16.mxu1 %v7972_v26 }
0x2861   : > { %4383 = vmatmul.mubr.f32.vlgmr.msra.gmra.mrb[30].mxu0 %v6961_v48 }
0x2862   : > { %6331 = vmatpush1.bf16.msra.mxu0 %v7998_v57  ;;  %4632 = vmatprep.mubr.f32.mxu0 %v6961_v48 }
0x2863   : > { %6333 = vmatprep.subr.bf16.mxu0 %v8000_v59 }
0x2866   : > { %6335 = vmatpush1.bf16.msra.mxu0 %v8017_v2 }
0x2867   : > { %6337 = vmatprep.subr.bf16.mxu0 %v8021_v3 }
0x286a   : > { %6339 = vmatpush1.bf16.msra.mxu0 %v8039_v62 }
0x286b   : > { %6341 = vmatprep.subr.bf16.mxu0 %v8042_v22 }
0x286e   : > { %6343 = vmatpush1.bf16.msra.mxu0 %v8053_v11 }
0x286f   : > { %6361 = vmatprep.subr.bf16.mxu0 %v7972_v26 }
0x2924   : > { %v4246_v40 = vpop.f32.mrb[32].mxu0  ;;  %v4287_v43 = vpop.f32.mrb[36].mxu1 }
0x2925   : > { %v4247_v47 = vadd.f32 %v4246_v40, %v4112_v6  ;;  %v4288_v12 = vadd.f32 %v4287_v43, %v4120_v10  ;;  %v4248_v51 = vpop.f32.mrb[33].mxu0  ;;  %v4289_v14 = vpop.f32.mrb[37].mxu1 }
0x2926   : > { %v4249_v16 = vadd.f32 %v4248_v51, %v4116_v34  ;;  %v4290_v17 = vadd.f32 %v4289_v14, %v4124_v37  ;;  %v4250_v36 = vpop.f32.mrb[34].mxu0  ;;  %v4291_v18 = vpop.f32.mrb[38].mxu1 }
0x2927   : > { %4294 = vst [vmem:[#allocation5] sm:$0xff] %v4247_v47  ;;  %4296 = vst [vmem:[#allocation5 + $0x10] sm:$0xff] %v4288_v12  ;;  %v4251_v19 = vpop.f32.mrb[35].mxu0  ;;  %v4292_v13 = vpop.f32.mrb[39].mxu1 }
0x2928   : > { %4295 = vst [vmem:[#allocation5 + $0x8] sm:$0xff] %v4249_v16  ;;  %4297 = vst [vmem:[#allocation5 + $0x18] sm:$0xff] %v4290_v17 }
0x292f   : > { %v4315_v29 = vld [vmem:[#allocation5] ss:$8 sm:$0x3]  ;;  %v4316_v21 = vld [vmem:[#allocation5 + $0x17] ss:$8 sm:$0x3] }
0x2930   : > { %v4317_v24 = vadd.f32 %v4316_v21, %v4315_v29  ;;  %v4437_v61 = vld [vmem:[#allocation5 + $0x1] ss:$8 sm:$0x3]  ;;  %v4438_v63 = vld [vmem:[#allocation5 + $0x16] ss:$8 sm:$0x3] }
0x2931   : > { %v4439_v7 = vadd.f32 %v4438_v63, %v4437_v61  ;;  %v4562_v19 = vld [vmem:[#allocation5 + $0x2] ss:$8 sm:$0x3]  ;;  %v4563_v13 = vld [vmem:[#allocation5 + $0x15] ss:$8 sm:$0x3] }
0x2934   : > { %v4384_v25 = vpop.f32.mrb[30].mxu0 }
0x2935   : > { %v4386_v15 = vpop.f32.mrb[31].mxu0 }
0x2936   : > { %v4391_v20 = vcombine.low %v4384_v25, %v4386_v15 }
0x2938   : > { %v4398_v28 = vrot.slane %v4391_v20, %v7557_v39  ;;  %v4564_v20 = vadd.f32 %v4563_v13, %v4562_v19 }
0x293a   : > { %v4405_v23 = vrot.slane %v4398_v28, %v7557_v39 }
0x293c   : > { %v4407_v27 = vadd.f32 %v4405_v23, %v4317_v24 }
0x293e   : > { %4415 = vrot.lane.b32.xlu1 %v4407_v27, %s6966_s29  ;;  %v5834_v30 = vmul.f32 -1.442695, %v4407_v27 }
0x2940   : > { %6771 = vpow2.f32 %v5834_v30 }
0x294a   : > { %v6772_v32 = vpop.eup %6771 }
0x294b   : > { %v4411_v33 = vadd.f32 1.0, %v6772_v32 }
0x294d   : > { %6773 = vrcp.f32 %v4411_v33 }
0x2957   : > { %v6774_v41 = vpop.eup %6773 }
0x2958   : > { %v4420_v46 = vmul.f32 0.0, %v6774_v41  ;;  %v4429_v53 = vrot.slane %v6774_v41, 1 }
0x29b0   : > { %v4416_v35 = vpop.permute.xlu1 %4415 }
0x29b1   : > { %v4417_v38 = vrot.slane %v4416_v35, 1 }
0x29b3   : > { %6775 = vtanh.f32 %v4417_v38 }
0x29bd   : > { %v6776_v42 = vpop.eup %6775 }
0x29be   : > { %v4421_v44 = vmul.f32 %v6776_v42, %v6774_v41 }
0x29c0   : > { %4423 = vrot.lane.b32.xlu0 %v4421_v44, %s6966_s29 }
0x2a32   : > { %v4424_v49 = vpop.permute.xlu0 %4423 }
0x2a33   : > { %v4426_v50 = vadd.f32 %v4424_v49, %v4420_v46 }
0x2a35   : > { %6777 = vtanh.f32 %v4426_v50 }
0x2a3f   : > { %v6778_v52 = vpop.eup %6777 }
0x2a40   : > { %4432 = vrot.lane.b32.xlu1 %v6778_v52, %s6966_s29 }
0x2ab2   : > { %v4433_v54 = vpop.permute.xlu1 %4432 }
0x2ab3   : > { %v4435_v55 = vmul.f32 %v4433_v54, %v4429_v53  ;;  %v4687_v54 = vld [vmem:[#allocation5 + $0x3] ss:$8 sm:$0x3] }
0x2ab5   : > { %4436 = vst.msk [vmem:[#allocation6] sm:$0x1] %vm1575_vm4, %v4435_v55  ;;  %5835 = vmatmul.mubr.msk.f32.vlgmr.msra.gmra.mrb[40].mxu1 %vm1578_vm5, %v4435_v55  ;;  %v4688_v55 = vld [vmem:[#allocation5 + $0x14] ss:$8 sm:$0x3] }
0x2ab6   : > { %6347 = vmatpush1.bf16.msra.mxu1 %v7998_v57  ;;  %4757 = vmatprep.mubr.f32.mxu1 %v6961_v48 }
0x2ab7   : > { %6349 = vmatprep.subr.bf16.mxu1 %v8000_v59 }
0x2aba   : > { %6351 = vmatpush1.bf16.msra.mxu1 %v8017_v2 }
0x2abb   : > { %6353 = vmatprep.subr.bf16.mxu1 %v8021_v3 }
0x2abe   : > { %6355 = vmatpush1.bf16.msra.mxu1 %v8039_v62 }
0x2abf   : > { %6357 = vmatprep.subr.bf16.mxu1 %v8042_v22 }
0x2ac2   : > { %6359 = vmatpush1.bf16.msra.mxu1 %v8053_v11 }
0x2ac3   : > { %6377 = vmatprep.subr.bf16.mxu1 %v7972_v26 }
0x2b88   : > { %v4509_v56 = vpop.f32.mrb[40].mxu1 }
0x2b89   : > { %v4511_v58 = vpop.f32.mrb[41].mxu1 }
0x2b8a   : > { %v4516_v60 = vcombine.low %v4509_v56, %v4511_v58 }
0x2b8c   : > { %v4523_v1 = vrot.slane %v4516_v60, %v7557_v39  ;;  %v4689_v60 = vadd.f32 %v4688_v55, %v4687_v54 }
0x2b8e   : > { %v4530_v4 = vrot.slane %v4523_v1, %v7557_v39 }
0x2b90   : > { %v4532_v8 = vadd.f32 %v4530_v4, %v4439_v7 }
0x2b92   : > { %4540 = vrot.lane.b32.xlu0 %v4532_v8, %s6966_s29  ;;  %v5836_v31 = vmul.f32 -1.442695, %v4532_v8 }
0x2b94   : > { %6779 = vpow2.f32 %v5836_v31 }
0x2b9e   : > { %v6780_v9 = vpop.eup %6779 }
0x2b9f   : > { %v4536_v0 = vadd.f32 1.0, %v6780_v9 }
0x2ba1   : > { %6781 = vrcp.f32 %v4536_v0 }
0x2bab   : > { %v6782_v10 = vpop.eup %6781 }
0x2bac   : > { %v4545_v40 = vmul.f32 %v6782_v10, %v4426_v50  ;;  %v4554_v51 = vrot.slane %v6782_v10, 1 }
0x2c04   : > { %v4541_v5 = vpop.permute.xlu0 %4540 }
0x2c05   : > { %v4542_v6 = vrot.slane %v4541_v5, 1 }
0x2c07   : > { %6783 = vtanh.f32 %v4542_v6 }
0x2c11   : > { %v6784_v34 = vpop.eup %6783 }
0x2c12   : > { %v4546_v37 = vmul.f32 %v6784_v34, %v6782_v10 }
0x2c14   : > { %4548 = vrot.lane.b32.xlu1 %v4546_v37, %s6966_s29 }
0x2c86   : > { %v4549_v43 = vpop.permute.xlu1 %4548 }
0x2c87   : > { %v4551_v47 = vadd.f32 %v4549_v43, %v4545_v40 }
0x2c89   : > { %6785 = vtanh.f32 %v4551_v47 }
0x2c93   : > { %v6786_v12 = vpop.eup %6785 }
0x2c94   : > { %4557 = vrot.lane.b32.xlu0 %v6786_v12, %s6966_s29 }
0x2d06   : > { %v4558_v14 = vpop.permute.xlu0 %4557 }
0x2d07   : > { %v4560_v16 = vmul.f32 %v4558_v14, %v4554_v51  ;;  %v4812_v51 = vld [vmem:[#allocation5 + $0x4] ss:$8 sm:$0x3]  ;;  %v4813_v14 = vld [vmem:[#allocation5 + $0x13] ss:$8 sm:$0x3] }
0x2d09   : > { %4561 = vst.msk [vmem:[#allocation6 + $0x1] sm:$0x1] %vm1575_vm4, %v4560_v16  ;;  %5837 = vmatmul.mubr.msk.f32.vlgmr.msra.gmra.mrb[36].mxu0 %vm1578_vm5, %v4560_v16 }
0x2d0a   : > { %6363 = vmatpush1.bf16.msra.mxu0 %v7998_v57  ;;  %4882 = vmatprep.mubr.f32.mxu0 %v6961_v48 }
0x2d0b   : > { %6365 = vmatprep.subr.bf16.mxu0 %v8000_v59 }
0x2d0e   : > { %6367 = vmatpush1.bf16.msra.mxu0 %v8017_v2 }
0x2d0f   : > { %6369 = vmatprep.subr.bf16.mxu0 %v8021_v3 }
0x2d12   : > { %6371 = vmatpush1.bf16.msra.mxu0 %v8039_v62 }
0x2d13   : > { %6373 = vmatprep.subr.bf16.mxu0 %v8042_v22 }
0x2d16   : > { %6375 = vmatpush1.bf16.msra.mxu0 %v8053_v11 }
0x2d17   : > { %6393 = vmatprep.subr.bf16.mxu0 %v7972_v26 }
0x2ddc   : > { %v4634_v17 = vpop.f32.mrb[36].mxu0 }
0x2ddd   : > { %v4636_v36 = vpop.f32.mrb[37].mxu0 }
0x2dde   : > { %v4641_v18 = vcombine.low %v4634_v17, %v4636_v36  ;;  %v4814_v36 = vadd.f32 %v4813_v14, %v4812_v51 }
0x2de0   : > { %v4648_v25 = vrot.slane %v4641_v18, %v7557_v39 }
0x2de2   : > { %v4655_v15 = vrot.slane %v4648_v25, %v7557_v39 }
0x2de4   : > { %v4657_v29 = vadd.f32 %v4655_v15, %v4564_v20 }
0x2de6   : > { %4665 = vrot.lane.b32.xlu1 %v4657_v29, %s6966_s29  ;;  %v5838_v21 = vmul.f32 -1.442695, %v4657_v29 }
0x2de8   : > { %6787 = vpow2.f32 %v5838_v21 }
0x2df2   : > { %v6788_v28 = vpop.eup %6787 }
0x2df3   : > { %v4661_v23 = vadd.f32 1.0, %v6788_v28 }
0x2df5   : > { %6789 = vrcp.f32 %v4661_v23 }
0x2dff   : > { %v6790_v30 = vpop.eup %6789 }
0x2e00   : > { %v4670_v35 = vmul.f32 %v6790_v30, %v4551_v47  ;;  %v4679_v44 = vrot.slane %v6790_v30, 1 }
0x2e58   : > { %v4666_v24 = vpop.permute.xlu1 %4665 }
0x2e59   : > { %v4667_v27 = vrot.slane %v4666_v24, 1 }
0x2e5b   : > { %6791 = vtanh.f32 %v4667_v27 }
0x2e65   : > { %v6792_v32 = vpop.eup %6791 }
0x2e66   : > { %v4671_v33 = vmul.f32 %v6792_v32, %v6790_v30 }
0x2e68   : > { %4673 = vrot.lane.b32.xlu0 %v4671_v33, %s6966_s29 }
0x2eda   : > { %v4674_v38 = vpop.permute.xlu0 %4673 }
0x2edb   : > { %v4676_v41 = vadd.f32 %v4674_v38, %v4670_v35 }
0x2edd   : > { %6793 = vtanh.f32 %v4676_v41 }
0x2ee7   : > { %v6794_v42 = vpop.eup %6793 }
0x2ee8   : > { %4682 = vrot.lane.b32.xlu1 %v6794_v42, %s6966_s29 }
0x2f5a   : > { %v4683_v46 = vpop.permute.xlu1 %4682 }
0x2f5b   : > { %v4685_v49 = vmul.f32 %v4683_v46, %v4679_v44  ;;  %v4937_v44 = vld [vmem:[#allocation5 + $0x5] ss:$8 sm:$0x3]  ;;  %v4938_v46 = vld [vmem:[#allocation5 + $0x12] ss:$8 sm:$0x3] }
0x2f5d   : > { %4686 = vst.msk [vmem:[#allocation6 + $0x2] sm:$0x1] %vm1575_vm4, %v4685_v49  ;;  %5839 = vmatmul.mubr.msk.f32.vlgmr.msra.gmra.mrb[42].mxu1 %vm1578_vm5, %v4685_v49 }
0x2f5e   : > { %6379 = vmatpush1.bf16.msra.mxu1 %v7998_v57  ;;  %5007 = vmatprep.mubr.f32.mxu1 %v6961_v48 }
0x2f5f   : > { %6381 = vmatprep.subr.bf16.mxu1 %v8000_v59 }
0x2f62   : > { %6383 = vmatpush1.bf16.msra.mxu1 %v8017_v2 }
0x2f63   : > { %6385 = vmatprep.subr.bf16.mxu1 %v8021_v3 }
0x2f66   : > { %6387 = vmatpush1.bf16.msra.mxu1 %v8039_v62 }
0x2f67   : > { %6389 = vmatprep.subr.bf16.mxu1 %v8042_v22 }
0x2f6a   : > { %6391 = vmatpush1.bf16.msra.mxu1 %v8053_v11 }
0x2f6b   : > { %6409 = vmatprep.subr.bf16.mxu1 %v7972_v26 }
0x3030   : > { %v4759_v50 = vpop.f32.mrb[42].mxu1 }
0x3031   : > { %v4761_v52 = vpop.f32.mrb[43].mxu1 }
0x3032   : > { %v4766_v53 = vcombine.low %v4759_v50, %v4761_v52 }
0x3034   : > { %v4773_v56 = vrot.slane %v4766_v53, %v7557_v39 }
0x3036   : > { %v4780_v58 = vrot.slane %v4773_v56, %v7557_v39 }
0x3038   : > { %v4782_v61 = vadd.f32 %v4780_v58, %v4689_v60 }
0x303a   : > { %4790 = vrot.lane.b32.xlu0 %v4782_v61, %s6966_s29  ;;  %v5840_v63 = vmul.f32 -1.442695, %v4782_v61 }
0x303c   : > { %6795 = vpow2.f32 %v5840_v63 }
0x3046   : > { %v6796_v1 = vpop.eup %6795 }
0x3047   : > { %v4786_v4 = vadd.f32 1.0, %v6796_v1 }
0x3049   : > { %6797 = vrcp.f32 %v4786_v4 }
0x3053   : > { %v6798_v26 = vpop.eup %6797 }
0x3054   : > { %v4795_v0 = vmul.f32 %v6798_v26, %v4676_v41  ;;  %v4804_v34 = vrot.slane %v6798_v26, 1 }
0x30ac   : > { %v4791_v7 = vpop.permute.xlu0 %4790 }
0x30ad   : > { %v4792_v8 = vrot.slane %v4791_v7, 1 }
0x30af   : > { %6799 = vtanh.f32 %v4792_v8 }
0x30b9   : > { %v6800_v31 = vpop.eup %6799 }
0x30ba   : > { %v4796_v9 = vmul.f32 %v6800_v31, %v6798_v26  ;;  %v5062_v26 = vld [vmem:[#allocation5 + $0x6] ss:$8 sm:$0x3]  ;;  %v5063_v31 = vld [vmem:[#allocation5 + $0x11] ss:$8 sm:$0x3] }
0x30bc   : > { %4798 = vrot.lane.b32.xlu1 %v4796_v9, %s6966_s29 }
0x312e   : > { %v4799_v5 = vpop.permute.xlu1 %4798 }
0x312f   : > { %v4801_v6 = vadd.f32 %v4799_v5, %v4795_v0  ;;  %v5064_v5 = vadd.f32 %v5063_v31, %v5062_v26 }
0x3131   : > { %6801 = vtanh.f32 %v4801_v6 }
0x313b   : > { %v6802_v10 = vpop.eup %6801 }
0x313c   : > { %4807 = vrot.lane.b32.xlu0 %v6802_v10, %s6966_s29 }
0x31ae   : > { %v4808_v37 = vpop.permute.xlu0 %4807 }
0x31af   : > { %v4810_v40 = vmul.f32 %v4808_v37, %v4804_v34 }
0x31b1   : > { %4811 = vst.msk [vmem:[#allocation6 + $0x3] sm:$0x1] %vm1575_vm4, %v4810_v40  ;;  %5841 = vmatmul.mubr.msk.f32.vlgmr.msra.gmra.mrb[38].mxu0 %vm1578_vm5, %v4810_v40 }
0x31b2   : > { %6395 = vmatpush1.bf16.msra.mxu0 %v7998_v57  ;;  %5132 = vmatprep.mubr.f32.mxu0 %v6961_v48 }
0x31b3   : > { %6397 = vmatprep.subr.bf16.mxu0 %v8000_v59 }
0x31b6   : > { %6399 = vmatpush1.bf16.msra.mxu0 %v8017_v2 }
0x31b7   : > { %6401 = vmatprep.subr.bf16.mxu0 %v8021_v3 }
0x31ba   : > { %6403 = vmatpush1.bf16.msra.mxu0 %v8039_v62 }
0x31bb   : > { %6405 = vmatprep.subr.bf16.mxu0 %v8042_v22 }
0x31be   : > { %6407 = vmatpush1.bf16.msra.mxu0 %v8053_v11 }
0x31bf   : > { %6424 = vmatprep.subr.bf16.mxu0 %v6960_v45 }
0x3284   : > { %v4884_v43 = vpop.f32.mrb[38].mxu0 }
0x3285   : > { %v4886_v47 = vpop.f32.mrb[39].mxu0 }
0x3286   : > { %v4891_v12 = vcombine.low %v4884_v43, %v4886_v47 }
0x3288   : > { %v4898_v16 = vrot.slane %v4891_v12, %v7557_v39 }
0x328a   : > { %v4905_v17 = vrot.slane %v4898_v16, %v7557_v39 }
0x328c   : > { %v4907_v18 = vadd.f32 %v4905_v17, %v4814_v36 }
0x328e   : > { %4915 = vrot.lane.b32.xlu1 %v4907_v18, %s6966_s29  ;;  %v5842_v19 = vmul.f32 -1.442695, %v4907_v18 }
0x3290   : > { %6803 = vpow2.f32 %v5842_v19 }
0x329a   : > { %v6804_v13 = vpop.eup %6803 }
0x329b   : > { %v4911_v25 = vadd.f32 1.0, %v6804_v13 }
0x329d   : > { %6805 = vrcp.f32 %v4911_v25 }
0x32a7   : > { %v6806_v29 = vpop.eup %6805 }
0x32a8   : > { %v4920_v23 = vmul.f32 %v6806_v29, %v4801_v6  ;;  %v4929_v32 = vrot.slane %v6806_v29, 1 }
0x3300   : > { %v4916_v15 = vpop.permute.xlu1 %4915 }
0x3301   : > { %v4917_v20 = vrot.slane %v4916_v15, 1 }
0x3303   : > { %6807 = vtanh.f32 %v4917_v20  ;;  %v5187_v20 = vld [vmem:[#allocation5 + $0x7] ss:$8 sm:$0x3] }
0x330d   : > { %v6808_v21 = vpop.eup %6807 }
0x330e   : > { %v4921_v28 = vmul.f32 %v6808_v21, %v6806_v29  ;;  %v5188_v29 = vld [vmem:[#allocation5 + $0x10] ss:$8 sm:$0x3] }
0x3310   : > { %4923 = vrot.lane.b32.xlu0 %v4921_v28, %s6966_s29 }
0x3382   : > { %v4924_v24 = vpop.permute.xlu0 %4923 }
0x3383   : > { %v4926_v27 = vadd.f32 %v4924_v24, %v4920_v23  ;;  %v5189_v23 = vadd.f32 %v5188_v29, %v5187_v20 }
0x3385   : > { %6809 = vtanh.f32 %v4926_v27 }
0x338f   : > { %v6810_v30 = vpop.eup %6809 }
0x3390   : > { %4932 = vrot.lane.b32.xlu1 %v6810_v30, %s6966_s29 }
0x3402   : > { %v4933_v33 = vpop.permute.xlu1 %4932 }
0x3403   : > { %v4935_v35 = vmul.f32 %v4933_v33, %v4929_v32 }
0x3405   : > { %4936 = vst.msk [vmem:[#allocation6 + $0x4] sm:$0x1] %vm1575_vm4, %v4935_v35  ;;  %5843 = vmatmul.mubr.msk.f32.vlgmr.msra.gmra.mrb[44].mxu1 %vm1578_vm5, %v4935_v35 }
0x3406   : > { %6411 = vmatpush1.bf16.msra.mxu1 %v7998_v57  ;;  %5257 = vmatprep.mubr.f32.mxu1 %v6961_v48 }
0x3407   : > { %6413 = vmatprep.subr.bf16.mxu1 %v8000_v59  ;;  %v4939_v59 = vadd.f32 %v4938_v46, %v4937_v44 }
0x340a   : > { %6415 = vmatpush1.bf16.msra.mxu1 %v8017_v2 }
0x340b   : > { %6417 = vmatprep.subr.bf16.mxu1 %v8021_v3 }
0x340c   : > { %v5322_v26 = vld [vmem:[#allocation6 + $0x4] sm:$0x1] }
0x340e   : > { %6419 = vmatpush1.bf16.msra.mxu1 %v8039_v62 }
0x340f   : > { %6421 = vmatprep.subr.bf16.mxu1 %v8042_v22 }
0x3412   : > { %6423 = vmatpush1.bf16.msra.mxu1 %v8053_v11 }
0x34d8   : > { %v5009_v38 = vpop.f32.mrb[44].mxu1 }
0x34d9   : > { %v5011_v41 = vpop.f32.mrb[45].mxu1 }
0x34da   : > { %v5016_v42 = vcombine.low %v5009_v38, %v5011_v41 }
0x34dc   : > { %v5023_v57 = vrot.slane %v5016_v42, %v7557_v39 }
0x34de   : > { %v5030_v49 = vrot.slane %v5023_v57, %v7557_v39  ;;  %v5332_v57 = vld [vmem:[%s8333_s12] sm:$0xff] }
0x34e0   : > { %v5032_v50 = vadd.f32 %v5030_v49, %v4939_v59  ;;  %v5333_v49 = vld [vmem:[%s8333_s12 + $0x8] sm:$0xff] }
0x34e1   : > { %v6425_v59 = vpack.c.bf16 %v5333_v49, %v5332_v57 }
0x34e2   : > { %5040 = vrot.lane.b32.xlu0 %v5032_v50, %s6966_s29  ;;  %v5844_v2 = vmul.f32 -1.442695, %v5032_v50  ;;  %v5334_v50 = vld [vmem:[%s8333_s12 + $0x10] sm:$0xff] }
0x34e4   : > { %6811 = vpow2.f32 %v5844_v2  ;;  %v5335_v2 = vld [vmem:[%s8333_s12 + $0x18] sm:$0xff] }
0x34ee   : > { %v6812_v3 = vpop.eup %6811 }
0x34ef   : > { %v5036_v62 = vadd.f32 1.0, %v6812_v3 }
0x34f1   : > { %6813 = vrcp.f32 %v5036_v62  ;;  %v6428_v62 = vpack.c.bf16 %v5335_v2, %v5334_v50 }
0x34fb   : > { %v6814_v11 = vpop.eup %6813 }
0x34fc   : > { %v5045_v55 = vmul.f32 %v6814_v11, %v4926_v27  ;;  %v5054_v61 = vrot.slane %v6814_v11, 1 }
0x3554   : > { %v5041_v22 = vpop.permute.xlu0 %5040 }
0x3555   : > { %v5042_v52 = vrot.slane %v5041_v22, 1  ;;  %v5336_v22 = vld [vmem:[%s8333_s12 + $0x20] sm:$0xff] }
0x3557   : > { %6815 = vtanh.f32 %v5042_v52  ;;  %v5337_v52 = vld [vmem:[%s8333_s12 + $0x28] sm:$0xff] }
0x3561   : > { %v6816_v53 = vpop.eup %6815 }
0x3562   : > { %v5046_v54 = vmul.f32 %v6816_v53, %v6814_v11  ;;  %v6431_v11 = vpack.c.bf16 %v5337_v52, %v5336_v22  ;;  %v5338_v53 = vld [vmem:[%s8333_s12 + $0x30] sm:$0xff] }
0x3564   : > { %5048 = vrot.lane.b32.xlu1 %v5046_v54, %s6966_s29  ;;  %v5339_v54 = vld [vmem:[%s8333_s12 + $0x38] sm:$0xff] }
0x35d6   : > { %v5049_v56 = vpop.permute.xlu1 %5048 }
0x35d7   : > { %v5051_v58 = vadd.f32 %v5049_v56, %v5045_v55  ;;  %v6434_v55 = vpack.c.bf16 %v5339_v54, %v5338_v53 }
0x35d9   : > { %6817 = vtanh.f32 %v5051_v58 }
0x35e3   : > { %v6818_v60 = vpop.eup %6817 }
0x35e4   : > { %5057 = vrot.lane.b32.xlu0 %v6818_v60, %s6966_s29 }
0x3656   : > { %v5058_v63 = vpop.permute.xlu0 %5057 }
0x3657   : > { %v5060_v1 = vmul.f32 %v5058_v63, %v5054_v61  ;;  %v5316_v61 = vld [vmem:[#allocation6 + $0x1] sm:$0x1]  ;;  %v5318_v63 = vld [vmem:[#allocation6 + $0x2] sm:$0x1] }
0x3659   : > { %5061 = vst.msk [vmem:[#allocation6 + $0x5] sm:$0x1] %vm1575_vm4, %v5060_v1  ;;  %5845 = vmatmul.mubr.msk.f32.vlgmr.msra.gmra.mrb[40].mxu0 %vm1578_vm5, %v5060_v1  ;;  %v5314_v1 = vld [vmem:[#allocation6] sm:$0x1] }
0x365a   : > { %6019 = vmatprep.mubr.msk.f32.mxu0 %vm6962_vm1, %v6961_v48  ;;  %6426 = vmatpush3.bf16.msra.mxu0 %v6425_v59 }
0x365b   : > { %6427 = vmatprep.subr.bf16.mxu0 %v6960_v45 }
0x365e   : > { %6429 = vmatpush3.bf16.msra.mxu0 %v6428_v62 }
0x365f   : > { %6430 = vmatprep.subr.bf16.mxu0 %v6960_v45 }
0x3660   : > { %v5324_v31 = vld [vmem:[#allocation6 + $0x5] sm:$0x1] }
0x3662   : > { %6432 = vmatpush3.bf16.msra.mxu0 %v6431_v11 }
0x3663   : > { %6433 = vmatprep.subr.bf16.mxu0 %v6960_v45 }
0x3666   : > { %6435 = vmatpush3.bf16.msra.mxu0 %v6434_v55 }
0x372c   : > { %v5134_v4 = vpop.f32.mrb[40].mxu0 }
0x372d   : > { %v5136_v7 = vpop.f32.mrb[41].mxu0 }
0x372e   : > { %v5141_v8 = vcombine.low %v5134_v4, %v5136_v7  ;;  %v5320_v4 = vld [vmem:[#allocation6 + $0x3] sm:$0x1] }
0x3730   : > { %v5148_v9 = vrot.slane %v5141_v8, %v7557_v39 }
0x3732   : > { %v5155_v0 = vrot.slane %v5148_v9, %v7557_v39 }
0x3734   : > { %v5157_v6 = vadd.f32 %v5155_v0, %v5064_v5 }
0x3736   : > { %5165 = vrot.lane.b32.xlu1 %v5157_v6, %s6966_s29  ;;  %v5846_v10 = vmul.f32 -1.442695, %v5157_v6 }
0x3738   : > { %6819 = vpow2.f32 %v5846_v10 }
0x3742   : > { %v6820_v34 = vpop.eup %6819 }
0x3743   : > { %v5161_v37 = vadd.f32 1.0, %v6820_v34 }
0x3745   : > { %6821 = vrcp.f32 %v5161_v37 }
0x374f   : > { %v6822_v48 = vpop.eup %6821 }
0x3750   : > { %v5170_v51 = vmul.f32 %v6822_v48, %v5051_v58  ;;  %v5179_v36 = vrot.slane %v6822_v48, 1 }
0x37a8   : > { %v5166_v40 = vpop.permute.xlu1 %5165 }
0x37a9   : > { %v5167_v43 = vrot.slane %v5166_v40, 1 }
0x37ab   : > { %6823 = vtanh.f32 %v5167_v43 }
0x37b5   : > { %v6824_v47 = vpop.eup %6823 }
0x37b6   : > { %v5171_v12 = vmul.f32 %v6824_v47, %v6822_v48 }
0x37b8   : > { %5173 = vrot.lane.b32.xlu0 %v5171_v12, %s6966_s29 }
0x382a   : > { %v5174_v14 = vpop.permute.xlu0 %5173 }
0x382b   : > { %v5176_v16 = vadd.f32 %v5174_v14, %v5170_v51 }
0x382d   : > { %6825 = vtanh.f32 %v5176_v16 }
0x3837   : > { %v6826_v17 = vpop.eup %6825 }
0x3838   : > { %5182 = vrot.lane.b32.xlu1 %v6826_v17, %s6966_s29 }
0x38aa   : > { %v5183_v18 = vpop.permute.xlu1 %5182 }
0x38ab   : > { %v5185_v19 = vmul.f32 %v5183_v18, %v5179_v36 }
0x38ad   : > { %5186 = vst.msk [vmem:[#allocation6 + $0x6] sm:$0x1] %vm1575_vm4, %v5185_v19  ;;  %5847 = vmatmul.mubr.msk.f32.vlgmr.msra.gmra.mrb[46].mxu1 %vm1578_vm5, %v5185_v19 }
0x38b4   : > { %v5326_v9 = vld [vmem:[#allocation6 + $0x6] sm:$0x1] }
0x3980   : > { %v5259_v13 = vpop.f32.mrb[46].mxu1 }
0x3981   : > { %v5261_v25 = vpop.f32.mrb[47].mxu1 }
0x3982   : > { %v5266_v15 = vcombine.low %v5259_v13, %v5261_v25 }
0x3984   : > { %v5273_v21 = vrot.slane %v5266_v15, %v7557_v39 }
0x3986   : > { %v5280_v28 = vrot.slane %v5273_v21, %v7557_v39 }
0x3988   : > { %v5282_v24 = vadd.f32 %v5280_v28, %v5189_v23 }
0x398a   : > { %5290 = vrot.lane.b32.xlu0 %v5282_v24, %s6966_s29  ;;  %v5848_v27 = vmul.f32 -1.442695, %v5282_v24 }
0x398c   : > { %6827 = vpow2.f32 %v5848_v27 }
0x3996   : > { %v6828_v30 = vpop.eup %6827 }
0x3997   : > { %v5286_v32 = vadd.f32 1.0, %v6828_v30 }
0x3999   : > { %6829 = vrcp.f32 %v5286_v32 }
0x39a3   : > { %v6830_v38 = vpop.eup %6829 }
0x39a4   : > { %v5295_v44 = vmul.f32 %v6830_v38, %v5176_v16  ;;  %v5304_v56 = vrot.slane %v6830_v38, 1 }
0x39fc   : > { %v5291_v33 = vpop.permute.xlu0 %5290 }
0x39fd   : > { %v5292_v35 = vrot.slane %v5291_v33, 1 }
0x39ff   : > { %6831 = vtanh.f32 %v5292_v35 }
0x3a09   : > { %v6832_v41 = vpop.eup %6831 }
0x3a0a   : > { %v5296_v42 = vmul.f32 %v6832_v41, %v6830_v38 }
0x3a0c   : > { %5298 = vrot.lane.b32.xlu1 %v5296_v42, %s6966_s29 }
0x3a7e   : > { %v5299_v46 = vpop.permute.xlu1 %5298 }
0x3a7f   : > { %v5301_v39 = vadd.f32 %v5299_v46, %v5295_v44 }
0x3a81   : > { %6833 = vtanh.f32 %v5301_v39 }
0x3a8b   : > { %v6834_v3 = vpop.eup %6833 }
0x3a8c   : > { %5307 = vrot.lane.b32.xlu0 %v6834_v3, %s6966_s29  ;;  %s539_s29 = scalar_lea.vmem [#allocation9], %s7501_s16 }
0x3a8d   : > { %s5451_s19 = sshll.u32 %s539_s29, 4  ;;  %s5452_s19 = int_to_ptr.vmem [resolvable:$true] %s5451_s19 }
0x3a8e   : > { %s6835_s21 = scalar_lea.vmem %s5452_s19, 16  ;;  %p6842_p0 = scmp.lt.s32.totalorder %s5452_s19, %s6840_s30 }
0x3a8f   : > { %p6836_p11 = scmp.ne.s32.totalorder %s5452_s19, %s6835_s21  ;;  %p6843_p1 = scmp.lt.s32.totalorder %s6841_s27, %s6835_s21 }
0x3a91   : > { %p6837_p12 = pnand %p6836_p11, %p7095_p5  ;;  %p6844_p2 = por %p6843_p1, %p6842_p0 }
0x3a93   : > { %p6838_p13 = pneg %p6837_p12 }
0x3a95   : > { %p6845_p3 = pnand %p6844_p2, %p6838_p13 }
0x3afe   : > { %v5308_v58 = vpop.permute.xlu0 %5307 }
0x3aff   : > { %v5310_v60 = vmul.f32 %v5308_v58, %v5304_v56 }
0x3b01   : > { %5311 = vst.msk [vmem:[#allocation6 + $0x7] sm:$0x1] %vm1575_vm4, %v5310_v60 }
0x3b08   : > { %v5312_v7 = vld [vmem:[#allocation6] sm:$0xff] }
0x3b09   : > { %v5328_v8 = vld [vmem:[#allocation6 + $0x7] sm:$0x1]  ;;  %5313 = vst.msk [vmem:[#allocation4] sm:$0xff] %vm1319_vm3, %v5312_v7 }
0x3b0a   : > { %5317 = vst.msk [vmem:[#allocation4 + $0x6] sm:$0x1] %vm2828_vm6, %v5316_v61  ;;  %5319 = vst.msk [vmem:[#allocation4 + $0x5] sm:$0x1] %vm2828_vm6, %v5318_v63 }
0x3b0b   : > { %5321 = vst.msk [vmem:[#allocation4 + $0x4] sm:$0x1] %vm2828_vm6, %v5320_v4  ;;  %5323 = vst.msk [vmem:[#allocation4 + $0x3] sm:$0x1] %vm2828_vm6, %v5322_v26 }
0x3b0c   : > { %5325 = vst.msk [vmem:[#allocation4 + $0x2] sm:$0x1] %vm2828_vm6, %v5324_v31  ;;  %5327 = vst.msk [vmem:[#allocation4 + $0x1] sm:$0x1] %vm2828_vm6, %v5326_v9 }
0x3b0d   : > { %5329 = vst.msk [vmem:[#allocation4] sm:$0x1] %vm2828_vm6, %v5328_v8  ;;  %5315 = vst.msk [vmem:[#allocation4 + $0x7] sm:$0x1] %vm2828_vm6, %v5314_v1 }
0x3b14   : > { %v5330_v45 = vld [vmem:[#allocation4 + $0x7] sm:$0x1] }
0x3b15   : > { %6020 = vmatmul.mubr.msk.f32.vlgmr.msra.gmra.mrb[42].mxu0 %vm1578_vm5, %v5330_v45  ;;  %5331 = vst.msk [vmem:[%s539_s29] sm:$0x1] %vm1575_vm4, %v5330_v45 }
0x3b16   : > { %6848 = shalt.err (!%p6845_p3)
}
0x3b17   : > { %s6849_s29 = scalar_lea.hbm %s8226_s18, 16  ;;  %s6853_s17 = scalar_lea.hbm %s8336_s15, 32 }
0x3b18   : > { %p6850_p4 = scmp.ne.s32.totalorder %s8226_s18, %s6849_s29  ;;  %p6854_p9 = scmp.lt.u32.totalorder %s8226_s18, %s8336_s15 }
0x3b19   : > { %p6855_p10 = scmp.lt.u32.totalorder %s6853_s17, %s6849_s29  ;;  %p6857_p12 = scmp.lt.u32.totalorder %s6849_s29, %s8226_s18 }
0x3b1a   : > { %p6851_p7 = pnand %p6850_p4, %p7095_p5 }
0x3b1b   : > { %p6856_p11 = por %p6855_p10, %p6854_p9 }
0x3b1c   : > { %p6852_p8 = pneg %p6851_p7 }
0x3b1d   : > { %p6858_p13 = por %p6857_p12, %p6856_p11 }
0x3b1f   : > { %p6859_p0 = pnand %p6858_p13, %p6852_p8 }
0x3b21   : > { %6862 = shalt.err (!%p6859_p0)
}
0x3b22   : > { %6441 = dma.vmem_to_hbm [thread:$0]  (%p7095_p5), %s5452_s19, 16, %s8226_s18, %s8228_s26  }
0x3b23   : > { %s5851_s21 = sshll.u32 %s7076_s25, 7  ;;  %s5438_s27 = sshll.u32 %s7510_s20, 4  ;;  %s5439_s27 = int_to_ptr.vmem [resolvable:$true] %s5438_s27 }
0x3b24   : > { %s8253_s17 = scalar_lea.hbm %s8335_s14, %s5851_s21  ;;  %s5417_s29 = scalar_lea.sflag [#allocation8], %s7501_s16 }
0x3b25   : > { %s6863_s23 = scalar_lea.vmem %s5439_s27, 128  ;;  %s6968_s30 = smov [#allocation7]  }
0x3b26   : > { %p6864_p1 = scmp.ne.s32.totalorder %s5439_s27, %s6863_s23  ;;  %s6867_s28 = sshll.u32 %s6968_s30, 4  ;;  %s6868_s28 = int_to_ptr.vmem [resolvable:$false] %s6867_s28 }
0x3b27   : > { %s6869_s1 = scalar_lea.vmem %s6868_s28, 256  ;;  %p6870_p4 = scmp.lt.s32.totalorder %s5439_s27, %s6868_s28 }
0x3b28   : > { %p6865_p2 = pnand %p6864_p1, %p7095_p5  ;;  %p6871_p7 = scmp.lt.s32.totalorder %s6869_s1, %s6863_s23 }
0x3b2a   : > { %p6866_p3 = pneg %p6865_p2  ;;  %p6872_p8 = por %p6871_p7, %p6870_p4 }
0x3b2c   : > { %p6873_p9 = pnand %p6872_p8, %p6866_p3 }
0x3b2e   : > { %6876 = shalt.err (!%p6873_p9)
}
0x3b2f   : > { %s6877_s20 = scalar_lea.hbm %s8253_s17, 128  ;;  %s6881_s21 = scalar_lea.hbm %s8335_s14, 256 }
0x3b30   : > { %p6878_p10 = scmp.ne.s32.totalorder %s8253_s17, %s6877_s20  ;;  %p6882_p13 = scmp.lt.u32.totalorder %s8253_s17, %s8335_s14 }
0x3b31   : > { %p6883_p0 = scmp.lt.u32.totalorder %s6881_s21, %s6877_s20  ;;  %p6885_p2 = scmp.lt.u32.totalorder %s6877_s20, %s8253_s17 }
0x3b32   : > { %p6879_p11 = pnand %p6878_p10, %p7095_p5 }
0x3b33   : > { %p6884_p1 = por %p6883_p0, %p6882_p13 }
0x3b34   : > { %p6880_p12 = pneg %p6879_p11 }
0x3b35   : > { %p6886_p3 = por %p6885_p2, %p6884_p1 }
0x3b37   : > { %p6887_p4 = pnand %p6886_p3, %p6880_p12 }
0x3b39   : > { %6890 = shalt.err (!%p6887_p4)
}
0x3b3a   : > { %6440 = dma.vmem_to_hbm [thread:$0]  (%p7095_p5), %s5439_s27, 128, %s8253_s17, %s5417_s29   ;;  %vm5414_vm7 = vcmask 65536  }
0x3b3b   : > { %s8366_s23 = sld [smem:[#allocation24_spill]]  ;;  %s545_s30 = scalar_lea.vmem [#allocation11], %s7501_s16 }
0x3b3c   : > { %s5464_s18 = sshll.u32 %s545_s30, 4  ;;  %s8367_s20 = sshll.u32 %s7076_s25, 4  ;;  %s5465_s18 = int_to_ptr.vmem [resolvable:$true] %s5464_s18 }
0x3b3d   : > { %s8368_s24 = sld [smem:[#allocation25_spill]]  ;;  %s6891_s3 = scalar_lea.vmem %s5465_s18, 16 }
0x3b3e   : > { %p6892_p7 = scmp.ne.s32.totalorder %s5465_s18, %s6891_s3  ;;  %s6969_s27 = smov [#allocation11]  }
0x3b3f   : > { %s6895_s16 = sshll.u32 %s6969_s27, 4  ;;  %s6896_s16 = int_to_ptr.vmem [resolvable:$false] %s6895_s16 }
0x3b40   : > { %p6893_p8 = pnand %p6892_p7, %p7095_p5  ;;  %s6897_s17 = scalar_lea.vmem %s6896_s16, 32 }
0x3b41   : > { %v5340_v0 = vld [vmem:[%s8366_s23] sm:$0x1]  ;;  %p6898_p10 = scmp.lt.s32.totalorder %s5465_s18, %s6896_s16  ;;  %p6899_p11 = scmp.lt.s32.totalorder %s6897_s17, %s6891_s3 }
0x3b42   : > { %p6894_p9 = pneg %p6893_p8 }
0x3b43   : > { %s8369_s28 = smov %s8368_s24  ;;  %s8282_s2 = scalar_lea.hbm %s8368_s24, %s8367_s20 }
0x3b44   : > { %p6900_p12 = por %p6899_p11, %p6898_p10 }
0x3b46   : > { %p6901_p13 = pnand %p6900_p12, %p6894_p9 }
0x3be8   : > { %v5410_v5 = vpop.f32.mrb[42].mxu0 }
0x3be9   : > { %v5411_v6 = vadd.f32 %v5410_v5, %v5340_v0  ;;  %v6021_v10 = vpop.f32.mrb[43].mxu0 }
0x3beb   : > { %5415 = vst.msk [vmem:[%s545_s30] sm:$0x1] %vm5414_vm7, %v5411_v6 }
0x3bec   : > { %6904 = shalt.err (!%p6901_p13)
}
0x3bed   : > { %s6905_s25 = scalar_lea.hbm %s8282_s2, 16  ;;  %s6909_s13 = scalar_lea.hbm %s8369_s28, 32 }
0x3bee   : > { %p6906_p0 = scmp.ne.s32.totalorder %s8282_s2, %s6905_s25  ;;  %p6910_p3 = scmp.lt.u32.totalorder %s8282_s2, %s8369_s28 }
0x3bef   : > { %p6911_p4 = scmp.lt.u32.totalorder %s6909_s13, %s6905_s25  ;;  %p6913_p8 = scmp.lt.u32.totalorder %s6905_s25, %s8282_s2 }
0x3bf0   : > { %p6907_p1 = pnand %p6906_p0, %p7095_p5 }
0x3bf1   : > { %p6912_p7 = por %p6911_p4, %p6910_p3 }
0x3bf2   : > { %p6908_p2 = pneg %p6907_p1 }
0x3bf3   : > { %p6914_p9 = por %p6913_p8, %p6912_p7 }
0x3bf5   : > { %p6915_p10 = pnand %p6914_p9, %p6908_p2 }
0x3bf7   : > { %6918 = shalt.err (!%p6915_p10)
}
0x3bf8   : > { %6442 = dma.vmem_to_hbm [thread:$0]  (%p7095_p5), %s5465_s18, 16, %s8282_s2, %s8228_s26  }
0x3bf9 PF: > { %s8370_s3 = sld [smem:[#allocation16_spill]]  ;;  %s8371_s20 = sld [smem:[#allocation14_spill]] }
0x3bff   : > { %p6456_p11 = scmp.ge.s32.totalorder %s8370_s3, 2  ;;  %s5476_s21 = sand.u32 1, %s8371_s20  }
0x3c00   : > { %s5477_s24 = scalar_lea.sflag [#allocation8], %s5476_s21 }
0x3c01   : > { %p6447_p12 = pnand %p6456_p11, %p7099_p6 }
0x3c03   : > { %6936 = dma.done.wait (!%p6447_p12), %s5477_s24, 128  }
0x3c04   : > { %6938 = vsyncadd (!%p6447_p12), %s5477_s24, 4294967168  ;;  %s8373_s27 = sadd.s32 4294967294, %s8370_s3  }
0x3c05   : > { %s5485_s16 = sand.u32 1, %s8373_s27  }
0x3c06   : > { %s5486_s17 = scalar_lea.sflag [#allocation10], %s5485_s16 }
0x3c07   : > { %6940 = dma.done.wait (!%p6447_p12), %s5486_s17, 32  }
0x3c08   : > { %6942 = vsyncadd (!%p6447_p12), %s5486_s17, 4294967264  ;;  %s8374_s24 = sld [smem:[#allocation17_spill]]  ;;  %s8375_s2 = sld [smem:[#allocation15_spill]] }
0x3c09   : > { %s8376_s23 = sld [smem:[#allocation18_spill]]  ;;  %s8377_s21 = smov %s6949_s22 }
0x3c0e   : > { %p30_p5 = scmp.ge.s32.totalorder %s8374_s24, 4   ;;  %s8378_s22 = smov %s8375_s2 }
0x3c10   :  { %32 = sbr.rel (!%p30_p5) target bundleno = 12 (0xc), region = 169 }
0x3c17   :  { %5498 = vsyncpa [#allocation8], 1 }
0x3c18   :  { %5500 = vsyncpa [#allocation8 + $0x1], 1 }
0x3c19   :  { %5501 = vsyncpa [#allocation10], 1 }
0x3c1a   :  { %5503 = vsyncpa [#allocation10 + $0x1], 1 }

</bundles_post_ra>
